<compile_context>
chip_gen: v7x
topology: tpu7x:2x2x1
jax: 0.10.0
libtpu: 0.0.40
codegen_flags: <defaults>
</compile_context>

<pallas_src>
import numpy as np
import jax
import jax.numpy as jnp
from jax import lax
from jax.experimental import pallas as pl
from jax.experimental.pallas import tpu as pltpu

C1, C2 = 32, 64          # conv1 / conv2 output channels (fixed by the module)


def _shift_rows(v, k):
    """Shift a 2-D value down by k rows (k < 0: up), zero-filling the gap."""
    if k == 0:
        return v
    r, c = v.shape
    zeros = jnp.zeros((abs(k), c), v.dtype)
    if k > 0:
        return jnp.concatenate([zeros, v[: r - k, :]], axis=0)
    kk = -k
    return jnp.concatenate([v[kk:, :], zeros], axis=0)


def _build_kernel(Bg, H, W):
    """Fused conv1+pool+relu -> conv2+pool+relu -> multiply -> fc -> sigmoid."""
    NB = 2 * Bg                 # merged (branch-paired) samples per grid block
    Hh, Hq = H // 2, H // 4     # spatial height after pool1 / pool2
    L1 = (W // 2) * C1          # 128 lanes: (pooled x, conv1 channel)
    L2 = (W // 4) * C2          # 128 lanes: (pooled x, conv2 channel)
    assert Hq == 2, "head split below assumes H == 8"

    def kernel(x_ref, w1_ref, w2_ref, b1_ref, b2_ref, wa_ref, wb_ref,
               b12_ref, o_ref):
        # ---- stage the (H, NB, W) input block as a 2-D (H*NB, W) slab,
        #      rows = (y, sample) ------------------------------------------
        xs = jnp.concatenate([x_ref[y] for y in range(H)], axis=0)

        # ---- conv1 (3x3, pad 1): horizontal taps + x-pool phase folded into
        #      banded weight columns; vertical taps are zero-padded row shifts
        c1 = None
        for oy in range(3):
            a = jnp.dot(xs, w1_ref[oy], preferred_element_type=jnp.float32)
            a = _shift_rows(a, (1 - oy) * NB)
            c1 = a if c1 is None else c1 + a
        xp1 = jnp.maximum(c1[:, :L1], c1[:, L1:])                 # pool over x
        y1 = jnp.concatenate(                                     # pool over y
            [jnp.maximum(xp1[(2 * h) * NB:(2 * h + 1) * NB, :],
                         xp1[(2 * h + 1) * NB:(2 * h + 2) * NB, :])
             for h in range(Hh)], axis=0)
        y1 = jnp.maximum(y1 + b1_ref[...], 0.0)                   # bias + relu
        # y1: (Hh*NB, L1), rows = (h, sample), lanes = (x, cin)

        # ---- conv2 (3x3, pad 1): same structure, K = 128 per matmul -------
        c2 = None
        for oy in range(3):
            a = jnp.dot(y1, w2_ref[oy], preferred_element_type=jnp.float32)
            a = _shift_rows(a, (1 - oy) * NB)
            c2 = a if c2 is None else c2 + a
        xp2 = jnp.maximum(c2[:, :L2], c2[:, L2:])
        y2 = jnp.concatenate(
            [jnp.maximum(xp2[(2 * h) * NB:(2 * h + 1) * NB, :],
                         xp2[(2 * h + 1) * NB:(2 * h + 2) * NB, :])
             for h in range(Hq)], axis=0)
        y2 = jnp.maximum(y2 + b2_ref[...], 0.0)
        # y2: (2*NB, L2), rows = (h, sample); sample < Bg -> branch1 else branch2

        # ---- head: branch multiply + folded fc1@fc2 (VPU multiply + lane
        #      reduction, no N=1 MXU matmul) + numerically stable sigmoid ---
        p0 = y2[0 * Bg:1 * Bg, :] * y2[1 * Bg:2 * Bg, :]          # h = 0 feats
        p1 = y2[2 * Bg:3 * Bg, :] * y2[3 * Bg:4 * Bg, :]          # h = 1 feats
        z = jnp.sum(p0 * wa_ref[...] + p1 * wb_ref[...],
                    axis=1, keepdims=True) + b12_ref[...]
        ez = jnp.exp(-jnp.abs(z))                 # in (0, 1] -> never overflows
        o_ref[...] = jnp.where(z >= 0.0, 1.0, ez) / (1.0 + ez)

    return kernel


def prepare_params(conv1_w, conv1_b, conv2_w, conv2_b,
                   fc1_w, fc1_b, fc2_w, fc2_b, H, W):
    """One-off (eager) re-layout of the torch parameters into banded matrices."""
    w1 = np.asarray(conv1_w)            # (C1, 1, 3, 3)  torch OIHW
    w2 = np.asarray(conv2_w)            # (C2, C1, 3, 3)
    Wp1, Ws2, Wp2 = W // 2, W // 2, W // 4

    # conv1 banded matrices: (3, W, 2*Wp1*C1); columns ordered (x-phase, x, c)
    W1big = np.zeros((3, W, 2 * Wp1 * C1), np.float32)
    for oy in range(3):
        for xsrc in range(W):
            for px in range(2):
                for xx in range(Wp1):
                    ox = xsrc - (2 * xx + px) + 1
                    if 0 <= ox <= 2:
                        col = px * Wp1 * C1 + xx * C1
                        W1big[oy, xsrc, col:col + C1] = w1[:, 0, oy, ox]

    # conv2 banded matrices: rows = (x, cin), cols = (x-phase, x, cout)
    W2big = np.zeros((3, Ws2 * C1, 2 * Wp2 * C2), np.float32)
    for oy in range(3):
        for xsrc in range(Ws2):
            for px in range(2):
                for ww in range(Wp2):
                    ox = xsrc - (2 * ww + px) + 1
                    if 0 <= ox <= 2:
                        r0 = xsrc * C1
                        c0 = px * Wp2 * C2 + ww * C2
                        W2big[oy, r0:r0 + C1, c0:c0 + C2] = w2[:, :, oy, ox].T

    b1row = np.tile(np.asarray(conv1_b), Wp1).reshape(1, Wp1 * C1)
    b2row = np.tile(np.asarray(conv2_b), Wp2).reshape(1, Wp2 * C2)

    # fc1 @ fc2 fold (no activation between them in the torch module); permute
    # fc1's input axis from torch's (c, h, w) NCHW flatten to our (h, w, c).
    f1 = np.asarray(fc1_w)              # (128, 4*H*W)
    f2 = np.asarray(fc2_w)              # (1, 128)
    Hq, Wq = H // 4, W // 4
    w12_t = f1.T @ f2.T                 # (4*H*W, 1), torch feature order (c,h,w)
    w12 = w12_t.reshape(C2, Hq, Wq).transpose(1, 2, 0).reshape(Hq, Wq * C2)
    b12 = np.asarray(fc1_b) @ f2.T + np.asarray(fc2_b)           # (1,)
    assert Hq == 2, "head split assumes H == 8 (two pooled rows)"
    w12a, w12b = w12[0:1], w12[1:2]                              # (1, 128) each

    return tuple(jnp.asarray(a, jnp.float32) for a in
                 (W1big, W2big, b1row, b2row, w12a, w12b,
                  np.asarray(b12, np.float32).reshape(1, 1)))


def pick_sample_split(batch):
    # v7x has two TensorCores per chip -> split the sample axis across them.
    # Single-TC v5e / v6e keep grid=(1,): no pointless extra grid step.
    try:
        kind = jax.devices()[0].device_kind.lower()
    except Exception:
        kind = ""
    split = 2 if ("v7" in kind or "tpu7" in kind) else 1
    if batch % split or (batch // split) % 8:
        split = 1
    return split


def build_forward(params, B, H, W, sample_split):
    assert H == 8 and W == 8
    W1big, W2big, b1row, b2row, w12a, w12b, b12 = params
    G = sample_split
    Bg = B // G
    NB = 2 * Bg

    grid_spec = pltpu.PrefetchScalarGridSpec(
        num_scalar_prefetch=0,
        grid=(G,),
        in_specs=[
            pl.BlockSpec((H, NB, W), lambda g: (0, g, 0)),   # (y, sample, x)
            pl.BlockSpec(W1big.shape, lambda g: (0, 0, 0)),
            pl.BlockSpec(W2big.shape, lambda g: (0, 0, 0)),
            pl.BlockSpec(b1row.shape, lambda g: (0, 0)),
            pl.BlockSpec(b2row.shape, lambda g: (0, 0)),
            pl.BlockSpec(w12a.shape, lambda g: (0, 0)),
            pl.BlockSpec(w12b.shape, lambda g: (0, 0)),
            pl.BlockSpec(b12.shape, lambda g: (0, 0)),
        ],
        out_specs=pl.BlockSpec((Bg, 1), lambda g: (g, 0)),
    )
    fused = pl.pallas_call(
        _build_kernel(Bg, H, W),
        out_shape=jax.ShapeDtypeStruct((B, 1), jnp.float32),
        grid_spec=grid_spec,
        compiler_params=pltpu.CompilerParams(
            dimension_semantics=("parallel",)),
    )

    def forward(inputs1, inputs2):
        # NCHW (B,1,H,W) -> merged (y, sample, x) slab.
        # Merged sample order = (grid block, branch, local sample) so each grid
        # block holds both branches of its samples (branch multiply stays local).
        x1 = inputs1.reshape(G, Bg, H, W)
        x2 = inputs2.reshape(G, Bg, H, W)
        xm = jnp.concatenate([x1, x2], axis=1).reshape(2 * B, H, W)
        xm = jnp.transpose(xm, (1, 0, 2))                        # (H, 2B, W)
        return fused(xm, W1big, W2big, b1row, b2row, w12a, w12b, b12)

    return forward


def reference_forward(x1, x2, conv1_w, conv1_b, conv2_w, conv2_b,
                      fc1_w, fc1_b, fc2_w, fc2_b):
    """Pure-JAX re-implementation of the torch module, for verification."""
    hp = lax.Precision.HIGHEST

    def pool2(y):
        n, c, h, w = y.shape
        return jnp.max(y.reshape(n, c, h // 2, 2, w // 2, 2), axis=(3, 5))

    def block(x, w, b):
        y = lax.conv_general_dilated(
            x, w, (1, 1), ((1, 1), (1, 1)),
            dimension_numbers=("NCHW", "OIHW", "NCHW"), precision=hp)
        return jnp.maximum(pool2(y + b[None, :, None, None]), 0.0)

    def branch(x):
        return block(block(x, conv1_w, conv1_b), conv2_w, conv2_b)

    v = (branch(x1) * branch(x2)).reshape(x1.shape[0], -1)
    h = jnp.dot(v, fc1_w.T, precision=hp) + fc1_b
    z = jnp.dot(h, fc2_w.T, precision=hp) + fc2_b
    return jax.nn.sigmoid(z)


if __name__ == "__main__":
    B, H, W = 32, 8, 8          # torch's .view() requires 128 // B == 4
    assert 128 // B == 4 and H == 8 and W == 8

    key = jax.random.PRNGKey(0)
    ks = jax.random.split(key, 10)
    inputs1 = jax.random.normal(ks[0], (B, 1, H, W), jnp.float32)
    inputs2 = jax.random.normal(ks[1], (B, 1, H, W), jnp.float32)

    # Deterministic synthetic parameters in PyTorch layouts
    conv1_w = 0.05 * jax.random.normal(ks[2], (C1, 1, 3, 3), jnp.float32)
    conv1_b = 0.05 * jax.random.normal(ks[3], (C1,), jnp.float32)
    conv2_w = 0.05 * jax.random.normal(ks[4], (C2, C1, 3, 3), jnp.float32)
    conv2_b = 0.05 * jax.random.normal(ks[5], (C2,), jnp.float32)
    fc1_w = 0.05 * jax.random.normal(ks[6], (128, 4 * H * W), jnp.float32)
    fc1_b = 0.05 * jax.random.normal(ks[7], (128,), jnp.float32)
    fc2_w = 0.05 * jax.random.normal(ks[8], (1, 128), jnp.float32)
    fc2_b = 0.05 * jax.random.normal(ks[9], (1,), jnp.float32)

    params = prepare_params(conv1_w, conv1_b, conv2_w, conv2_b,
                            fc1_w, fc1_b, fc2_w, fc2_b, H, W)
    split = pick_sample_split(B)
    forward = jax.jit(build_forward(params, B, H, W, split))

    out = jax.block_until_ready(forward(inputs1, inputs2))
    assert out.shape == (B, 1), out.shape
    assert bool(jnp.all(jnp.isfinite(out)))
    assert bool(jnp.all((out > 0.0) & (out < 1.0)))   # sigmoid range

    ref = reference_forward(inputs1, inputs2, conv1_w, conv1_b, conv2_w,
                            conv2_b, fc1_w, fc1_b, fc2_w, fc2_b)
    np.testing.assert_allclose(np.asarray(out), np.asarray(ref),
                               rtol=5e-3, atol=5e-3)
    print("KERNEL_OK")
</pallas_src>

<mosaic_0001>
module attributes {stable_mosaic.version = 11 : i64} {
  func.func @kernel(%arg0: i32, %arg1: memref<8x64x8xf32, #tpu.memory_space<vmem>>, %arg2: memref<3x8x256xf32, #tpu.memory_space<vmem>>, %arg3: memref<3x128x256xf32, #tpu.memory_space<vmem>>, %arg4: memref<1x128xf32, #tpu.memory_space<vmem>>, %arg5: memref<1x128xf32, #tpu.memory_space<vmem>>, %arg6: memref<1x128xf32, #tpu.memory_space<vmem>>, %arg7: memref<1x128xf32, #tpu.memory_space<vmem>>, %arg8: memref<1x1xf32, #tpu.memory_space<vmem>>, %arg9: memref<32x1xf32, #tpu.memory_space<vmem>>) attributes {dimension_semantics = [#tpu.dimension_semantics<parallel>], iteration_bounds = array<i64: 1>, scalar_prefetch = 0 : i64, scratch_operands = 0 : i64, tpu.core_type = #tpu.core_type<tc>, window_params = [{transform_indices = @transform_0, window_bounds = array<i64: 8, 64, 8>}, {pipeline_mode = #tpu.pipeline_mode<synchronous>, transform_indices = @transform_1, window_bounds = array<i64: 3, 8, 256>}, {pipeline_mode = #tpu.pipeline_mode<synchronous>, transform_indices = @transform_2, window_bounds = array<i64: 3, 128, 256>}, {pipeline_mode = #tpu.pipeline_mode<synchronous>, transform_indices = @transform_3, window_bounds = array<i64: 1, 128>}, {pipeline_mode = #tpu.pipeline_mode<synchronous>, transform_indices = @transform_4, window_bounds = array<i64: 1, 128>}, {pipeline_mode = #tpu.pipeline_mode<synchronous>, transform_indices = @transform_5, window_bounds = array<i64: 1, 128>}, {pipeline_mode = #tpu.pipeline_mode<synchronous>, transform_indices = @transform_6, window_bounds = array<i64: 1, 128>}, {pipeline_mode = #tpu.pipeline_mode<synchronous>, transform_indices = @transform_7, window_bounds = array<i64: 1, 1>}, {transform_indices = @transform_8, window_bounds = array<i64: 32, 1>}]} {
    %c0 = arith.constant 0 : index
    %c0_0 = arith.constant 0 : index
    %c0_1 = arith.constant 0 : index
    %0 = vector.load %arg1[%c0, %c0_0, %c0_1] : memref<8x64x8xf32, #tpu.memory_space<vmem>>, vector<1x64x8xf32>
    %1 = vector.shape_cast %0 : vector<1x64x8xf32> to vector<64x8xf32>
    %c1 = arith.constant 1 : index
    %c0_2 = arith.constant 0 : index
    %c0_3 = arith.constant 0 : index
    %2 = vector.load %arg1[%c1, %c0_2, %c0_3] : memref<8x64x8xf32, #tpu.memory_space<vmem>>, vector<1x64x8xf32>
    %3 = vector.shape_cast %2 : vector<1x64x8xf32> to vector<64x8xf32>
    %c2 = arith.constant 2 : index
    %c0_4 = arith.constant 0 : index
    %c0_5 = arith.constant 0 : index
    %4 = vector.load %arg1[%c2, %c0_4, %c0_5] : memref<8x64x8xf32, #tpu.memory_space<vmem>>, vector<1x64x8xf32>
    %5 = vector.shape_cast %4 : vector<1x64x8xf32> to vector<64x8xf32>
    %c3 = arith.constant 3 : index
    %c0_6 = arith.constant 0 : index
    %c0_7 = arith.constant 0 : index
    %6 = vector.load %arg1[%c3, %c0_6, %c0_7] : memref<8x64x8xf32, #tpu.memory_space<vmem>>, vector<1x64x8xf32>
    %7 = vector.shape_cast %6 : vector<1x64x8xf32> to vector<64x8xf32>
    %c4 = arith.constant 4 : index
    %c0_8 = arith.constant 0 : index
    %c0_9 = arith.constant 0 : index
    %8 = vector.load %arg1[%c4, %c0_8, %c0_9] : memref<8x64x8xf32, #tpu.memory_space<vmem>>, vector<1x64x8xf32>
    %9 = vector.shape_cast %8 : vector<1x64x8xf32> to vector<64x8xf32>
    %c5 = arith.constant 5 : index
    %c0_10 = arith.constant 0 : index
    %c0_11 = arith.constant 0 : index
    %10 = vector.load %arg1[%c5, %c0_10, %c0_11] : memref<8x64x8xf32, #tpu.memory_space<vmem>>, vector<1x64x8xf32>
    %11 = vector.shape_cast %10 : vector<1x64x8xf32> to vector<64x8xf32>
    %c6 = arith.constant 6 : index
    %c0_12 = arith.constant 0 : index
    %c0_13 = arith.constant 0 : index
    %12 = vector.load %arg1[%c6, %c0_12, %c0_13] : memref<8x64x8xf32, #tpu.memory_space<vmem>>, vector<1x64x8xf32>
    %13 = vector.shape_cast %12 : vector<1x64x8xf32> to vector<64x8xf32>
    %c7 = arith.constant 7 : index
    %c0_14 = arith.constant 0 : index
    %c0_15 = arith.constant 0 : index
    %14 = vector.load %arg1[%c7, %c0_14, %c0_15] : memref<8x64x8xf32, #tpu.memory_space<vmem>>, vector<1x64x8xf32>
    %15 = vector.shape_cast %14 : vector<1x64x8xf32> to vector<64x8xf32>
    %16 = tpu.concatenate %1, %3, %5, %7, %9, %11, %13, %15 in 0 : vector<64x8xf32>, vector<64x8xf32>, vector<64x8xf32>, vector<64x8xf32>, vector<64x8xf32>, vector<64x8xf32>, vector<64x8xf32>, vector<64x8xf32> -> vector<512x8xf32>
    %c0_16 = arith.constant 0 : index
    %c0_17 = arith.constant 0 : index
    %c0_18 = arith.constant 0 : index
    %17 = vector.load %arg2[%c0_16, %c0_17, %c0_18] : memref<3x8x256xf32, #tpu.memory_space<vmem>>, vector<1x8x256xf32>
    %18 = vector.shape_cast %17 : vector<1x8x256xf32> to vector<8x256xf32>
    %cst = arith.constant dense<0.000000e+00> : vector<512x256xf32>
    %19 = tpu.matmul %16, %18, %cst {dimension_numbers = #tpu.dot_dimension_numbers<[1], [0], [0], [1], [0, 0, 1, 1], [], []>} : vector<512x8xf32>, vector<8x256xf32>, vector<512x256xf32> -> vector<512x256xf32>
    %cst_19 = arith.constant 0.000000e+00 : f32
    %20 = vector.broadcast %cst_19 : f32 to vector<64x256xf32>
    %21 = vector.extract_strided_slice %19 {offsets = [0, 0], sizes = [448, 256], strides = [1, 1]} : vector<512x256xf32> to vector<448x256xf32>
    %22 = tpu.concatenate %20, %21 in 0 : vector<64x256xf32>, vector<448x256xf32> -> vector<512x256xf32>
    %c1_20 = arith.constant 1 : index
    %c0_21 = arith.constant 0 : index
    %c0_22 = arith.constant 0 : index
    %23 = vector.load %arg2[%c1_20, %c0_21, %c0_22] : memref<3x8x256xf32, #tpu.memory_space<vmem>>, vector<1x8x256xf32>
    %24 = vector.shape_cast %23 : vector<1x8x256xf32> to vector<8x256xf32>
    %cst_23 = arith.constant dense<0.000000e+00> : vector<512x256xf32>
    %25 = tpu.matmul %16, %24, %cst_23 {dimension_numbers = #tpu.dot_dimension_numbers<[1], [0], [0], [1], [0, 0, 1, 1], [], []>} : vector<512x8xf32>, vector<8x256xf32>, vector<512x256xf32> -> vector<512x256xf32>
    %26 = arith.addf %22, %25 : vector<512x256xf32>
    %c2_24 = arith.constant 2 : index
    %c0_25 = arith.constant 0 : index
    %c0_26 = arith.constant 0 : index
    %27 = vector.load %arg2[%c2_24, %c0_25, %c0_26] : memref<3x8x256xf32, #tpu.memory_space<vmem>>, vector<1x8x256xf32>
    %28 = vector.shape_cast %27 : vector<1x8x256xf32> to vector<8x256xf32>
    %cst_27 = arith.constant dense<0.000000e+00> : vector<512x256xf32>
    %29 = tpu.matmul %16, %28, %cst_27 {dimension_numbers = #tpu.dot_dimension_numbers<[1], [0], [0], [1], [0, 0, 1, 1], [], []>} : vector<512x8xf32>, vector<8x256xf32>, vector<512x256xf32> -> vector<512x256xf32>
    %cst_28 = arith.constant 0.000000e+00 : f32
    %30 = vector.broadcast %cst_28 : f32 to vector<64x256xf32>
    %31 = vector.extract_strided_slice %29 {offsets = [64, 0], sizes = [448, 256], strides = [1, 1]} : vector<512x256xf32> to vector<448x256xf32>
    %32 = tpu.concatenate %31, %30 in 0 : vector<448x256xf32>, vector<64x256xf32> -> vector<512x256xf32>
    %33 = arith.addf %26, %32 : vector<512x256xf32>
    %34 = vector.extract_strided_slice %33 {offsets = [0, 0], sizes = [512, 128], strides = [1, 1]} : vector<512x256xf32> to vector<512x128xf32>
    %35 = vector.extract_strided_slice %33 {offsets = [0, 128], sizes = [512, 128], strides = [1, 1]} : vector<512x256xf32> to vector<512x128xf32>
    %36 = arith.maximumf %34, %35 : vector<512x128xf32>
    %37 = vector.extract_strided_slice %36 {offsets = [0, 0], sizes = [64, 128], strides = [1, 1]} : vector<512x128xf32> to vector<64x128xf32>
    %38 = vector.extract_strided_slice %36 {offsets = [64, 0], sizes = [64, 128], strides = [1, 1]} : vector<512x128xf32> to vector<64x128xf32>
    %39 = arith.maximumf %37, %38 : vector<64x128xf32>
    %40 = vector.extract_strided_slice %36 {offsets = [128, 0], sizes = [64, 128], strides = [1, 1]} : vector<512x128xf32> to vector<64x128xf32>
    %41 = vector.extract_strided_slice %36 {offsets = [192, 0], sizes = [64, 128], strides = [1, 1]} : vector<512x128xf32> to vector<64x128xf32>
    %42 = arith.maximumf %40, %41 : vector<64x128xf32>
    %43 = vector.extract_strided_slice %36 {offsets = [256, 0], sizes = [64, 128], strides = [1, 1]} : vector<512x128xf32> to vector<64x128xf32>
    %44 = vector.extract_strided_slice %36 {offsets = [320, 0], sizes = [64, 128], strides = [1, 1]} : vector<512x128xf32> to vector<64x128xf32>
    %45 = arith.maximumf %43, %44 : vector<64x128xf32>
    %46 = vector.extract_strided_slice %36 {offsets = [384, 0], sizes = [64, 128], strides = [1, 1]} : vector<512x128xf32> to vector<64x128xf32>
    %47 = vector.extract_strided_slice %36 {offsets = [448, 0], sizes = [64, 128], strides = [1, 1]} : vector<512x128xf32> to vector<64x128xf32>
    %48 = arith.maximumf %46, %47 : vector<64x128xf32>
    %49 = tpu.concatenate %39, %42, %45, %48 in 0 : vector<64x128xf32>, vector<64x128xf32>, vector<64x128xf32>, vector<64x128xf32> -> vector<256x128xf32>
    %c0_29 = arith.constant 0 : index
    %c0_30 = arith.constant 0 : index
    %50 = vector.load %arg4[%c0_29, %c0_30] : memref<1x128xf32, #tpu.memory_space<vmem>>, vector<1x128xf32>
    %51 = vector.broadcast %50 : vector<1x128xf32> to vector<256x128xf32>
    %52 = arith.addf %49, %51 : vector<256x128xf32>
    %cst_31 = arith.constant 0.000000e+00 : f32
    %53 = vector.broadcast %cst_31 : f32 to vector<256x128xf32>
    %54 = arith.maximumf %52, %53 : vector<256x128xf32>
    %c0_32 = arith.constant 0 : index
    %c0_33 = arith.constant 0 : index
    %c0_34 = arith.constant 0 : index
    %55 = vector.load %arg3[%c0_32, %c0_33, %c0_34] : memref<3x128x256xf32, #tpu.memory_space<vmem>>, vector<1x128x256xf32>
    %56 = vector.shape_cast %55 : vector<1x128x256xf32> to vector<128x256xf32>
    %cst_35 = arith.constant dense<0.000000e+00> : vector<256x256xf32>
    %57 = tpu.matmul %54, %56, %cst_35 {dimension_numbers = #tpu.dot_dimension_numbers<[1], [0], [0], [1], [0, 0, 1, 1], [], []>} : vector<256x128xf32>, vector<128x256xf32>, vector<256x256xf32> -> vector<256x256xf32>
    %cst_36 = arith.constant 0.000000e+00 : f32
    %58 = vector.broadcast %cst_36 : f32 to vector<64x256xf32>
    %59 = vector.extract_strided_slice %57 {offsets = [0, 0], sizes = [192, 256], strides = [1, 1]} : vector<256x256xf32> to vector<192x256xf32>
    %60 = tpu.concatenate %58, %59 in 0 : vector<64x256xf32>, vector<192x256xf32> -> vector<256x256xf32>
    %c1_37 = arith.constant 1 : index
    %c0_38 = arith.constant 0 : index
    %c0_39 = arith.constant 0 : index
    %61 = vector.load %arg3[%c1_37, %c0_38, %c0_39] : memref<3x128x256xf32, #tpu.memory_space<vmem>>, vector<1x128x256xf32>
    %62 = vector.shape_cast %61 : vector<1x128x256xf32> to vector<128x256xf32>
    %cst_40 = arith.constant dense<0.000000e+00> : vector<256x256xf32>
    %63 = tpu.matmul %54, %62, %cst_40 {dimension_numbers = #tpu.dot_dimension_numbers<[1], [0], [0], [1], [0, 0, 1, 1], [], []>} : vector<256x128xf32>, vector<128x256xf32>, vector<256x256xf32> -> vector<256x256xf32>
    %64 = arith.addf %60, %63 : vector<256x256xf32>
    %c2_41 = arith.constant 2 : index
    %c0_42 = arith.constant 0 : index
    %c0_43 = arith.constant 0 : index
    %65 = vector.load %arg3[%c2_41, %c0_42, %c0_43] : memref<3x128x256xf32, #tpu.memory_space<vmem>>, vector<1x128x256xf32>
    %66 = vector.shape_cast %65 : vector<1x128x256xf32> to vector<128x256xf32>
    %cst_44 = arith.constant dense<0.000000e+00> : vector<256x256xf32>
    %67 = tpu.matmul %54, %66, %cst_44 {dimension_numbers = #tpu.dot_dimension_numbers<[1], [0], [0], [1], [0, 0, 1, 1], [], []>} : vector<256x128xf32>, vector<128x256xf32>, vector<256x256xf32> -> vector<256x256xf32>
    %cst_45 = arith.constant 0.000000e+00 : f32
    %68 = vector.broadcast %cst_45 : f32 to vector<64x256xf32>
    %69 = vector.extract_strided_slice %67 {offsets = [64, 0], sizes = [192, 256], strides = [1, 1]} : vector<256x256xf32> to vector<192x256xf32>
    %70 = tpu.concatenate %69, %68 in 0 : vector<192x256xf32>, vector<64x256xf32> -> vector<256x256xf32>
    %71 = arith.addf %64, %70 : vector<256x256xf32>
    %72 = vector.extract_strided_slice %71 {offsets = [0, 0], sizes = [256, 128], strides = [1, 1]} : vector<256x256xf32> to vector<256x128xf32>
    %73 = vector.extract_strided_slice %71 {offsets = [0, 128], sizes = [256, 128], strides = [1, 1]} : vector<256x256xf32> to vector<256x128xf32>
    %74 = arith.maximumf %72, %73 : vector<256x128xf32>
    %75 = vector.extract_strided_slice %74 {offsets = [0, 0], sizes = [64, 128], strides = [1, 1]} : vector<256x128xf32> to vector<64x128xf32>
    %76 = vector.extract_strided_slice %74 {offsets = [64, 0], sizes = [64, 128], strides = [1, 1]} : vector<256x128xf32> to vector<64x128xf32>
    %77 = arith.maximumf %75, %76 : vector<64x128xf32>
    %78 = vector.extract_strided_slice %74 {offsets = [128, 0], sizes = [64, 128], strides = [1, 1]} : vector<256x128xf32> to vector<64x128xf32>
    %79 = vector.extract_strided_slice %74 {offsets = [192, 0], sizes = [64, 128], strides = [1, 1]} : vector<256x128xf32> to vector<64x128xf32>
    %80 = arith.maximumf %78, %79 : vector<64x128xf32>
    %81 = tpu.concatenate %77, %80 in 0 : vector<64x128xf32>, vector<64x128xf32> -> vector<128x128xf32>
    %c0_46 = arith.constant 0 : index
    %c0_47 = arith.constant 0 : index
    %82 = vector.load %arg5[%c0_46, %c0_47] : memref<1x128xf32, #tpu.memory_space<vmem>>, vector<1x128xf32>
    %83 = vector.broadcast %82 : vector<1x128xf32> to vector<128x128xf32>
    %84 = arith.addf %81, %83 : vector<128x128xf32>
    %cst_48 = arith.constant 0.000000e+00 : f32
    %85 = vector.broadcast %cst_48 : f32 to vector<128x128xf32>
    %86 = arith.maximumf %84, %85 : vector<128x128xf32>
    %87 = vector.extract_strided_slice %86 {offsets = [0, 0], sizes = [32, 128], strides = [1, 1]} : vector<128x128xf32> to vector<32x128xf32>
    %88 = vector.extract_strided_slice %86 {offsets = [32, 0], sizes = [32, 128], strides = [1, 1]} : vector<128x128xf32> to vector<32x128xf32>
    %89 = arith.mulf %87, %88 : vector<32x128xf32>
    %90 = vector.extract_strided_slice %86 {offsets = [64, 0], sizes = [32, 128], strides = [1, 1]} : vector<128x128xf32> to vector<32x128xf32>
    %91 = vector.extract_strided_slice %86 {offsets = [96, 0], sizes = [32, 128], strides = [1, 1]} : vector<128x128xf32> to vector<32x128xf32>
    %92 = arith.mulf %90, %91 : vector<32x128xf32>
    %c0_49 = arith.constant 0 : index
    %c0_50 = arith.constant 0 : index
    %93 = vector.load %arg6[%c0_49, %c0_50] : memref<1x128xf32, #tpu.memory_space<vmem>>, vector<1x128xf32>
    %94 = vector.broadcast %93 : vector<1x128xf32> to vector<32x128xf32>
    %95 = arith.mulf %89, %94 : vector<32x128xf32>
    %c0_51 = arith.constant 0 : index
    %c0_52 = arith.constant 0 : index
    %96 = vector.load %arg7[%c0_51, %c0_52] : memref<1x128xf32, #tpu.memory_space<vmem>>, vector<1x128xf32>
    %97 = vector.broadcast %96 : vector<1x128xf32> to vector<32x128xf32>
    %98 = arith.mulf %92, %97 : vector<32x128xf32>
    %99 = arith.addf %95, %98 : vector<32x128xf32>
    %cst_53 = arith.constant dense<0.000000e+00> : vector<32xf32>
    %100 = vector.multi_reduction <add>, %99, %cst_53 [1] : vector<32x128xf32> to vector<32xf32>
    %101 = vector.shape_cast %100 : vector<32xf32> to vector<32x1xf32>
    %c0_54 = arith.constant 0 : index
    %c0_55 = arith.constant 0 : index
    %102 = vector.load %arg8[%c0_54, %c0_55] : memref<1x1xf32, #tpu.memory_space<vmem>>, vector<1x1xf32>
    %103 = vector.broadcast %102 : vector<1x1xf32> to vector<32x1xf32>
    %104 = arith.addf %101, %103 : vector<32x1xf32>
    %105 = math.absf %104 : vector<32x1xf32>
    %cst_56 = arith.constant 0.000000e+00 : f32
    %106 = vector.broadcast %cst_56 : f32 to vector<32x1xf32>
    %107 = arith.subf %106, %105 : vector<32x1xf32>
    %108 = math.exp %107 : vector<32x1xf32>
    %cst_57 = arith.constant 0.000000e+00 : f32
    %109 = vector.broadcast %cst_57 : f32 to vector<32x1xf32>
    %110 = arith.cmpf oge, %104, %109 : vector<32x1xf32>
    %cst_58 = arith.constant 1.000000e+00 : f32
    %111 = vector.broadcast %cst_58 : f32 to vector<32x1xf32>
    %112 = arith.select %110, %111, %108 : vector<32x1xi1>, vector<32x1xf32>
    %cst_59 = arith.constant 1.000000e+00 : f32
    %113 = vector.broadcast %cst_59 : f32 to vector<32x1xf32>
    %114 = arith.addf %113, %108 : vector<32x1xf32>
    %115 = arith.divf %112, %114 : vector<32x1xf32>
    %c0_60 = arith.constant 0 : index
    %c0_61 = arith.constant 0 : index
    %116 = vector.load %arg9[%c0_60, %c0_61] : memref<32x1xf32, #tpu.memory_space<vmem>>, vector<32x1xf32>
    tpu.vector_store %arg9[%c0_60, %c0_61], %115 {strides = array<i32>} : memref<32x1xf32, #tpu.memory_space<vmem>>, vector<32x1xf32>,
    return
  }
  func.func @transform_0(%arg0: i32) -> (i32, i32, i32) {
    %c0_i32 = arith.constant 0 : i32
    %c0_i32_0 = arith.constant 0 : i32
    %c0_i32_1 = arith.constant 0 : i32
    return %c0_i32, %arg0, %c0_i32_0 : i32, i32, i32
  }
  func.func @transform_1(%arg0: i32) -> (i32, i32, i32) {
    %c0_i32 = arith.constant 0 : i32
    %c0_i32_0 = arith.constant 0 : i32
    %c0_i32_1 = arith.constant 0 : i32
    %c0_i32_2 = arith.constant 0 : i32
    return %c0_i32, %c0_i32_0, %c0_i32_1 : i32, i32, i32
  }
  func.func @transform_2(%arg0: i32) -> (i32, i32, i32) {
    %c0_i32 = arith.constant 0 : i32
    %c0_i32_0 = arith.constant 0 : i32
    %c0_i32_1 = arith.constant 0 : i32
    %c0_i32_2 = arith.constant 0 : i32
    return %c0_i32, %c0_i32_0, %c0_i32_1 : i32, i32, i32
  }
  func.func @transform_3(%arg0: i32) -> (i32, i32) {
    %c0_i32 = arith.constant 0 : i32
    %c0_i32_0 = arith.constant 0 : i32
    %c0_i32_1 = arith.constant 0 : i32
    return %c0_i32, %c0_i32_0 : i32, i32
  }
  func.func @transform_4(%arg0: i32) -> (i32, i32) {
    %c0_i32 = arith.constant 0 : i32
    %c0_i32_0 = arith.constant 0 : i32
    %c0_i32_1 = arith.constant 0 : i32
    return %c0_i32, %c0_i32_0 : i32, i32
  }
  func.func @transform_5(%arg0: i32) -> (i32, i32) {
    %c0_i32 = arith.constant 0 : i32
    %c0_i32_0 = arith.constant 0 : i32
    %c0_i32_1 = arith.constant 0 : i32
    return %c0_i32, %c0_i32_0 : i32, i32
  }
  func.func @transform_6(%arg0: i32) -> (i32, i32) {
    %c0_i32 = arith.constant 0 : i32
    %c0_i32_0 = arith.constant 0 : i32
    %c0_i32_1 = arith.constant 0 : i32
    return %c0_i32, %c0_i32_0 : i32, i32
  }
  func.func @transform_7(%arg0: i32) -> (i32, i32) {
    %c0_i32 = arith.constant 0 : i32
    %c0_i32_0 = arith.constant 0 : i32
    %c0_i32_1 = arith.constant 0 : i32
    return %c0_i32, %c0_i32_0 : i32, i32
  }
  func.func @transform_8(%arg0: i32) -> (i32, i32) {
    %c0_i32 = arith.constant 0 : i32
    %c0_i32_0 = arith.constant 0 : i32
    return %arg0, %c0_i32 : i32, i32
  }
}

</mosaic_0001>

<bundles_post_ra>
// kernel: forward.1
= control target key start
LH: loop header
LB: loop body
LE: loop exit
PB: predicated region body
PF: predicated region fallthrough
CT: control target
= control target key end

     0   :  { %s6070_s0 = inlined_call_operand.vmem [shape: f32[8,64,8], index: 0, kind: input, shape index: {}]   ;;  %s6071_s1 = inlined_call_operand.hbm [shape: f32[3,8,256], index: 1, kind: input, shape index: {}]   ;;  %s6072_s2 = inlined_call_operand.vmem [shape: f32[3,128,256], index: 2, kind: input, shape index: {}]   ;;  %s6073_s3 = inlined_call_operand.vmem [shape: f32[1,128], index: 3, kind: input, shape index: {}]   ;;  %s6074_s4 = inlined_call_operand.vmem [shape: f32[1,128], index: 4, kind: input, shape index: {}]   ;;  %s6075_s5 = inlined_call_operand.vmem [shape: f32[1,128], index: 5, kind: input, shape index: {}]   ;;  %s6076_s6 = inlined_call_operand.vmem [shape: f32[1,128], index: 6, kind: input, shape index: {}]   ;;  %s6077_s7 = inlined_call_operand.<no memory space> [shape: f32[1,1], index: 7, kind: input, shape index: {}]   ;;  %s6078_s8 = inlined_call_operand.vmem [shape: f32[32,1], index: 8, kind: output, shape index: {}]  }
   0x1   :  { %v13_v0 = vstv %s6077_s7 }
   0x2   :  { %14 = vst [vmem:[#allocation2] sm:$0x1] %v13_v0 }
   0x3   :  { %15 = vsyncpa [#allocation4], 0  ;;  %s3985_s29 = smov [#allocation3]   ;;  %s3961_s11 = scalar_lea.hbm %s6071_s1, 768 }
   0x4   :  { %s23_s30 = sshll.u32 %s3985_s29, 4  ;;  %p3962_p0 = scmp.ne.s32.totalorder %s6071_s1, %s3961_s11  ;;  %s24_s30 = int_to_ptr.vmem [resolvable:$true] %s23_s30 }
   0x5   :  { %p3965_p1 = scmp.lt.u32.totalorder %s3961_s11, %s6071_s1 }
   0x7   :  { %p3967_p2 = pnand %p3965_p1, %p3962_p0 }
   0x9   :  { %3970 = shalt.err (!%p3967_p2)
}
   0xa   :  { %s3971_s7 = scalar_lea.vmem %s24_s30, 768  ;;  %p3976_p4 = scmp.lt.s32.totalorder %s24_s30, %s24_s30 }
   0xb   :  { %p3972_p3 = scmp.ne.s32.totalorder %s24_s30, %s3971_s7  ;;  %p3977_p5 = scmp.lt.s32.totalorder %s3971_s7, %s3971_s7 }
   0xd   :  { %p3978_p6 = por %p3977_p5, %p3976_p4 }
   0xf   :  { %p3979_p7 = pnand %p3978_p6, %p3972_p3 }
  0x11   :  { %3982 = shalt.err (!%p3979_p7)
}
  0x12   :  { %s3986_s16 = smov 256   ;;  %s3987_s17 = smov 16  }
  0x13   :  { %29 = dma.hbm_to_vmem [thread:$0]  %s6071_s1, 768, %s24_s30, [#allocation4], %s3986_s16, %s3986_s16, %s3987_s17  }
  0x14   :  { %3983 = dma.done.wait [#allocation4], 768  }
  0x15   :  { %3984 = vsyncadd [#allocation4], 4294966528  ;;  %v6087_v1 = vmov 0.0   ;;  %v117_v2 = vld [vmem:[#allocation3 + $0x8] sm:$0xff]  ;;  %v116_v3 = vld [vmem:[#allocation3] sm:$0xff]  ;;  %vm118_vm0 = vcmask 64512  }
  0x16   :  { %375 = vmatprep.mubr.f32.mxu0 %v6087_v1  ;;  %471 = vmatprep.mubr.f32.mxu1 %v6087_v1  ;;  %v4054_v4 = vld [vmem:[%s6070_s0] sm:$0xff]  ;;  %v745_v6 = vld [vmem:[#allocation3 + $0x10] sm:$0xff]  ;;  %v4062_v7 = vld [vmem:[%s6070_s0 + $0x8] sm:$0xff]  ;;  %vm3196_vm2 = vcmask 7168  }
  0x17   :  { %311 = vmatprep.subr.mxu0 %v117_v2  ;;  %v746_v5 = vld [vmem:[#allocation3 + $0x18] sm:$0xff]  ;;  %3619 = vmatprep.subr.mxu1 %v117_v2  ;;  %v1326_v8 = vld [vmem:[#allocation3 + $0x28] sm:$0xff]  ;;  %v1325_v38 = vld [vmem:[#allocation3 + $0x20] sm:$0xff] }
  0x18   :  { %312 = vmatpush1.msra.mxu0 %v116_v3  ;;  %3620 = vmatpush1.msra.mxu1 %v116_v3  ;;  %v4069_v9 = vld [vmem:[%s6070_s0 + $0x80] sm:$0xff]  ;;  %v4075_v10 = vld [vmem:[%s6070_s0 + $0x10] sm:$0xff]  ;;  %v4085_v11 = vld [vmem:[%s6070_s0 + $0x88] sm:$0xff] }
  0x19   :  { %3262 = vmatmul.mubr.msk.f32.vlgmr.msra.gmra.mrb[0].mxu0 %vm118_vm0, %v4054_v4  ;;  %747 = vmatprep.subr.mxu0 %v746_v5  ;;  %v4091_v12 = vld [vmem:[%s6070_s0 + $0x18] sm:$0xff]  ;;  %v4101_v13 = vld [vmem:[%s6070_s0 + $0x90] sm:$0xff]  ;;  %v4107_v14 = vld [vmem:[%s6070_s0 + $0x20] sm:$0xff] }
  0x1a   :  { %748 = vmatpush1.msra.mxu0 %v745_v6  ;;  %381 = vmatprep.mubr.f32.mxu0 %v6087_v1  ;;  %v4117_v15 = vld [vmem:[%s6070_s0 + $0x98] sm:$0xff]  ;;  %v4123_v16 = vld [vmem:[%s6070_s0 + $0x28] sm:$0xff]  ;;  %v4133_v17 = vld [vmem:[%s6070_s0 + $0xa0] sm:$0xff] }
  0x1b   :  { %1327 = vmatprep.subr.mxu0 %v1326_v8  ;;  %3278 = vmatmul.mubr.msk.f32.vlgmr.msra.gmra.mrb[0].mxu1 %vm118_vm0, %v4069_v9  ;;  %v4139_v18 = vld [vmem:[%s6070_s0 + $0x30] sm:$0xff]  ;;  %v4149_v19 = vld [vmem:[%s6070_s0 + $0xa8] sm:$0xff]  ;;  %v4155_v20 = vld [vmem:[%s6070_s0 + $0x38] sm:$0xff] }
  0x1c   :  { %477 = vmatprep.mubr.f32.mxu1 %v6087_v1  ;;  %v4165_v21 = vld [vmem:[%s6070_s0 + $0xb0] sm:$0xff]  ;;  %v4171_v22 = vld [vmem:[%s6070_s0 + $0x40] sm:$0xff]  ;;  %v4181_v23 = vld [vmem:[%s6070_s0 + $0xb8] sm:$0xff] }
  0x1d   :  { %3263 = vmatmul.mubr.msk.f32.gmra.mrb[2].mxu0 %vm118_vm0, %v4062_v7  ;;  %v4187_v24 = vld [vmem:[%s6070_s0 + $0x48] sm:$0xff]  ;;  %v4197_v25 = vld [vmem:[%s6070_s0 + $0xc0] sm:$0xff]  ;;  %v4203_v26 = vld [vmem:[%s6070_s0 + $0x50] sm:$0xff] }
  0x1e   :  { %387 = vmatprep.mubr.f32.mxu0 %v6087_v1  ;;  %v4213_v27 = vld [vmem:[%s6070_s0 + $0xc8] sm:$0xff]  ;;  %v4219_v28 = vld [vmem:[%s6070_s0 + $0x58] sm:$0xff]  ;;  %v4229_v29 = vld [vmem:[%s6070_s0 + $0xd0] sm:$0xff] }
  0x1f   :  { %3279 = vmatmul.mubr.msk.f32.gmra.mrb[2].mxu1 %vm118_vm0, %v4085_v11  ;;  %v4235_v30 = vld [vmem:[%s6070_s0 + $0x60] sm:$0xff]  ;;  %v4245_v31 = vld [vmem:[%s6070_s0 + $0xd8] sm:$0xff]  ;;  %v4251_v32 = vld [vmem:[%s6070_s0 + $0x68] sm:$0xff] }
  0x20   :  { %483 = vmatprep.mubr.f32.mxu1 %v6087_v1  ;;  %v4261_v33 = vld [vmem:[%s6070_s0 + $0xe0] sm:$0xff]  ;;  %v4267_v34 = vld [vmem:[%s6070_s0 + $0x70] sm:$0xff]  ;;  %v4277_v35 = vld [vmem:[%s6070_s0 + $0xe8] sm:$0xff] }
  0x21   :  { %3264 = vmatmul.mubr.msk.f32.gmra.mrb[4].mxu0 %vm118_vm0, %v4075_v10  ;;  %v4283_v36 = vld [vmem:[%s6070_s0 + $0x78] sm:$0xff]  ;;  %v4293_v37 = vld [vmem:[%s6070_s0 + $0xf0] sm:$0xff]  ;;  %v4316_v40 = vld [vmem:[%s6070_s0 + $0x100] sm:$0xff] }
  0x22   :  { %393 = vmatprep.mubr.f32.mxu0 %v6087_v1  ;;  %v4305_v39 = vld [vmem:[%s6070_s0 + $0xf8] sm:$0xff]  ;;  %v4327_v41 = vld [vmem:[%s6070_s0 + $0x108] sm:$0xff]  ;;  %v4338_v42 = vld [vmem:[%s6070_s0 + $0x110] sm:$0xff] }
  0x23   :  { %3280 = vmatmul.mubr.msk.f32.gmra.mrb[4].mxu1 %vm118_vm0, %v4101_v13  ;;  %6095 = vst [vmem:[#allocation6_spill] sm:$0xff] %v4305_v39  ;;  %v4349_v43 = vld [vmem:[%s6070_s0 + $0x118] sm:$0xff]  ;;  %v4360_v44 = vld [vmem:[%s6070_s0 + $0x120] sm:$0xff]  ;;  %v4371_v45 = vld [vmem:[%s6070_s0 + $0x128] sm:$0xff] }
  0x24   :  { %489 = vmatprep.mubr.f32.mxu1 %v6087_v1  ;;  %v4382_v46 = vld [vmem:[%s6070_s0 + $0x130] sm:$0xff]  ;;  %v4393_v47 = vld [vmem:[%s6070_s0 + $0x138] sm:$0xff]  ;;  %v4404_v48 = vld [vmem:[%s6070_s0 + $0x140] sm:$0xff] }
  0x25   :  { %3265 = vmatmul.mubr.msk.f32.gmra.mrb[6].mxu0 %vm118_vm0, %v4091_v12  ;;  %v4415_v49 = vld [vmem:[%s6070_s0 + $0x148] sm:$0xff]  ;;  %v4426_v50 = vld [vmem:[%s6070_s0 + $0x150] sm:$0xff]  ;;  %v4437_v51 = vld [vmem:[%s6070_s0 + $0x158] sm:$0xff] }
  0x26   :  { %399 = vmatprep.mubr.f32.mxu0 %v6087_v1  ;;  %v4448_v52 = vld [vmem:[%s6070_s0 + $0x160] sm:$0xff]  ;;  %v4459_v53 = vld [vmem:[%s6070_s0 + $0x168] sm:$0xff]  ;;  %v4470_v54 = vld [vmem:[%s6070_s0 + $0x170] sm:$0xff] }
  0x27   :  { %3281 = vmatmul.mubr.msk.f32.gmra.mrb[6].mxu1 %vm118_vm0, %v4117_v15  ;;  %v4481_v55 = vld [vmem:[%s6070_s0 + $0x178] sm:$0xff]  ;;  %v4492_v56 = vld [vmem:[%s6070_s0 + $0x180] sm:$0xff]  ;;  %v4503_v57 = vld [vmem:[%s6070_s0 + $0x188] sm:$0xff] }
  0x28   :  { %495 = vmatprep.mubr.f32.mxu1 %v6087_v1  ;;  %v4514_v58 = vld [vmem:[%s6070_s0 + $0x190] sm:$0xff]  ;;  %v4525_v59 = vld [vmem:[%s6070_s0 + $0x198] sm:$0xff]  ;;  %v4536_v60 = vld [vmem:[%s6070_s0 + $0x1a0] sm:$0xff] }
  0x29   :  { %3266 = vmatmul.mubr.msk.f32.gmra.mrb[8].mxu0 %vm118_vm0, %v4107_v14  ;;  %v4547_v61 = vld [vmem:[%s6070_s0 + $0x1a8] sm:$0xff]  ;;  %v4558_v62 = vld [vmem:[%s6070_s0 + $0x1b0] sm:$0xff]  ;;  %v4569_v63 = vld [vmem:[%s6070_s0 + $0x1b8] sm:$0xff] }
  0x2a   :  { %405 = vmatprep.mubr.f32.mxu0 %v6087_v1  ;;  %6096 = vst [vmem:[#allocation7_spill] sm:$0xff] %v4558_v62  ;;  %6097 = vst [vmem:[#allocation8_spill] sm:$0xff] %v4569_v63  ;;  %v4580_v0 = vld [vmem:[%s6070_s0 + $0x1c0] sm:$0xff]  ;;  %v4591_v2 = vld [vmem:[%s6070_s0 + $0x1c8] sm:$0xff] }
  0x2b   :  { %3282 = vmatmul.mubr.msk.f32.gmra.mrb[8].mxu1 %vm118_vm0, %v4133_v17  ;;  %6098 = vst [vmem:[#allocation9_spill] sm:$0xff] %v4580_v0  ;;  %6099 = vst [vmem:[#allocation10_spill] sm:$0xff] %v4591_v2  ;;  %v4602_v3 = vld [vmem:[%s6070_s0 + $0x1d0] sm:$0xff]  ;;  %v4613_v5 = vld [vmem:[%s6070_s0 + $0x1d8] sm:$0xff] }
  0x2c   :  { %501 = vmatprep.mubr.f32.mxu1 %v6087_v1  ;;  %6100 = vst [vmem:[#allocation11_spill] sm:$0xff] %v4602_v3  ;;  %6101 = vst [vmem:[#allocation12_spill] sm:$0xff] %v4613_v5  ;;  %v4624_v6 = vld [vmem:[%s6070_s0 + $0x1e0] sm:$0xff]  ;;  %v4635_v8 = vld [vmem:[%s6070_s0 + $0x1e8] sm:$0xff] }
  0x2d   :  { %3267 = vmatmul.mubr.msk.f32.gmra.mrb[10].mxu0 %vm118_vm0, %v4123_v16  ;;  %6102 = vst [vmem:[#allocation13_spill] sm:$0xff] %v4635_v8 }
  0x2e   :  { %411 = vmatprep.mubr.f32.mxu0 %v6087_v1 }
  0x2f   :  { %3283 = vmatmul.mubr.msk.f32.gmra.mrb[10].mxu1 %vm118_vm0, %v4149_v19 }
  0x30   :  { %507 = vmatprep.mubr.f32.mxu1 %v6087_v1 }
  0x31   :  { %3268 = vmatmul.mubr.msk.f32.gmra.mrb[12].mxu0 %vm118_vm0, %v4139_v18 }
  0x32   :  { %417 = vmatprep.mubr.f32.mxu0 %v6087_v1 }
  0x33   :  { %3284 = vmatmul.mubr.msk.f32.gmra.mrb[12].mxu1 %vm118_vm0, %v4165_v21 }
  0x34   :  { %513 = vmatprep.mubr.f32.mxu1 %v6087_v1 }
  0x35   :  { %3269 = vmatmul.mubr.msk.f32.gmra.mrb[14].mxu0 %vm118_vm0, %v4155_v20 }
  0x36   :  { %423 = vmatprep.mubr.f32.mxu0 %v6087_v1 }
  0x37   :  { %3285 = vmatmul.mubr.msk.f32.gmra.mrb[14].mxu1 %vm118_vm0, %v4181_v23 }
  0x38   :  { %519 = vmatprep.mubr.f32.mxu1 %v6087_v1 }
  0x39   :  { %3270 = vmatmul.mubr.msk.f32.gmra.mrb[16].mxu0 %vm118_vm0, %v4171_v22 }
  0x3a   :  { %429 = vmatprep.mubr.f32.mxu0 %v6087_v1 }
  0x3b   :  { %3286 = vmatmul.mubr.msk.f32.gmra.mrb[16].mxu1 %vm118_vm0, %v4197_v25 }
  0x3c   :  { %525 = vmatprep.mubr.f32.mxu1 %v6087_v1 }
  0x3d   :  { %3271 = vmatmul.mubr.msk.f32.gmra.mrb[18].mxu0 %vm118_vm0, %v4187_v24 }
  0x3e   :  { %435 = vmatprep.mubr.f32.mxu0 %v6087_v1 }
  0x3f   :  { %3287 = vmatmul.mubr.msk.f32.gmra.mrb[18].mxu1 %vm118_vm0, %v4213_v27 }
  0x40   :  { %531 = vmatprep.mubr.f32.mxu1 %v6087_v1 }
  0x41   :  { %3272 = vmatmul.mubr.msk.f32.gmra.mrb[20].mxu0 %vm118_vm0, %v4203_v26 }
  0x42   :  { %441 = vmatprep.mubr.f32.mxu0 %v6087_v1 }
  0x43   :  { %3288 = vmatmul.mubr.msk.f32.gmra.mrb[20].mxu1 %vm118_vm0, %v4229_v29 }
  0x44   :  { %537 = vmatprep.mubr.f32.mxu1 %v6087_v1 }
  0x45   :  { %3273 = vmatmul.mubr.msk.f32.gmra.mrb[22].mxu0 %vm118_vm0, %v4219_v28 }
  0x46   :  { %447 = vmatprep.mubr.f32.mxu0 %v6087_v1 }
  0x47   :  { %3289 = vmatmul.mubr.msk.f32.gmra.mrb[22].mxu1 %vm118_vm0, %v4245_v31 }
  0x48   :  { %543 = vmatprep.mubr.f32.mxu1 %v6087_v1 }
  0x49   :  { %3274 = vmatmul.mubr.msk.f32.gmra.mrb[24].mxu0 %vm118_vm0, %v4235_v30 }
  0x4a   :  { %453 = vmatprep.mubr.f32.mxu0 %v6087_v1 }
  0x4b   :  { %3290 = vmatmul.mubr.msk.f32.gmra.mrb[24].mxu1 %vm118_vm0, %v4261_v33 }
  0x4c   :  { %549 = vmatprep.mubr.f32.mxu1 %v6087_v1 }
  0x4d   :  { %3275 = vmatmul.mubr.msk.f32.gmra.mrb[26].mxu0 %vm118_vm0, %v4251_v32 }
  0x4e   :  { %459 = vmatprep.mubr.f32.mxu0 %v6087_v1 }
  0x4f   :  { %3291 = vmatmul.mubr.msk.f32.gmra.mrb[26].mxu1 %vm118_vm0, %v4277_v35 }
  0x50   :  { %555 = vmatprep.mubr.f32.mxu1 %v6087_v1 }
  0x51   :  { %3276 = vmatmul.mubr.msk.f32.gmra.mrb[28].mxu0 %vm118_vm0, %v4267_v34 }
  0x52   :  { %465 = vmatprep.mubr.f32.mxu0 %v6087_v1 }
  0x53   :  { %3292 = vmatmul.mubr.msk.f32.gmra.mrb[28].mxu1 %vm118_vm0, %v4293_v37 }
  0x54   :  { %561 = vmatprep.mubr.f32.mxu1 %v6087_v1 }
  0x55   :  { %3277 = vmatmul.mubr.msk.f32.gmra.mrb[30].mxu0 %vm118_vm0, %v4283_v36 }
  0x56   :  { %811 = vmatprep.mubr.f32.mxu0 %v6087_v1 }
  0x57   :  { %3293 = vmatmul.mubr.msk.f32.gmra.mrb[30].mxu1 %vm118_vm0, %v4305_v39 }
  0x58   :  { %567 = vmatprep.mubr.f32.mxu1 %v6087_v1 }
  0x59   :  { %3326 = vmatmul.mubr.msk.f32.vlgmr.msra.gmra.mrb[32].mxu0 %vm118_vm0, %v4054_v4 }
  0x5a   :  { %1328 = vmatpush1.msra.mxu0 %v1325_v38  ;;  %817 = vmatprep.mubr.f32.mxu0 %v6087_v1  ;;  %v4646_v38 = vld [vmem:[%s6070_s0 + $0x1f0] sm:$0xff] }
  0x5b   :  { %3294 = vmatmul.mubr.msk.f32.gmra.mrb[32].mxu1 %vm118_vm0, %v4316_v40 }
  0x5c   :  { %573 = vmatprep.mubr.f32.mxu1 %v6087_v1 }
  0x5d   :  { %3327 = vmatmul.mubr.msk.f32.gmra.mrb[34].mxu0 %vm118_vm0, %v4062_v7 }
  0x5e   :  { %823 = vmatprep.mubr.f32.mxu0 %v6087_v1 }
  0x5f   :  { %3295 = vmatmul.mubr.msk.f32.gmra.mrb[34].mxu1 %vm118_vm0, %v4327_v41 }
  0x60   :  { %579 = vmatprep.mubr.f32.mxu1 %v6087_v1 }
  0x61   :  { %3328 = vmatmul.mubr.msk.f32.gmra.mrb[36].mxu0 %vm118_vm0, %v4075_v10 }
  0x62   :  { %829 = vmatprep.mubr.f32.mxu0 %v6087_v1 }
  0x63   :  { %3296 = vmatmul.mubr.msk.f32.gmra.mrb[36].mxu1 %vm118_vm0, %v4338_v42 }
  0x64   :  { %585 = vmatprep.mubr.f32.mxu1 %v6087_v1 }
  0x65   :  { %3329 = vmatmul.mubr.msk.f32.gmra.mrb[38].mxu0 %vm118_vm0, %v4091_v12 }
  0x66   :  { %835 = vmatprep.mubr.f32.mxu0 %v6087_v1 }
  0x67   :  { %3297 = vmatmul.mubr.msk.f32.gmra.mrb[38].mxu1 %vm118_vm0, %v4349_v43 }
  0x68   :  { %591 = vmatprep.mubr.f32.mxu1 %v6087_v1 }
  0x69   :  { %3330 = vmatmul.mubr.msk.f32.gmra.mrb[40].mxu0 %vm118_vm0, %v4107_v14 }
  0x6a   :  { %841 = vmatprep.mubr.f32.mxu0 %v6087_v1 }
  0x6b   :  { %3298 = vmatmul.mubr.msk.f32.gmra.mrb[40].mxu1 %vm118_vm0, %v4360_v44 }
  0x6c   :  { %597 = vmatprep.mubr.f32.mxu1 %v6087_v1 }
  0x6d   :  { %3331 = vmatmul.mubr.msk.f32.gmra.mrb[42].mxu0 %vm118_vm0, %v4123_v16 }
  0x6e   :  { %847 = vmatprep.mubr.f32.mxu0 %v6087_v1 }
  0x6f   :  { %3299 = vmatmul.mubr.msk.f32.gmra.mrb[42].mxu1 %vm118_vm0, %v4371_v45 }
  0x70   :  { %603 = vmatprep.mubr.f32.mxu1 %v6087_v1 }
  0x71   :  { %3332 = vmatmul.mubr.msk.f32.gmra.mrb[44].mxu0 %vm118_vm0, %v4139_v18 }
  0x72   :  { %853 = vmatprep.mubr.f32.mxu0 %v6087_v1 }
  0x73   :  { %3300 = vmatmul.mubr.msk.f32.gmra.mrb[44].mxu1 %vm118_vm0, %v4382_v46 }
  0x74   :  { %609 = vmatprep.mubr.f32.mxu1 %v6087_v1 }
  0x75   :  { %3333 = vmatmul.mubr.msk.f32.gmra.mrb[46].mxu0 %vm118_vm0, %v4155_v20 }
  0x76   :  { %859 = vmatprep.mubr.f32.mxu0 %v6087_v1 }
  0x77   :  { %3301 = vmatmul.mubr.msk.f32.gmra.mrb[46].mxu1 %vm118_vm0, %v4393_v47 }
  0x78   :  { %615 = vmatprep.mubr.f32.mxu1 %v6087_v1 }
  0x79   :  { %3334 = vmatmul.mubr.msk.f32.gmra.mrb[0].mxu0 %vm118_vm0, %v4171_v22 }
  0x7a   :  { %865 = vmatprep.mubr.f32.mxu0 %v6087_v1 }
  0x7b   :  { %3302 = vmatmul.mubr.msk.f32.gmra.mrb[48].mxu1 %vm118_vm0, %v4404_v48 }
  0x7c   :  { %621 = vmatprep.mubr.f32.mxu1 %v6087_v1 }
  0x7d   :  { %3335 = vmatmul.mubr.msk.f32.gmra.mrb[2].mxu0 %vm118_vm0, %v4187_v24 }
  0x7e   :  { %871 = vmatprep.mubr.f32.mxu0 %v6087_v1 }
  0x7f   :  { %3303 = vmatmul.mubr.msk.f32.gmra.mrb[50].mxu1 %vm118_vm0, %v4415_v49 }
  0x80   :  { %627 = vmatprep.mubr.f32.mxu1 %v6087_v1 }
  0x81   :  { %3336 = vmatmul.mubr.msk.f32.gmra.mrb[4].mxu0 %vm118_vm0, %v4203_v26 }
  0x82   :  { %877 = vmatprep.mubr.f32.mxu0 %v6087_v1 }
  0x83   :  { %3304 = vmatmul.mubr.msk.f32.gmra.mrb[52].mxu1 %vm118_vm0, %v4426_v50 }
  0x84   :  { %633 = vmatprep.mubr.f32.mxu1 %v6087_v1 }
  0x85   :  { %3337 = vmatmul.mubr.msk.f32.gmra.mrb[6].mxu0 %vm118_vm0, %v4219_v28 }
  0x86   :  { %883 = vmatprep.mubr.f32.mxu0 %v6087_v1 }
  0x87   :  { %3305 = vmatmul.mubr.msk.f32.gmra.mrb[54].mxu1 %vm118_vm0, %v4437_v51 }
  0x88   :  { %639 = vmatprep.mubr.f32.mxu1 %v6087_v1 }
  0x89   :  { %3338 = vmatmul.mubr.msk.f32.gmra.mrb[8].mxu0 %vm118_vm0, %v4235_v30 }
  0x8a   :  { %889 = vmatprep.mubr.f32.mxu0 %v6087_v1 }
  0x8b   :  { %3306 = vmatmul.mubr.msk.f32.gmra.mrb[56].mxu1 %vm118_vm0, %v4448_v52 }
  0x8c   :  { %645 = vmatprep.mubr.f32.mxu1 %v6087_v1 }
  0x8d   :  { %3339 = vmatmul.mubr.msk.f32.gmra.mrb[10].mxu0 %vm118_vm0, %v4251_v32 }
  0x8e   :  { %895 = vmatprep.mubr.f32.mxu0 %v6087_v1 }
  0x8f   :  { %3307 = vmatmul.mubr.msk.f32.gmra.mrb[58].mxu1 %vm118_vm0, %v4459_v53 }
  0x90   :  { %651 = vmatprep.mubr.f32.mxu1 %v6087_v1 }
  0x91   :  { %3340 = vmatmul.mubr.msk.f32.gmra.mrb[12].mxu0 %vm118_vm0, %v4267_v34 }
  0x92   :  { %901 = vmatprep.mubr.f32.mxu0 %v6087_v1 }
  0x93   :  { %3308 = vmatmul.mubr.msk.f32.gmra.mrb[60].mxu1 %vm118_vm0, %v4470_v54 }
  0x94   :  { %657 = vmatprep.mubr.f32.mxu1 %v6087_v1 }
  0x95   :  { %3341 = vmatmul.mubr.msk.f32.gmra.mrb[14].mxu0 %vm118_vm0, %v4283_v36 }
  0x96   :  { %907 = vmatprep.mubr.f32.mxu0 %v6087_v1 }
  0x97   :  { %3309 = vmatmul.mubr.msk.f32.gmra.mrb[62].mxu1 %vm118_vm0, %v4481_v55 }
  0x98   :  { %663 = vmatprep.mubr.f32.mxu1 %v6087_v1 }
  0x99   :  { %3342 = vmatmul.mubr.msk.f32.gmra.mrb[16].mxu0 %vm118_vm0, %v4069_v9 }
  0x9a   :  { %913 = vmatprep.mubr.f32.mxu0 %v6087_v1 }
  0x9b   :  { %3310 = vmatmul.mubr.msk.f32.gmra.mrb[64].mxu1 %vm118_vm0, %v4492_v56 }
  0x9c   :  { %669 = vmatprep.mubr.f32.mxu1 %v6087_v1 }
  0x9d   :  { %3343 = vmatmul.mubr.msk.f32.gmra.mrb[18].mxu0 %vm118_vm0, %v4085_v11 }
  0x9e   :  { %919 = vmatprep.mubr.f32.mxu0 %v6087_v1 }
  0x9f   :  { %3311 = vmatmul.mubr.msk.f32.gmra.mrb[66].mxu1 %vm118_vm0, %v4503_v57 }
  0xa0   :  { %675 = vmatprep.mubr.f32.mxu1 %v6087_v1 }
  0xa1   :  { %3344 = vmatmul.mubr.msk.f32.gmra.mrb[20].mxu0 %vm118_vm0, %v4101_v13 }
  0xa2   :  { %925 = vmatprep.mubr.f32.mxu0 %v6087_v1 }
  0xa3   :  { %3312 = vmatmul.mubr.msk.f32.gmra.mrb[68].mxu1 %vm118_vm0, %v4514_v58 }
  0xa4   :  { %681 = vmatprep.mubr.f32.mxu1 %v6087_v1 }
  0xa5   :  { %3345 = vmatmul.mubr.msk.f32.gmra.mrb[22].mxu0 %vm118_vm0, %v4117_v15 }
  0xa6   :  { %931 = vmatprep.mubr.f32.mxu0 %v6087_v1 }
  0xa7   :  { %3313 = vmatmul.mubr.msk.f32.gmra.mrb[70].mxu1 %vm118_vm0, %v4525_v59 }
  0xa8   :  { %687 = vmatprep.mubr.f32.mxu1 %v6087_v1 }
  0xa9   :  { %3346 = vmatmul.mubr.msk.f32.gmra.mrb[24].mxu0 %vm118_vm0, %v4133_v17 }
  0xaa   :  { %937 = vmatprep.mubr.f32.mxu0 %v6087_v1 }
  0xab   :  { %3314 = vmatmul.mubr.msk.f32.gmra.mrb[72].mxu1 %vm118_vm0, %v4536_v60 }
  0xac   :  { %693 = vmatprep.mubr.f32.mxu1 %v6087_v1 }
  0xad   :  { %3347 = vmatmul.mubr.msk.f32.gmra.mrb[26].mxu0 %vm118_vm0, %v4149_v19 }
  0xae   :  { %943 = vmatprep.mubr.f32.mxu0 %v6087_v1 }
  0xaf   :  { %3315 = vmatmul.mubr.msk.f32.gmra.mrb[74].mxu1 %vm118_vm0, %v4547_v61 }
  0xb0   :  { %699 = vmatprep.mubr.f32.mxu1 %v6087_v1 }
  0xb1   :  { %3348 = vmatmul.mubr.msk.f32.gmra.mrb[28].mxu0 %vm118_vm0, %v4165_v21 }
  0xb2   :  { %949 = vmatprep.mubr.f32.mxu0 %v6087_v1 }
  0xb3   :  { %3316 = vmatmul.mubr.msk.f32.gmra.mrb[76].mxu1 %vm118_vm0, %v4558_v62 }
  0xb4   :  { %705 = vmatprep.mubr.f32.mxu1 %v6087_v1 }
  0xb5   :  { %3349 = vmatmul.mubr.msk.f32.gmra.mrb[30].mxu0 %vm118_vm0, %v4181_v23 }
  0xb6   :  { %955 = vmatprep.mubr.f32.mxu0 %v6087_v1 }
  0xb7   :  { %3317 = vmatmul.mubr.msk.f32.gmra.mrb[78].mxu1 %vm118_vm0, %v4569_v63 }
  0xb8   :  { %711 = vmatprep.mubr.f32.mxu1 %v6087_v1 }
  0xb9   :  { %3350 = vmatmul.mubr.msk.f32.gmra.mrb[48].mxu0 %vm118_vm0, %v4197_v25 }
  0xba   :  { %961 = vmatprep.mubr.f32.mxu0 %v6087_v1 }
  0xbb   :  { %3318 = vmatmul.mubr.msk.f32.gmra.mrb[80].mxu1 %vm118_vm0, %v4580_v0 }
  0xbc   :  { %715 = vmatprep.mubr.f32.mxu1 %v6087_v1 }
  0xbd   :  { %3351 = vmatmul.mubr.msk.f32.gmra.mrb[50].mxu0 %vm118_vm0, %v4213_v27 }
  0xbe   :  { %967 = vmatprep.mubr.f32.mxu0 %v6087_v1 }
  0xbf   :  { %3319 = vmatmul.mubr.msk.f32.gmra.mrb[82].mxu1 %vm118_vm0, %v4591_v2 }
  0xc0   :  { %719 = vmatprep.mubr.f32.mxu1 %v6087_v1 }
  0xc1   :  { %3352 = vmatmul.mubr.msk.f32.gmra.mrb[52].mxu0 %vm118_vm0, %v4229_v29 }
  0xc2   :  { %973 = vmatprep.mubr.f32.mxu0 %v6087_v1 }
  0xc3   :  { %3320 = vmatmul.mubr.msk.f32.gmra.mrb[84].mxu1 %vm118_vm0, %v4602_v3 }
  0xc4   :  { %723 = vmatprep.mubr.f32.mxu1 %v6087_v1 }
  0xc5   :  { %3353 = vmatmul.mubr.msk.f32.gmra.mrb[54].mxu0 %vm118_vm0, %v4245_v31 }
  0xc6   :  { %979 = vmatprep.mubr.f32.mxu0 %v6087_v1 }
  0xc7   :  { %3321 = vmatmul.mubr.msk.f32.gmra.mrb[86].mxu1 %vm118_vm0, %v4613_v5 }
  0xc8   :  { %727 = vmatprep.mubr.f32.mxu1 %v6087_v1 }
  0xc9   :  { %3354 = vmatmul.mubr.msk.f32.gmra.mrb[56].mxu0 %vm118_vm0, %v4261_v33 }
  0xca   :  { %985 = vmatprep.mubr.f32.mxu0 %v6087_v1 }
  0xcb   :  { %3322 = vmatmul.mubr.msk.f32.gmra.mrb[88].mxu1 %vm118_vm0, %v4624_v6 }
  0xcc   :  { %731 = vmatprep.mubr.f32.mxu1 %v6087_v1 }
  0xcd   :  { %3355 = vmatmul.mubr.msk.f32.gmra.mrb[58].mxu0 %vm118_vm0, %v4277_v35 }
  0xce   :  { %991 = vmatprep.mubr.f32.mxu0 %v6087_v1 }
  0xcf   :  { %3323 = vmatmul.mubr.msk.f32.gmra.mrb[90].mxu1 %vm118_vm0, %v4635_v8 }
  0xd0   :  { %735 = vmatprep.mubr.f32.mxu1 %v6087_v1 }
  0xd1   :  { %3356 = vmatmul.mubr.msk.f32.gmra.mrb[60].mxu0 %vm118_vm0, %v4293_v37 }
  0xd2   :  { %997 = vmatprep.mubr.f32.mxu0 %v6087_v1 }
  0xd3   :  { %3324 = vmatmul.mubr.msk.f32.gmra.mrb[92].mxu1 %vm118_vm0, %v4646_v38 }
  0xd4   :  { %739 = vmatprep.mubr.f32.mxu1 %v6087_v1 }
  0xd5   :  { %3357 = vmatmul.mubr.msk.f32.gmra.mrb[62].mxu0 %vm118_vm0, %v4305_v39  ;;  %v4657_v39 = vld [vmem:[%s6070_s0 + $0x1f8] sm:$0xff] }
  0xd6   :  { %1003 = vmatprep.mubr.f32.mxu0 %v6087_v1 }
  0xd7   :  { %3325 = vmatmul.mubr.msk.f32.gmra.mrb[94].mxu1 %vm118_vm0, %v4657_v39 }
  0xd8   :  { %2151 = vmatprep.mubr.f32.mxu1 %v6087_v1 }
  0xd9   :  { %3358 = vmatmul.mubr.msk.f32.gmra.mrb[64].mxu0 %vm118_vm0, %v4316_v40 }
  0xda   :  { %1009 = vmatprep.mubr.f32.mxu0 %v6087_v1 }
  0xdd   :  { %3359 = vmatmul.mubr.msk.f32.gmra.mrb[66].mxu0 %vm118_vm0, %v4327_v41 }
  0xde   :  { %1015 = vmatprep.mubr.f32.mxu0 %v6087_v1 }
  0xe1   :  { %3360 = vmatmul.mubr.msk.f32.gmra.mrb[68].mxu0 %vm118_vm0, %v4338_v42 }
  0xe2   :  { %1021 = vmatprep.mubr.f32.mxu0 %v6087_v1 }
  0xe5   :  { %3361 = vmatmul.mubr.msk.f32.gmra.mrb[70].mxu0 %vm118_vm0, %v4349_v43 }
  0xe6   :  { %1027 = vmatprep.mubr.f32.mxu0 %v6087_v1 }
  0xe9   :  { %3362 = vmatmul.mubr.msk.f32.gmra.mrb[72].mxu0 %vm118_vm0, %v4360_v44 }
  0xea   :  { %1033 = vmatprep.mubr.f32.mxu0 %v6087_v1 }
  0xed   :  { %3363 = vmatmul.mubr.msk.f32.gmra.mrb[74].mxu0 %vm118_vm0, %v4371_v45 }
  0xee   :  { %1039 = vmatprep.mubr.f32.mxu0 %v6087_v1 }
  0xf1   :  { %3364 = vmatmul.mubr.msk.f32.gmra.mrb[76].mxu0 %vm118_vm0, %v4382_v46 }
  0xf2   :  { %1045 = vmatprep.mubr.f32.mxu0 %v6087_v1 }
  0xf5   :  { %3365 = vmatmul.mubr.msk.f32.gmra.mrb[78].mxu0 %vm118_vm0, %v4393_v47 }
  0xf6   :  { %1051 = vmatprep.mubr.f32.mxu0 %v6087_v1 }
  0xf9   :  { %3366 = vmatmul.mubr.msk.f32.gmra.mrb[80].mxu0 %vm118_vm0, %v4404_v48 }
  0xfa   :  { %1057 = vmatprep.mubr.f32.mxu0 %v6087_v1 }
  0xfd   :  { %3367 = vmatmul.mubr.msk.f32.gmra.mrb[82].mxu0 %vm118_vm0, %v4415_v49 }
  0xfe   :  { %1063 = vmatprep.mubr.f32.mxu0 %v6087_v1 }
 0x101   :  { %3368 = vmatmul.mubr.msk.f32.gmra.mrb[84].mxu0 %vm118_vm0, %v4426_v50 }
 0x102   :  { %1069 = vmatprep.mubr.f32.mxu0 %v6087_v1 }
 0x105   :  { %3369 = vmatmul.mubr.msk.f32.gmra.mrb[86].mxu0 %vm118_vm0, %v4437_v51 }
 0x106   :  { %1075 = vmatprep.mubr.f32.mxu0 %v6087_v1 }
 0x109   :  { %3370 = vmatmul.mubr.msk.f32.gmra.mrb[88].mxu0 %vm118_vm0, %v4448_v52 }
 0x10a   :  { %1081 = vmatprep.mubr.f32.mxu0 %v6087_v1 }
 0x10d   :  { %3371 = vmatmul.mubr.msk.f32.gmra.mrb[90].mxu0 %vm118_vm0, %v4459_v53 }
 0x10e   :  { %1087 = vmatprep.mubr.f32.mxu0 %v6087_v1 }
 0x111   :  { %3372 = vmatmul.mubr.msk.f32.gmra.mrb[92].mxu0 %vm118_vm0, %v4470_v54 }
 0x112   :  { %1093 = vmatprep.mubr.f32.mxu0 %v6087_v1 }
 0x115   :  { %3373 = vmatmul.mubr.msk.f32.gmra.mrb[94].mxu0 %vm118_vm0, %v4481_v55 }
 0x116   :  { %1099 = vmatprep.mubr.f32.mxu0 %v6087_v1 }
 0x119   :  { %3374 = vmatmul.mubr.msk.f32.gmra.mrb[96].mxu0 %vm118_vm0, %v4492_v56 }
 0x11a   :  { %1105 = vmatprep.mubr.f32.mxu0 %v6087_v1 }
 0x11d   :  { %3375 = vmatmul.mubr.msk.f32.gmra.mrb[98].mxu0 %vm118_vm0, %v4503_v57 }
 0x11e   :  { %1111 = vmatprep.mubr.f32.mxu0 %v6087_v1 }
 0x121   :  { %3376 = vmatmul.mubr.msk.f32.gmra.mrb[100].mxu0 %vm118_vm0, %v4514_v58 }
 0x122   :  { %1117 = vmatprep.mubr.f32.mxu0 %v6087_v1 }
 0x125   :  { %3377 = vmatmul.mubr.msk.f32.gmra.mrb[102].mxu0 %vm118_vm0, %v4525_v59 }
 0x126   :  { %1123 = vmatprep.mubr.f32.mxu0 %v6087_v1 }
 0x129   :  { %3378 = vmatmul.mubr.msk.f32.gmra.mrb[104].mxu0 %vm118_vm0, %v4536_v60 }
 0x12a   :  { %1129 = vmatprep.mubr.f32.mxu0 %v6087_v1 }
 0x12d   :  { %3379 = vmatmul.mubr.msk.f32.gmra.mrb[106].mxu0 %vm118_vm0, %v4547_v61 }
 0x12e   :  { %1135 = vmatprep.mubr.f32.mxu0 %v6087_v1 }
 0x131   :  { %3380 = vmatmul.mubr.msk.f32.gmra.mrb[108].mxu0 %vm118_vm0, %v4558_v62 }
 0x132   :  { %1141 = vmatprep.mubr.f32.mxu0 %v6087_v1 }
 0x135   :  { %3381 = vmatmul.mubr.msk.f32.gmra.mrb[110].mxu0 %vm118_vm0, %v4569_v63 }
 0x136   :  { %1147 = vmatprep.mubr.f32.mxu0 %v6087_v1 }
 0x139   :  { %3382 = vmatmul.mubr.msk.f32.gmra.mrb[112].mxu0 %vm118_vm0, %v4580_v0  ;;  %v4745_v0 = vpop.f32.mrb[0].mxu1 }
 0x13a   :  { %1153 = vmatprep.mubr.f32.mxu0 %v6087_v1  ;;  %6103 = vst [vmem:[#allocation14_spill] sm:$0xff] %v4745_v0 }
 0x13d   :  { %3383 = vmatmul.mubr.msk.f32.gmra.mrb[114].mxu0 %vm118_vm0, %v4591_v2  ;;  %v4748_v2 = vpop.f32.mrb[1].mxu1 }
 0x13e   :  { %1159 = vmatprep.mubr.f32.mxu0 %v6087_v1  ;;  %6104 = vst [vmem:[#allocation15_spill] sm:$0xff] %v4748_v2 }
 0x141   :  { %3384 = vmatmul.mubr.msk.f32.gmra.mrb[116].mxu0 %vm118_vm0, %v4602_v3  ;;  %v4752_v3 = vpop.f32.mrb[2].mxu1 }
 0x142   :  { %1165 = vmatprep.mubr.f32.mxu0 %v6087_v1  ;;  %6105 = vst [vmem:[#allocation16_spill] sm:$0xff] %v4752_v3  ;;  %v4755_v63 = vpop.f32.mrb[3].mxu1 }
 0x143   :  { %6106 = vst [vmem:[#allocation17_spill] sm:$0xff] %v4755_v63 }
 0x145   :  { %3385 = vmatmul.mubr.msk.f32.gmra.mrb[118].mxu0 %vm118_vm0, %v4613_v5  ;;  %v4757_v5 = vpop.f32.mrb[4].mxu1 }
 0x146   :  { %1171 = vmatprep.mubr.f32.mxu0 %v6087_v1  ;;  %6107 = vst [vmem:[#allocation18_spill] sm:$0xff] %v4757_v5  ;;  %v4759_v62 = vpop.f32.mrb[5].mxu1 }
 0x147   :  { %6108 = vst [vmem:[#allocation19_spill] sm:$0xff] %v4759_v62  ;;  %v4763_v0 = vpop.f32.mrb[6].mxu1 }
 0x148   :  { %6109 = vst [vmem:[#allocation20_spill] sm:$0xff] %v4763_v0  ;;  %v4766_v2 = vpop.f32.mrb[7].mxu1 }
 0x149   :  { %3386 = vmatmul.mubr.msk.f32.gmra.mrb[120].mxu0 %vm118_vm0, %v4624_v6  ;;  %6110 = vst [vmem:[#allocation21_spill] sm:$0xff] %v4766_v2 }
 0x14a   :  { %1177 = vmatprep.mubr.f32.mxu0 %v6087_v1 }
 0x14d   :  { %3387 = vmatmul.mubr.msk.f32.gmra.mrb[122].mxu0 %vm118_vm0, %v4635_v8  ;;  %v4768_v8 = vpop.f32.mrb[8].mxu1 }
 0x14e   :  { %1183 = vmatprep.mubr.f32.mxu0 %v6087_v1  ;;  %6111 = vst [vmem:[#allocation22_spill] sm:$0xff] %v4768_v8  ;;  %v4770_v3 = vpop.f32.mrb[9].mxu1 }
 0x14f   :  { %6112 = vst [vmem:[#allocation23_spill] sm:$0xff] %v4770_v3  ;;  %v4774_v63 = vpop.f32.mrb[10].mxu1 }
 0x150   :  { %6113 = vst [vmem:[#allocation24_spill] sm:$0xff] %v4774_v63  ;;  %v4777_v62 = vpop.f32.mrb[11].mxu1 }
 0x151   :  { %3388 = vmatmul.mubr.msk.f32.gmra.mrb[124].mxu0 %vm118_vm0, %v4646_v38  ;;  %6114 = vst [vmem:[#allocation25_spill] sm:$0xff] %v4777_v62  ;;  %v4779_v5 = vpop.f32.mrb[12].mxu1 }
 0x152   :  { %1189 = vmatprep.mubr.f32.mxu0 %v6087_v1  ;;  %v4781_v0 = vpop.f32.mrb[13].mxu1 }
 0x153   :  { %6115 = vst [vmem:[#allocation26_spill] sm:$0xff] %v4781_v0  ;;  %v4785_v2 = vpop.f32.mrb[14].mxu1 }
 0x154   :  { %6116 = vst [vmem:[#allocation27_spill] sm:$0xff] %v4785_v2  ;;  %v4788_v3 = vpop.f32.mrb[15].mxu1 }
 0x155   :  { %3389 = vmatmul.mubr.msk.f32.gmra.mrb[126].mxu0 %vm118_vm0, %v4657_v39  ;;  %6117 = vst [vmem:[#allocation28_spill] sm:$0xff] %v4788_v3  ;;  %v4790_v8 = vpop.f32.mrb[16].mxu1 }
 0x156   :  { %1391 = vmatprep.mubr.f32.mxu0 %v6087_v1  ;;  %6118 = vst [vmem:[#allocation29_spill] sm:$0xff] %v4790_v8  ;;  %v4792_v63 = vpop.f32.mrb[17].mxu1 }
 0x157   :  { %6119 = vst [vmem:[#allocation30_spill] sm:$0xff] %v4792_v63  ;;  %v4796_v62 = vpop.f32.mrb[18].mxu1 }
 0x158   :  { %6120 = vst [vmem:[#allocation31_spill] sm:$0xff] %v4796_v62  ;;  %v4799_v0 = vpop.f32.mrb[19].mxu1 }
 0x159   :  { %3390 = vmatmul.mubr.msk.f32.vlgmr.msra.gmra.mrb[128].mxu0 %vm118_vm0, %v4054_v4  ;;  %6121 = vst [vmem:[#allocation32_spill] sm:$0xff] %v4799_v0  ;;  %v4801_v4 = vpop.f32.mrb[20].mxu1 }
 0x15a   :  { %1395 = vmatprep.mubr.f32.mxu0 %v6087_v1  ;;  %6122 = vst [vmem:[#allocation33_spill] sm:$0xff] %v4801_v4  ;;  %v4803_v2 = vpop.f32.mrb[21].mxu1 }
 0x15b   :  { %6123 = vst [vmem:[#allocation34_spill] sm:$0xff] %v4803_v2  ;;  %v4807_v3 = vpop.f32.mrb[22].mxu1 }
 0x15c   :  { %6124 = vst [vmem:[#allocation35_spill] sm:$0xff] %v4807_v3  ;;  %v4810_v63 = vpop.f32.mrb[23].mxu1 }
 0x15d   :  { %3391 = vmatmul.mubr.msk.f32.gmra.mrb[130].mxu0 %vm118_vm0, %v4062_v7  ;;  %6125 = vst [vmem:[#allocation36_spill] sm:$0xff] %v4810_v63  ;;  %v4812_v7 = vpop.f32.mrb[24].mxu1 }
 0x15e   :  { %1399 = vmatprep.mubr.f32.mxu0 %v6087_v1  ;;  %6126 = vst [vmem:[#allocation37_spill] sm:$0xff] %v4812_v7  ;;  %v4814_v62 = vpop.f32.mrb[25].mxu1 }
 0x15f   :  { %6127 = vst [vmem:[#allocation38_spill] sm:$0xff] %v4814_v62  ;;  %v4818_v0 = vpop.f32.mrb[26].mxu1 }
 0x160   :  { %6128 = vst [vmem:[#allocation39_spill] sm:$0xff] %v4818_v0  ;;  %v4821_v2 = vpop.f32.mrb[27].mxu1 }
 0x161   :  { %3392 = vmatmul.mubr.msk.f32.gmra.mrb[132].mxu0 %vm118_vm0, %v4075_v10  ;;  %6129 = vst [vmem:[#allocation40_spill] sm:$0xff] %v4821_v2  ;;  %v4823_v10 = vpop.f32.mrb[28].mxu1 }
 0x162   :  { %1403 = vmatprep.mubr.f32.mxu0 %v6087_v1  ;;  %6130 = vst [vmem:[#allocation41_spill] sm:$0xff] %v4823_v10  ;;  %v4825_v3 = vpop.f32.mrb[29].mxu1 }
 0x163   :  { %6131 = vst [vmem:[#allocation42_spill] sm:$0xff] %v4825_v3  ;;  %v4829_v63 = vpop.f32.mrb[30].mxu1 }
 0x164   :  { %6132 = vst [vmem:[#allocation43_spill] sm:$0xff] %v4829_v63  ;;  %v4832_v62 = vpop.f32.mrb[31].mxu1 }
 0x165   :  { %3393 = vmatmul.mubr.msk.f32.gmra.mrb[134].mxu0 %vm118_vm0, %v4091_v12  ;;  %6133 = vst [vmem:[#allocation44_spill] sm:$0xff] %v4832_v62  ;;  %v4834_v12 = vpop.f32.mrb[32].mxu1 }
 0x166   :  { %1407 = vmatprep.mubr.f32.mxu0 %v6087_v1  ;;  %6134 = vst [vmem:[#allocation45_spill] sm:$0xff] %v4834_v12  ;;  %v4836_v0 = vpop.f32.mrb[33].mxu1  ;;  %v2065_v12 = vld [vmem:[%s6072_s2 + $0x50] sm:$0xff] }
 0x167   :  { %6135 = vst [vmem:[#allocation46_spill] sm:$0xff] %v4836_v0  ;;  %v4840_v2 = vpop.f32.mrb[34].mxu1 }
 0x168   :  { %6136 = vst [vmem:[#allocation47_spill] sm:$0xff] %v4840_v2  ;;  %v4843_v3 = vpop.f32.mrb[35].mxu1 }
 0x169   :  { %3394 = vmatmul.mubr.msk.f32.gmra.mrb[136].mxu0 %vm118_vm0, %v4107_v14  ;;  %6137 = vst [vmem:[#allocation48_spill] sm:$0xff] %v4843_v3  ;;  %v4845_v14 = vpop.f32.mrb[36].mxu1 }
 0x16a   :  { %1411 = vmatprep.mubr.f32.mxu0 %v6087_v1  ;;  %6138 = vst [vmem:[#allocation49_spill] sm:$0xff] %v4845_v14  ;;  %v4847_v63 = vpop.f32.mrb[37].mxu1 }
 0x16b   :  { %6139 = vst [vmem:[#allocation50_spill] sm:$0xff] %v4847_v63  ;;  %v4851_v62 = vpop.f32.mrb[38].mxu1 }
 0x16c   :  { %6140 = vst [vmem:[#allocation51_spill] sm:$0xff] %v4851_v62  ;;  %v4854_v0 = vpop.f32.mrb[39].mxu1 }
 0x16d   :  { %3395 = vmatmul.mubr.msk.f32.gmra.mrb[138].mxu0 %vm118_vm0, %v4123_v16  ;;  %6141 = vst [vmem:[#allocation52_spill] sm:$0xff] %v4854_v0  ;;  %v4856_v16 = vpop.f32.mrb[40].mxu1  ;;  %v2058_v0 = vld [vmem:[%s6072_s2 + $0x18] sm:$0xff] }
 0x16e   :  { %1415 = vmatprep.mubr.f32.mxu0 %v6087_v1  ;;  %6142 = vst [vmem:[#allocation53_spill] sm:$0xff] %v4856_v16  ;;  %v4858_v2 = vpop.f32.mrb[41].mxu1 }
 0x16f   :  { %6143 = vst [vmem:[#allocation54_spill] sm:$0xff] %v4858_v2  ;;  %v4862_v3 = vpop.f32.mrb[42].mxu1 }
 0x170   :  { %6144 = vst [vmem:[#allocation55_spill] sm:$0xff] %v4862_v3  ;;  %v4865_v63 = vpop.f32.mrb[43].mxu1  ;;  %v6149_v3 = vmov 0.0  }
 0x171   :  { %3396 = vmatmul.mubr.msk.f32.gmra.mrb[140].mxu0 %vm118_vm0, %v4139_v18  ;;  %6145 = vst [vmem:[#allocation56_spill] sm:$0xff] %v4865_v63  ;;  %v2056_v18 = vld [vmem:[%s6072_s2 + $0x8] sm:$0xff]  ;;  %v4873_v16 = vpop.f32.mrb[44].mxu1 }
 0x172   :  { %1419 = vmatprep.mubr.f32.mxu0 %v6087_v1  ;;  %6146 = vst [vmem:[#allocation57_spill] sm:$0xff] %v4873_v16  ;;  %v3523_v2 = vpack.c.bf16 %v2058_v0, %v2056_v18  ;;  %v4875_v62 = vpop.f32.mrb[45].mxu1 }
 0x173   :  { %6147 = vst [vmem:[#allocation58_spill] sm:$0xff] %v4875_v62  ;;  %v4885_v63 = vpop.f32.mrb[46].mxu1 }
 0x174   :  { %3524 = vmatprep.subr.bf16.mxu1 %v3523_v2  ;;  %6148 = vst [vmem:[#allocation59_spill] sm:$0xff] %v4885_v63  ;;  %v4888_v0 = vpop.f32.mrb[47].mxu1 }
 0x175   :  { %3397 = vmatmul.mubr.msk.f32.gmra.mrb[142].mxu0 %vm118_vm0, %v4155_v20  ;;  %v2055_v20 = vld [vmem:[%s6072_s2] sm:$0xff]  ;;  %6150 = vst [vmem:[#allocation60_spill] sm:$0xff] %v4888_v0  ;;  %v4890_v18 = vpop.f32.mrb[48].mxu1 }
 0x176   :  { %1423 = vmatprep.mubr.f32.mxu0 %v6087_v1  ;;  %v2057_v1 = vld [vmem:[%s6072_s2 + $0x10] sm:$0xff]  ;;  %6151 = vst [vmem:[#allocation61_spill] sm:$0xff] %v4890_v18 }
 0x177   :  { %v3525_v16 = vpack.c.bf16 %v2057_v1, %v2055_v20 }
 0x179   :  { %3398 = vmatmul.mubr.msk.f32.gmra.mrb[32].mxu0 %vm118_vm0, %v4171_v22  ;;  %3526 = vmatpush1.bf16.msra.mxu1 %v3525_v16  ;;  %v4892_v22 = vpop.f32.mrb[49].mxu1 }
 0x17a   :  { %1429 = vmatprep.mubr.f32.mxu0 %v6149_v3  ;;  %6152 = vst [vmem:[#allocation62_spill] sm:$0xff] %v4892_v22  ;;  %v4896_v2 = vpop.f32.mrb[50].mxu1 }
 0x17b   :  { %6153 = vst [vmem:[#allocation63_spill] sm:$0xff] %v4896_v2  ;;  %v4899_v62 = vpop.f32.mrb[51].mxu1  ;;  %v2066_v2 = vld [vmem:[%s6072_s2 + $0x58] sm:$0xff] }
 0x17c   :  { %6154 = vst [vmem:[#allocation64_spill] sm:$0xff] %v4899_v62  ;;  %v4901_v63 = vpop.f32.mrb[52].mxu1 }
 0x17d   :  { %3399 = vmatmul.mubr.msk.f32.gmra.mrb[34].mxu0 %vm118_vm0, %v4187_v24  ;;  %6155 = vst [vmem:[#allocation65_spill] sm:$0xff] %v4901_v63  ;;  %v4903_v14 = vpop.f32.mrb[53].mxu1 }
 0x17e   :  { %1435 = vmatprep.mubr.f32.mxu0 %v6149_v3  ;;  %6156 = vst [vmem:[#allocation66_spill] sm:$0xff] %v4903_v14  ;;  %v4907_v1 = vpop.f32.mrb[54].mxu1 }
 0x17f   :  { %6157 = vst [vmem:[#allocation67_spill] sm:$0xff] %v4907_v1  ;;  %v4910_v16 = vpop.f32.mrb[55].mxu1 }
 0x180   :  { %6158 = vst [vmem:[#allocation68_spill] sm:$0xff] %v4910_v16  ;;  %v4912_v24 = vpop.f32.mrb[56].mxu1 }
 0x181   :  { %3400 = vmatmul.mubr.msk.f32.gmra.mrb[36].mxu0 %vm118_vm0, %v4203_v26  ;;  %6159 = vst [vmem:[#allocation69_spill] sm:$0xff] %v4912_v24  ;;  %v4914_v20 = vpop.f32.mrb[57].mxu1 }
 0x182   :  { %1441 = vmatprep.mubr.f32.mxu0 %v6149_v3  ;;  %6160 = vst [vmem:[#allocation70_spill] sm:$0xff] %v4914_v20  ;;  %v4918_v62 = vpop.f32.mrb[58].mxu1 }
 0x183   :  { %6161 = vst [vmem:[#allocation71_spill] sm:$0xff] %v4918_v62  ;;  %v4921_v14 = vpop.f32.mrb[59].mxu1 }
 0x184   :  { %6162 = vst [vmem:[#allocation72_spill] sm:$0xff] %v4921_v14  ;;  %v4923_v26 = vpop.f32.mrb[60].mxu1 }
 0x185   :  { %3401 = vmatmul.mubr.msk.f32.gmra.mrb[38].mxu0 %vm118_vm0, %v4219_v28  ;;  %6163 = vst [vmem:[#allocation73_spill] sm:$0xff] %v4923_v26  ;;  %v4925_v1 = vpop.f32.mrb[61].mxu1 }
 0x186   :  { %1447 = vmatprep.mubr.f32.mxu0 %v6149_v3  ;;  %6164 = vst [vmem:[#allocation74_spill] sm:$0xff] %v4925_v1  ;;  %v4929_v16 = vpop.f32.mrb[62].mxu1  ;;  %v2059_v1 = vld [vmem:[%s6072_s2 + $0x20] sm:$0xff] }
 0x187   :  { %6165 = vst [vmem:[#allocation75_spill] sm:$0xff] %v4929_v16  ;;  %v4932_v20 = vpop.f32.mrb[63].mxu1 }
 0x188   :  { %6166 = vst [vmem:[#allocation76_spill] sm:$0xff] %v4932_v20  ;;  %v4934_v28 = vpop.f32.mrb[64].mxu1  ;;  %v2062_v20 = vld [vmem:[%s6072_s2 + $0x38] sm:$0xff] }
 0x189   :  { %3402 = vmatmul.mubr.msk.f32.gmra.mrb[40].mxu0 %vm118_vm0, %v4235_v30  ;;  %v4938_v62 = vpop.f32.mrb[65].mxu1  ;;  %v2060_v30 = vld [vmem:[%s6072_s2 + $0x28] sm:$0xff] }
 0x18a   :  { %1453 = vmatprep.mubr.f32.mxu0 %v6149_v3  ;;  %v4941_v26 = vpop.f32.mrb[66].mxu1 }
 0x18b   :  { %v4951_v16 = vpop.f32.mrb[67].mxu1 }
 0x18c   :  { %v4960_v14 = vpop.f32.mrb[68].mxu1 }
 0x18d   :  { %3403 = vmatmul.mubr.msk.f32.gmra.mrb[42].mxu0 %vm118_vm0, %v4251_v32  ;;  %v3527_v32 = vpack.c.bf16 %v2062_v20, %v2060_v30  ;;  %v4964_v63 = vpop.f32.mrb[69].mxu1 }
 0x18e   :  { %1459 = vmatprep.mubr.f32.mxu0 %v6149_v3  ;;  %v4967_v20 = vpop.f32.mrb[70].mxu1 }
 0x18f   :  { %3528 = vmatprep.subr.bf16.mxu1 %v3527_v32  ;;  %v4971_v30 = vpop.f32.mrb[71].mxu1 }
 0x190   :  { %v4974_v32 = vpop.f32.mrb[72].mxu1 }
 0x191   :  { %3404 = vmatmul.mubr.msk.f32.gmra.mrb[44].mxu0 %vm118_vm0, %v4267_v34  ;;  %v2061_v34 = vld [vmem:[%s6072_s2 + $0x30] sm:$0xff] }
 0x192   :  { %1465 = vmatprep.mubr.f32.mxu0 %v6149_v3  ;;  %v3529_v24 = vpack.c.bf16 %v2061_v34, %v2059_v1 }
 0x194   :  { %3530 = vmatpush1.bf16.msra.mxu1 %v3529_v24 }
 0x195   :  { %3405 = vmatmul.mubr.msk.f32.gmra.mrb[46].mxu0 %vm118_vm0, %v4283_v36  ;;  %v4978_v36 = vpop.f32.mrb[73].mxu1 }
 0x196   :  { %1471 = vmatprep.mubr.f32.mxu0 %v6149_v3  ;;  %v4981_v1 = vpop.f32.mrb[74].mxu1 }
 0x197   :  { %v4985_v24 = vpop.f32.mrb[75].mxu1 }
 0x199   :  { %3406 = vmatmul.mubr.msk.f32.gmra.mrb[0].mxu0 %vm118_vm0, %v4069_v9  ;;  %v4988_v9 = vpop.f32.mrb[76].mxu1 }
 0x19a   :  { %1477 = vmatprep.mubr.f32.mxu0 %v6149_v3  ;;  %v4992_v34 = vpop.f32.mrb[77].mxu1 }
 0x19d   :  { %3407 = vmatmul.mubr.msk.f32.gmra.mrb[2].mxu0 %vm118_vm0, %v4085_v11  ;;  %v4995_v11 = vpop.f32.mrb[78].mxu1 }
 0x19e   :  { %1483 = vmatprep.mubr.f32.mxu0 %v6149_v3  ;;  %v5005_v22 = vpop.f32.mrb[79].mxu1 }
 0x19f   :  { %v713_v18 = vpop.f32.mrb[80].mxu1 }
 0x1a0   :  { %v714_v0 = vpop.f32.mrb[81].mxu1 }
 0x1a1   :  { %3408 = vmatmul.mubr.msk.f32.gmra.mrb[4].mxu0 %vm118_vm0, %v4101_v13  ;;  %v2064_v13 = vld [vmem:[%s6072_s2 + $0x48] sm:$0xff]  ;;  %v717_v10 = vpop.f32.mrb[82].mxu1 }
 0x1a2   :  { %1489 = vmatprep.mubr.f32.mxu0 %v6149_v3  ;;  %v718_v4 = vpop.f32.mrb[83].mxu1 }
 0x1a5   :  { %3409 = vmatmul.mubr.msk.f32.gmra.mrb[6].mxu0 %vm118_vm0, %v4117_v15  ;;  %v3531_v15 = vpack.c.bf16 %v2066_v2, %v2064_v13  ;;  %v721_v2 = vpop.f32.mrb[84].mxu1 }
 0x1a6   :  { %1495 = vmatprep.mubr.f32.mxu0 %v6149_v3  ;;  %v722_v0 = vpop.f32.mrb[85].mxu1 }
 0x1a7   :  { %3532 = vmatprep.subr.bf16.mxu1 %v3531_v15  ;;  %v725_v18 = vpop.f32.mrb[86].mxu1  ;;  %v2073_v0 = vld [vmem:[%s6072_s2 + $0x90] sm:$0xff] }
 0x1a8   :  { %v726_v13 = vpop.f32.mrb[87].mxu1 }
 0x1a9   :  { %3410 = vmatmul.mubr.msk.f32.gmra.mrb[8].mxu0 %vm118_vm0, %v4133_v17  ;;  %v2063_v17 = vld [vmem:[%s6072_s2 + $0x40] sm:$0xff]  ;;  %v729_v15 = vpop.f32.mrb[88].mxu1 }
 0x1aa   :  { %1501 = vmatprep.mubr.f32.mxu0 %v6149_v3  ;;  %v3533_v7 = vpack.c.bf16 %v2065_v12, %v2063_v17  ;;  %v730_v8 = vpop.f32.mrb[89].mxu1  ;;  %v2077_v15 = vld [vmem:[%s6072_s2 + $0xb0] sm:$0xff] }
 0x1ab   :  { %v733_v10 = vpop.f32.mrb[90].mxu1  ;;  %v2067_v8 = vld [vmem:[%s6072_s2 + $0x60] sm:$0xff] }
 0x1ac   :  { %3534 = vmatpush1.bf16.msra.mxu1 %v3533_v7  ;;  %v2080_v10 = vld [vmem:[%s6072_s2 + $0xc8] sm:$0xff] }
 0x1ad   :  { %3411 = vmatmul.mubr.msk.f32.gmra.mrb[10].mxu0 %vm118_vm0, %v4149_v19  ;;  %v734_v19 = vpop.f32.mrb[91].mxu1 }
 0x1ae   :  { %1507 = vmatprep.mubr.f32.mxu0 %v6149_v3  ;;  %v737_v4 = vpop.f32.mrb[92].mxu1  ;;  %v2082_v19 = vld [vmem:[%s6072_s2 + $0xd8] sm:$0xff] }
 0x1af   :  { %v738_v12 = vpop.f32.mrb[93].mxu1  ;;  %v3547_v4 = vpack.c.bf16 %v2082_v19, %v2080_v10  ;;  %v6168_v10 = vld [vmem:[#allocation7_spill] sm:$0xff]  ;;  %v6169_v19 = vld [vmem:[#allocation8_spill] sm:$0xff] }
 0x1b0   :  { %v741_v7 = vpop.f32.mrb[94].mxu1  ;;  %v2079_v12 = vld [vmem:[%s6072_s2 + $0xc0] sm:$0xff] }
 0x1b1   :  { %3412 = vmatmul.mubr.msk.f32.gmra.mrb[12].mxu0 %vm118_vm0, %v4165_v21  ;;  %v742_v17 = vpop.f32.mrb[95].mxu1  ;;  %v2068_v21 = vld [vmem:[%s6072_s2 + $0x68] sm:$0xff] }
 0x1b2   :  { %1513 = vmatprep.mubr.f32.mxu0 %v6149_v3  ;;  %v2084_v17 = vld [vmem:[%s6072_s2 + $0xe8] sm:$0xff] }
 0x1b5   :  { %3413 = vmatmul.mubr.msk.f32.gmra.mrb[14].mxu0 %vm118_vm0, %v4181_v23  ;;  %v2070_v23 = vld [vmem:[%s6072_s2 + $0x78] sm:$0xff] }
 0x1b6   :  { %1519 = vmatprep.mubr.f32.mxu0 %v6149_v3 }
 0x1b9   :  { %3414 = vmatmul.mubr.msk.f32.gmra.mrb[16].mxu0 %vm118_vm0, %v4197_v25  ;;  %v3535_v25 = vpack.c.bf16 %v2070_v23, %v2068_v21  ;;  %v2086_v21 = vld [vmem:[%s6072_s2 + $0xf8] sm:$0xff] }
 0x1ba   :  { %1525 = vmatprep.mubr.f32.mxu0 %v6149_v3  ;;  %v3551_v23 = vpack.c.bf16 %v2086_v21, %v2084_v17 }
 0x1bb   :  { %3536 = vmatprep.subr.bf16.mxu1 %v3535_v25  ;;  %v2083_v25 = vld [vmem:[%s6072_s2 + $0xe0] sm:$0xff] }
 0x1bd   :  { %3415 = vmatmul.mubr.msk.f32.gmra.mrb[18].mxu0 %vm118_vm0, %v4213_v27  ;;  %v2069_v27 = vld [vmem:[%s6072_s2 + $0x70] sm:$0xff] }
 0x1be   :  { %1531 = vmatprep.mubr.f32.mxu0 %v6149_v3  ;;  %v3537_v2 = vpack.c.bf16 %v2069_v27, %v2067_v8 }
 0x1c0   :  { %3538 = vmatpush1.bf16.msra.mxu1 %v3537_v2 }
 0x1c1   :  { %3416 = vmatmul.mubr.msk.f32.gmra.mrb[20].mxu0 %vm118_vm0, %v4229_v29  ;;  %v6167_v29 = vld [vmem:[#allocation6_spill] sm:$0xff] }
 0x1c2   :  { %1537 = vmatprep.mubr.f32.mxu0 %v6149_v3 }
 0x1c5   :  { %3417 = vmatmul.mubr.msk.f32.gmra.mrb[22].mxu0 %vm118_vm0, %v4245_v31  ;;  %v2072_v31 = vld [vmem:[%s6072_s2 + $0x88] sm:$0xff] }
 0x1c6   :  { %1543 = vmatprep.mubr.f32.mxu0 %v6149_v3 }
 0x1c9   :  { %3418 = vmatmul.mubr.msk.f32.gmra.mrb[24].mxu0 %vm118_vm0, %v4261_v33  ;;  %v2074_v33 = vld [vmem:[%s6072_s2 + $0x98] sm:$0xff] }
 0x1ca   :  { %1549 = vmatprep.mubr.f32.mxu0 %v6149_v3 }
 0x1cd   :  { %3419 = vmatmul.mubr.msk.f32.gmra.mrb[26].mxu0 %vm118_vm0, %v4277_v35  ;;  %v3539_v35 = vpack.c.bf16 %v2074_v33, %v2072_v31 }
 0x1ce   :  { %1555 = vmatprep.mubr.f32.mxu0 %v6149_v3 }
 0x1cf   :  { %3540 = vmatprep.subr.bf16.mxu1 %v3539_v35 }
 0x1d1   :  { %3420 = vmatmul.mubr.msk.f32.gmra.mrb[28].mxu0 %vm118_vm0, %v4293_v37  ;;  %v2071_v37 = vld [vmem:[%s6072_s2 + $0x80] sm:$0xff] }
 0x1d2   :  { %1561 = vmatprep.mubr.f32.mxu0 %v6149_v3  ;;  %v3541_v18 = vpack.c.bf16 %v2073_v0, %v2071_v37 }
 0x1d4   :  { %3542 = vmatpush1.bf16.msra.mxu1 %v3541_v18 }
 0x1d5   :  { %3421 = vmatmul.mubr.msk.f32.gmra.mrb[30].mxu0 %vm118_vm0, %v6167_v29 }
 0x1d6   :  { %1567 = vmatprep.mubr.f32.mxu0 %v6149_v3 }
 0x1d9   :  { %3422 = vmatmul.mubr.msk.f32.gmra.mrb[48].mxu0 %vm118_vm0, %v4316_v40  ;;  %v2076_v40 = vld [vmem:[%s6072_s2 + $0xa8] sm:$0xff] }
 0x1da   :  { %1573 = vmatprep.mubr.f32.mxu0 %v6149_v3 }
 0x1dd   :  { %3423 = vmatmul.mubr.msk.f32.gmra.mrb[50].mxu0 %vm118_vm0, %v4327_v41  ;;  %v2078_v41 = vld [vmem:[%s6072_s2 + $0xb8] sm:$0xff] }
 0x1de   :  { %1579 = vmatprep.mubr.f32.mxu0 %v6149_v3  ;;  %v3543_v13 = vpack.c.bf16 %v2078_v41, %v2076_v40 }
 0x1e0   :  { %3544 = vmatprep.subr.bf16.mxu1 %v3543_v13 }
 0x1e1   :  { %3424 = vmatmul.mubr.msk.f32.gmra.mrb[52].mxu0 %vm118_vm0, %v4338_v42  ;;  %v2075_v42 = vld [vmem:[%s6072_s2 + $0xa0] sm:$0xff] }
 0x1e2   :  { %1585 = vmatprep.mubr.f32.mxu0 %v6149_v3 }
 0x1e5   :  { %3425 = vmatmul.mubr.msk.f32.gmra.mrb[54].mxu0 %vm118_vm0, %v4349_v43  ;;  %v3545_v43 = vpack.c.bf16 %v2077_v15, %v2075_v42 }
 0x1e6   :  { %1591 = vmatprep.mubr.f32.mxu0 %v6149_v3 }
 0x1e7   :  { %3546 = vmatpush1.bf16.msra.mxu1 %v3545_v43 }
 0x1e8   :  { %3548 = vmatprep.subr.bf16.mxu1 %v3547_v4 }
 0x1e9   :  { %3426 = vmatmul.mubr.msk.f32.gmra.mrb[56].mxu0 %vm118_vm0, %v4360_v44  ;;  %v2081_v44 = vld [vmem:[%s6072_s2 + $0xd0] sm:$0xff] }
 0x1ea   :  { %1597 = vmatprep.mubr.f32.mxu0 %v6149_v3  ;;  %v3549_v7 = vpack.c.bf16 %v2081_v44, %v2079_v12  ;;  %v6170_v44 = vld [vmem:[#allocation9_spill] sm:$0xff] }
 0x1ec   :  { %3550 = vmatpush1.bf16.msra.mxu1 %v3549_v7  ;;  %v3458_v7 = vld [vmem:[%s6072_s2 + $0x118] sm:$0xff] }
 0x1ed   :  { %3427 = vmatmul.mubr.msk.f32.gmra.mrb[58].mxu0 %vm118_vm0, %v4371_v45  ;;  %v2085_v45 = vld [vmem:[%s6072_s2 + $0xf0] sm:$0xff]  ;;  %3552 = vmatprep.subr.bf16.mxu1 %v3551_v23 }
 0x1ee   :  { %1603 = vmatprep.mubr.f32.mxu0 %v6149_v3  ;;  %v3553_v8 = vpack.c.bf16 %v2085_v45, %v2083_v25  ;;  %v6171_v25 = vld [vmem:[#allocation10_spill] sm:$0xff] }
 0x1f0   :  { %3554 = vmatpush1.bf16.msra.mxu1 %v3553_v8 }
 0x1f1   :  { %3428 = vmatmul.mubr.msk.f32.gmra.mrb[60].mxu0 %vm118_vm0, %v4382_v46 }
 0x1f2   :  { %1609 = vmatprep.mubr.f32.mxu0 %v6149_v3 }
 0x1f5   :  { %3429 = vmatmul.mubr.msk.f32.gmra.mrb[62].mxu0 %vm118_vm0, %v4393_v47 }
 0x1f6   :  { %1615 = vmatprep.mubr.f32.mxu0 %v6149_v3 }
 0x1f9   :  { %3430 = vmatmul.mubr.msk.f32.gmra.mrb[64].mxu0 %vm118_vm0, %v4404_v48 }
 0x1fa   :  { %1621 = vmatprep.mubr.f32.mxu0 %v6149_v3 }
 0x1fd   :  { %3431 = vmatmul.mubr.msk.f32.gmra.mrb[66].mxu0 %vm118_vm0, %v4415_v49 }
 0x1fe   :  { %1627 = vmatprep.mubr.f32.mxu0 %v6149_v3 }
 0x201   :  { %3432 = vmatmul.mubr.msk.f32.gmra.mrb[68].mxu0 %vm118_vm0, %v4426_v50 }
 0x202   :  { %1633 = vmatprep.mubr.f32.mxu0 %v6149_v3 }
 0x205   :  { %3433 = vmatmul.mubr.msk.f32.gmra.mrb[70].mxu0 %vm118_vm0, %v4437_v51 }
 0x206   :  { %1639 = vmatprep.mubr.f32.mxu0 %v6149_v3 }
 0x209   :  { %3434 = vmatmul.mubr.msk.f32.gmra.mrb[72].mxu0 %vm118_vm0, %v4448_v52 }
 0x20a   :  { %1645 = vmatprep.mubr.f32.mxu0 %v6149_v3 }
 0x20c   :  { %v1149_v46 = vpop.f32.mrb[112].mxu0 }
 0x20d   :  { %v5147_v47 = vadd.f32 %v1149_v46, %v4934_v28  ;;  %v1151_v48 = vpop.f32.mrb[113].mxu0  ;;  %3435 = vmatmul.mubr.msk.f32.gmra.mrb[74].mxu0 %vm118_vm0, %v4459_v53  ;;  %v6172_v46 = vld [vmem:[#allocation11_spill] sm:$0xff] }
 0x20e   :  { %v5152_v49 = vadd.f32 %v1151_v48, %v4938_v62  ;;  %1651 = vmatprep.mubr.f32.mxu0 %v6149_v3 }
 0x210   :  { %v1155_v51 = vpop.f32.mrb[114].mxu0 }
 0x211   :  { %v5158_v52 = vadd.f32 %v1155_v51, %v4941_v26  ;;  %v1157_v27 = vpop.f32.mrb[115].mxu0  ;;  %3436 = vmatmul.mubr.msk.f32.gmra.mrb[76].mxu0 %vm118_vm0, %v4470_v54  ;;  %v6179_v54 = vld [vmem:[#allocation18_spill] sm:$0xff] }
 0x212   :  { %v5163_v28 = vadd.f32 %v1157_v27, %v4951_v16  ;;  %1657 = vmatprep.mubr.f32.mxu0 %v6149_v3  ;;  %v6173_v27 = vld [vmem:[#allocation12_spill] sm:$0xff] }
 0x214   :  { %v1161_v62 = vpop.f32.mrb[116].mxu0 }
 0x215   :  { %v5169_v2 = vadd.f32 %v1161_v62, %v4960_v14  ;;  %v1163_v29 = vpop.f32.mrb[117].mxu0  ;;  %3437 = vmatmul.mubr.msk.f32.gmra.mrb[78].mxu0 %vm118_vm0, %v4481_v55 }
 0x216   :  { %v5174_v26 = vadd.f32 %v1163_v29, %v4964_v63  ;;  %1663 = vmatprep.mubr.f32.mxu0 %v6149_v3 }
 0x218   :  { %v1167_v16 = vpop.f32.mrb[118].mxu0 }
 0x219   :  { %v5180_v31 = vadd.f32 %v1167_v16, %v4967_v20  ;;  %v1169_v33 = vpop.f32.mrb[119].mxu0  ;;  %3438 = vmatmul.mubr.msk.f32.gmra.mrb[80].mxu0 %vm118_vm0, %v4492_v56  ;;  %v6177_v56 = vld [vmem:[#allocation16_spill] sm:$0xff] }
 0x21a   :  { %v5185_v14 = vadd.f32 %v1169_v33, %v4971_v30  ;;  %1669 = vmatprep.mubr.f32.mxu0 %v6149_v3 }
 0x21c   :  { %v1173_v63 = vpop.f32.mrb[120].mxu0 }
 0x21d   :  { %v5191_v35 = vadd.f32 %v1173_v63, %v4974_v32  ;;  %v1175_v37 = vpop.f32.mrb[121].mxu0  ;;  %3439 = vmatmul.mubr.msk.f32.gmra.mrb[82].mxu0 %vm118_vm0, %v4503_v57  ;;  %v6174_v63 = vld [vmem:[#allocation13_spill] sm:$0xff] }
 0x21e   :  { %v5196_v20 = vadd.f32 %v1175_v37, %v4978_v36  ;;  %1675 = vmatprep.mubr.f32.mxu0 %v6149_v3 }
 0x220   :  { %v1179_v30 = vpop.f32.mrb[122].mxu0 }
 0x221   :  { %v5202_v0 = vadd.f32 %v1179_v30, %v4981_v1  ;;  %v1181_v18 = vpop.f32.mrb[123].mxu0  ;;  %3440 = vmatmul.mubr.msk.f32.gmra.mrb[84].mxu0 %vm118_vm0, %v4514_v58 }
 0x222   :  { %v5207_v32 = vadd.f32 %v1181_v18, %v4985_v24  ;;  %1681 = vmatprep.mubr.f32.mxu0 %v6149_v3 }
 0x224   :  { %v1185_v36 = vpop.f32.mrb[124].mxu0 }
 0x225   :  { %v5213_v40 = vadd.f32 %v1185_v36, %v4988_v9  ;;  %v1187_v41 = vpop.f32.mrb[125].mxu0  ;;  %3441 = vmatmul.mubr.msk.f32.gmra.mrb[86].mxu0 %vm118_vm0, %v4525_v59 }
 0x226   :  { %v5218_v1 = vadd.f32 %v1187_v41, %v4992_v34  ;;  %1687 = vmatprep.mubr.f32.mxu0 %v6149_v3 }
 0x228   :  { %v1191_v24 = vpop.f32.mrb[126].mxu0 }
 0x229   :  { %v5224_v13 = vadd.f32 %v1191_v24, %v4995_v11  ;;  %v1193_v42 = vpop.f32.mrb[127].mxu0  ;;  %3442 = vmatmul.mubr.msk.f32.gmra.mrb[88].mxu0 %vm118_vm0, %v4536_v60 }
 0x22a   :  { %v5229_v9 = vadd.f32 %v1193_v42, %v5005_v22  ;;  %1693 = vmatprep.mubr.f32.mxu0 %v6149_v3 }
 0x22c   :  { %v1393_v34 = vpop.f32.mrb[128].mxu0 }
 0x22d   :  { %v1394_v15 = vpop.f32.mrb[129].mxu0  ;;  %3443 = vmatmul.mubr.msk.f32.gmra.mrb[90].mxu0 %vm118_vm0, %v4547_v61  ;;  %v3456_v61 = vld [vmem:[%s6072_s2 + $0x108] sm:$0xff] }
 0x22e   :  { %1699 = vmatprep.mubr.f32.mxu0 %v6149_v3  ;;  %v3555_v17 = vpack.c.bf16 %v3458_v7, %v3456_v61 }
 0x230   :  { %v1397_v11 = vpop.f32.mrb[130].mxu0  ;;  %3556 = vmatprep.subr.bf16.mxu1 %v3555_v17 }
 0x231   :  { %v1398_v43 = vpop.f32.mrb[131].mxu0  ;;  %3444 = vmatmul.mubr.msk.f32.gmra.mrb[92].mxu0 %vm118_vm0, %v6168_v10 }
 0x232   :  { %1705 = vmatprep.mubr.f32.mxu0 %v6149_v3 }
 0x234   :  { %v1401_v60 = vpop.f32.mrb[132].mxu0 }
 0x235   :  { %v1402_v22 = vpop.f32.mrb[133].mxu0  ;;  %3445 = vmatmul.mubr.msk.f32.gmra.mrb[94].mxu0 %vm118_vm0, %v6169_v19 }
 0x236   :  { %1711 = vmatprep.mubr.f32.mxu0 %v6149_v3 }
 0x238   :  { %v1405_v4 = vpop.f32.mrb[134].mxu0 }
 0x239   :  { %v1406_v12 = vpop.f32.mrb[135].mxu0  ;;  %3446 = vmatmul.mubr.msk.f32.gmra.mrb[96].mxu0 %vm118_vm0, %v6170_v44 }
 0x23a   :  { %1717 = vmatprep.mubr.f32.mxu0 %v6149_v3 }
 0x23c   :  { %v1409_v21 = vpop.f32.mrb[136].mxu0 }
 0x23d   :  { %v1410_v23 = vpop.f32.mrb[137].mxu0  ;;  %3447 = vmatmul.mubr.msk.f32.gmra.mrb[98].mxu0 %vm118_vm0, %v6171_v25 }
 0x23e   :  { %1723 = vmatprep.mubr.f32.mxu0 %v6149_v3  ;;  %v5299_v23 = vld [vmem:[%s6073_s3] ss:$0 sm:$0xff] }
 0x240   :  { %v1413_v45 = vpop.f32.mrb[138].mxu0 }
 0x241   :  { %v1414_v8 = vpop.f32.mrb[139].mxu0  ;;  %3448 = vmatmul.mubr.msk.f32.gmra.mrb[100].mxu0 %vm118_vm0, %v6172_v46  ;;  %v3457_v46 = vld [vmem:[%s6072_s2 + $0x110] sm:$0xff] }
 0x242   :  { %1729 = vmatprep.mubr.f32.mxu0 %v6149_v3  ;;  %v3455_v8 = vld [vmem:[%s6072_s2 + $0x100] sm:$0xff] }
 0x244   :  { %v1417_v48 = vpop.f32.mrb[140].mxu0 }
 0x245   :  { %v1418_v51 = vpop.f32.mrb[141].mxu0  ;;  %3449 = vmatmul.mubr.msk.f32.gmra.mrb[102].mxu0 %vm118_vm0, %v6173_v27  ;;  %v3462_v27 = vld [vmem:[%s6072_s2 + $0x138] sm:$0xff] }
 0x246   :  { %1735 = vmatprep.mubr.f32.mxu0 %v6149_v3  ;;  %v3460_v51 = vld [vmem:[%s6072_s2 + $0x128] sm:$0xff] }
 0x248   :  { %v1421_v62 = vpop.f32.mrb[142].mxu0 }
 0x249   :  { %v1422_v29 = vpop.f32.mrb[143].mxu0  ;;  %3450 = vmatmul.mubr.msk.f32.gmra.mrb[104].mxu0 %vm118_vm0, %v4624_v6 }
 0x24a   :  { %1741 = vmatprep.mubr.f32.mxu0 %v6149_v3 }
 0x24c   :  { %v1425_v16 = vpop.f32.mrb[32].mxu0 }
 0x24d   :  { %v1427_v33 = vpop.f32.mrb[33].mxu0  ;;  %3451 = vmatmul.mubr.msk.f32.gmra.mrb[106].mxu0 %vm118_vm0, %v6174_v63 }
 0x24e   :  { %v1888_v37 = vmax.f32 %v1425_v16, %v1427_v33  ;;  %1747 = vmatprep.mubr.f32.mxu0 %v6149_v3  ;;  %v3557_v16 = vpack.c.bf16 %v3457_v46, %v3455_v8  ;;  %v3463_v46 = vld [vmem:[%s6072_s2 + $0x140] sm:$0xff] }
 0x250   :  { %v1431_v30 = vpop.f32.mrb[34].mxu0 }
 0x251   :  { %v1433_v18 = vpop.f32.mrb[35].mxu0  ;;  %3452 = vmatmul.mubr.msk.f32.gmra.mrb[108].mxu0 %vm118_vm0, %v4646_v38 }
 0x252   :  { %v1889_v36 = vmax.f32 %v1431_v30, %v1433_v18  ;;  %1753 = vmatprep.mubr.f32.mxu0 %v6149_v3  ;;  %v3559_v30 = vpack.c.bf16 %v3462_v27, %v3460_v51  ;;  %v3459_v18 = vld [vmem:[%s6072_s2 + $0x120] sm:$0xff]  ;;  %v3468_v27 = vld [vmem:[%s6072_s2 + $0x168] sm:$0xff] }
 0x254   :  { %v1437_v41 = vpop.f32.mrb[36].mxu0 }
 0x255   :  { %v1439_v6 = vpop.f32.mrb[37].mxu0  ;;  %3453 = vmatmul.mubr.msk.f32.gmra.mrb[110].mxu0 %vm118_vm0, %v4657_v39 }
 0x256   :  { %v1890_v24 = vmax.f32 %v1437_v41, %v1439_v6  ;;  %v3461_v41 = vld [vmem:[%s6072_s2 + $0x130] sm:$0xff] }
 0x258   :  { %v1443_v42 = vpop.f32.mrb[38].mxu0 }
 0x259   :  { %v1445_v34 = vpop.f32.mrb[39].mxu0 }
 0x25a   :  { %v1891_v15 = vmax.f32 %v1443_v42, %v1445_v34  ;;  %v3464_v42 = vld [vmem:[%s6072_s2 + $0x148] sm:$0xff]  ;;  %v3466_v34 = vld [vmem:[%s6072_s2 + $0x158] sm:$0xff] }
 0x25b   :  { %v3563_v8 = vpack.c.bf16 %v3466_v34, %v3464_v42  ;;  %v3472_v34 = vld [vmem:[%s6072_s2 + $0x188] sm:$0xff] }
 0x25c   :  { %v5272_v11 = vpop.f32.mrb[40].mxu0 }
 0x25d   :  { %v5274_v43 = vpop.f32.mrb[41].mxu0 }
 0x25e   :  { %v1892_v10 = vmax.f32 %v5272_v11, %v5274_v43 }
 0x260   :  { %v5278_v38 = vpop.f32.mrb[42].mxu0 }
 0x261   :  { %v5280_v60 = vpop.f32.mrb[43].mxu0 }
 0x262   :  { %v1893_v22 = vmax.f32 %v5278_v38, %v5280_v60 }
 0x264   :  { %v5284_v19 = vpop.f32.mrb[44].mxu0 }
 0x265   :  { %v5286_v39 = vpop.f32.mrb[45].mxu0 }
 0x266   :  { %v1894_v4 = vmax.f32 %v5284_v19, %v5286_v39 }
 0x268   :  { %v5290_v12 = vpop.f32.mrb[46].mxu0 }
 0x269   :  { %v5292_v44 = vpop.f32.mrb[47].mxu0 }
 0x26a   :  { %v1895_v61 = vmax.f32 %v5290_v12, %v5292_v44 }
 0x26c   :  { %v1473_v7 = vpop.f32.mrb[0].mxu0 }
 0x26d   :  { %v1475_v17 = vpop.f32.mrb[1].mxu0 }
 0x26e   :  { %v1896_v21 = vmax.f32 %v1473_v7, %v1475_v17  ;;  %v3561_v17 = vpack.c.bf16 %v3461_v41, %v3459_v18  ;;  %v3467_v41 = vld [vmem:[%s6072_s2 + $0x160] sm:$0xff] }
 0x270   :  { %v1952_v25 = vmax.f32 %v1888_v37, %v1896_v21  ;;  %v1479_v45 = vpop.f32.mrb[2].mxu0 }
 0x271   :  { %v1481_v48 = vpop.f32.mrb[3].mxu0 }
 0x272   :  { %v1991_v62 = vadd.f32 %v5299_v23, %v1952_v25  ;;  %v1897_v29 = vmax.f32 %v1479_v45, %v1481_v48  ;;  %v3465_v48 = vld [vmem:[%s6072_s2 + $0x150] sm:$0xff] }
 0x274   :  { %v5314_v33 = vmax.f32 %v1991_v62, 0.0  ;;  %v1953_v63 = vmax.f32 %v1889_v36, %v1897_v29  ;;  %v1485_v37 = vpop.f32.mrb[4].mxu0 }
 0x275   :  { %v1487_v6 = vpop.f32.mrb[5].mxu0 }
 0x276   :  { %v1898_v36 = vmax.f32 %v1485_v37, %v1487_v6  ;;  %2152 = vmatmul.mubr.f32.vlgmr.msra.gmra.mrb[96].mxu1 %v5314_v33  ;;  %v1992_v7 = vadd.f32 %v5299_v23, %v1953_v63  ;;  %v3469_v6 = vld [vmem:[%s6072_s2 + $0x170] sm:$0xff] }
 0x277   :  { %2157 = vmatprep.mubr.f32.mxu1 %v6149_v3  ;;  %3558 = vmatpush1.bf16.msra.mxu1 %v3557_v16  ;;  %v3565_v16 = vpack.c.bf16 %v3465_v48, %v3463_v46  ;;  %v3471_v48 = vld [vmem:[%s6072_s2 + $0x180] sm:$0xff] }
 0x278   :  { %v1954_v21 = vmax.f32 %v1890_v24, %v1898_v36  ;;  %v1491_v25 = vpop.f32.mrb[6].mxu0  ;;  %v5331_v45 = vmax.f32 %v1992_v7, 0.0  ;;  %3560 = vmatprep.subr.bf16.mxu1 %v3559_v30  ;;  %v3470_v24 = vld [vmem:[%s6072_s2 + $0x178] sm:$0xff] }
 0x279   :  { %v1493_v51 = vpop.f32.mrb[7].mxu0  ;;  %v3567_v18 = vpack.c.bf16 %v3470_v24, %v3468_v27 }
 0x27a   :  { %v1899_v62 = vmax.f32 %v1491_v25, %v1493_v51  ;;  %2158 = vmatmul.mubr.f32.gmra.mrb[98].mxu1 %v5331_v45  ;;  %v1993_v29 = vadd.f32 %v5299_v23, %v1954_v21  ;;  %v3473_v51 = vld [vmem:[%s6072_s2 + $0x190] sm:$0xff] }
 0x27b   :  { %2163 = vmatprep.mubr.f32.mxu1 %v6149_v3  ;;  %3562 = vmatpush1.bf16.msra.mxu1 %v3561_v17  ;;  %v3569_v17 = vpack.c.bf16 %v3469_v6, %v3467_v41  ;;  %v3573_v43 = vpack.c.bf16 %v3473_v51, %v3471_v48 }
 0x27c   :  { %v1955_v63 = vmax.f32 %v1891_v15, %v1899_v62  ;;  %v1497_v37 = vpop.f32.mrb[8].mxu0  ;;  %v5348_v30 = vmax.f32 %v1993_v29, 0.0  ;;  %3564 = vmatprep.subr.bf16.mxu1 %v3563_v8  ;;  %v3474_v15 = vld [vmem:[%s6072_s2 + $0x198] sm:$0xff] }
 0x27d   :  { %v1499_v42 = vpop.f32.mrb[9].mxu0  ;;  %v3571_v46 = vpack.c.bf16 %v3474_v15, %v3472_v34  ;;  %v3478_v34 = vld [vmem:[%s6072_s2 + $0x1b8] sm:$0xff] }
 0x27e   :  { %v1900_v36 = vmax.f32 %v1497_v37, %v1499_v42  ;;  %2164 = vmatmul.mubr.f32.gmra.mrb[100].mxu1 %v5348_v30  ;;  %v1994_v7 = vadd.f32 %v5299_v23, %v1955_v63  ;;  %v3476_v42 = vld [vmem:[%s6072_s2 + $0x1a8] sm:$0xff] }
 0x27f   :  { %2169 = vmatprep.mubr.f32.mxu1 %v6149_v3  ;;  %3566 = vmatpush1.bf16.msra.mxu1 %v3565_v16  ;;  %v3575_v19 = vpack.c.bf16 %v3478_v34, %v3476_v42 }
 0x280   :  { %v1956_v21 = vmax.f32 %v1892_v10, %v1900_v36  ;;  %v1503_v25 = vpop.f32.mrb[10].mxu0  ;;  %v5368_v8 = vmax.f32 %v1994_v7, 0.0  ;;  %3568 = vmatprep.subr.bf16.mxu1 %v3567_v18 }
 0x281   :  { %v1505_v27 = vpop.f32.mrb[11].mxu0 }
 0x282   :  { %v1901_v24 = vmax.f32 %v1503_v25, %v1505_v27  ;;  %2170 = vmatmul.mubr.f32.gmra.mrb[102].mxu1 %v5368_v8  ;;  %v1995_v11 = vadd.f32 %v5299_v23, %v1956_v21  ;;  %v3475_v21 = vld [vmem:[%s6072_s2 + $0x1a0] sm:$0xff]  ;;  %v3477_v25 = vld [vmem:[%s6072_s2 + $0x1b0] sm:$0xff] }
 0x283   :  { %2175 = vmatprep.mubr.f32.mxu1 %v6149_v3  ;;  %3570 = vmatpush1.bf16.msra.mxu1 %v3569_v17  ;;  %v3577_v12 = vpack.c.bf16 %v3477_v25, %v3475_v21 }
 0x284   :  { %v1957_v10 = vmax.f32 %v1893_v22, %v1901_v24  ;;  %v1509_v62 = vpop.f32.mrb[12].mxu0  ;;  %v5382_v29 = vmax.f32 %v1995_v11, 0.0  ;;  %3572 = vmatprep.subr.bf16.mxu1 %v3571_v46 }
 0x285   :  { %v1511_v16 = vpop.f32.mrb[13].mxu0 }
 0x286   :  { %v1902_v63 = vmax.f32 %v1509_v62, %v1511_v16  ;;  %2176 = vmatmul.mubr.f32.gmra.mrb[104].mxu1 %v5382_v29  ;;  %v1996_v37 = vadd.f32 %v5299_v23, %v1957_v10  ;;  %v3480_v62 = vld [vmem:[%s6072_s2 + $0x1c8] sm:$0xff]  ;;  %v3482_v16 = vld [vmem:[%s6072_s2 + $0x1d8] sm:$0xff] }
 0x287   :  { %2181 = vmatprep.mubr.f32.mxu1 %v6149_v3  ;;  %3574 = vmatpush1.bf16.msra.mxu1 %v3573_v43 }
 0x288   :  { %v1958_v18 = vmax.f32 %v1894_v4, %v1902_v63  ;;  %v1515_v41 = vpop.f32.mrb[14].mxu0  ;;  %v5390_v38 = vmax.f32 %v1996_v37, 0.0  ;;  %3576 = vmatprep.subr.bf16.mxu1 %v3575_v19  ;;  %v3579_v63 = vpack.c.bf16 %v3482_v16, %v3480_v62 }
 0x289   :  { %v1517_v60 = vpop.f32.mrb[15].mxu0 }
 0x28a   :  { %v1903_v22 = vmax.f32 %v1515_v41, %v1517_v60  ;;  %2182 = vmatmul.mubr.f32.gmra.mrb[106].mxu1 %v5390_v38  ;;  %v1997_v6 = vadd.f32 %v5299_v23, %v1958_v18  ;;  %v3479_v60 = vld [vmem:[%s6072_s2 + $0x1c0] sm:$0xff] }
 0x28b   :  { %2187 = vmatprep.mubr.f32.mxu1 %v6149_v3  ;;  %3578 = vmatpush1.bf16.msra.mxu1 %v3577_v12  ;;  %v3484_v12 = vld [vmem:[%s6072_s2 + $0x1e8] sm:$0xff] }
 0x28c   :  { %v1959_v39 = vmax.f32 %v1895_v61, %v1903_v22  ;;  %v1521_v4 = vpop.f32.mrb[16].mxu0  ;;  %v5404_v15 = vmax.f32 %v1997_v6, 0.0  ;;  %3580 = vmatprep.subr.bf16.mxu1 %v3579_v63  ;;  %v3481_v22 = vld [vmem:[%s6072_s2 + $0x1d0] sm:$0xff]  ;;  %v6176_v63 = vld [vmem:[#allocation15_spill] sm:$0xff] }
 0x28d   :  { %v1523_v36 = vpop.f32.mrb[17].mxu0  ;;  %v3581_v6 = vpack.c.bf16 %v3481_v22, %v3479_v60  ;;  %v3483_v22 = vld [vmem:[%s6072_s2 + $0x1e0] sm:$0xff] }
 0x28e   :  { %v1904_v7 = vmax.f32 %v1521_v4, %v1523_v36  ;;  %2188 = vmatmul.mubr.f32.gmra.mrb[108].mxu1 %v5404_v15  ;;  %v1998_v17 = vadd.f32 %v5299_v23, %v1959_v39  ;;  %v6180_v36 = vld [vmem:[#allocation19_spill] sm:$0xff] }
 0x28f   :  { %2193 = vmatprep.mubr.f32.mxu1 %v6149_v3  ;;  %3582 = vmatpush1.bf16.msra.mxu1 %v3581_v6  ;;  %v3485_v6 = vld [vmem:[%s6072_s2 + $0x1f0] sm:$0xff] }
 0x290   :  { %v1527_v44 = vpop.f32.mrb[18].mxu0  ;;  %v5415_v61 = vmax.f32 %v1998_v17, 0.0  ;;  %v3585_v59 = vpack.c.bf16 %v3485_v6, %v3483_v22 }
 0x291   :  { %v1529_v46 = vpop.f32.mrb[19].mxu0 }
 0x292   :  { %v1905_v48 = vmax.f32 %v1527_v44, %v1529_v46  ;;  %2194 = vmatmul.mubr.f32.gmra.mrb[110].mxu1 %v5415_v61  ;;  %v3486_v44 = vld [vmem:[%s6072_s2 + $0x1f8] sm:$0xff] }
 0x293   :  { %2199 = vmatprep.mubr.f32.mxu1 %v6149_v3  ;;  %v3583_v46 = vpack.c.bf16 %v3486_v44, %v3484_v12 }
 0x294   :  { %v5419_v51 = vpop.f32.mrb[20].mxu0 }
 0x295   :  { %v1535_v27 = vpop.f32.mrb[21].mxu0  ;;  %3584 = vmatprep.subr.bf16.mxu1 %v3583_v46 }
 0x296   :  { %v1906_v24 = vmax.f32 %v5419_v51, %v1535_v27  ;;  %v6175_v27 = vld [vmem:[#allocation14_spill] sm:$0xff]  ;;  %3586 = vmatpush1.bf16.msra.mxu1 %v3585_v59 }
 0x298   :  { %v5422_v11 = vpop.f32.mrb[22].mxu0 }
 0x299   :  { %v5424_v43 = vpop.f32.mrb[23].mxu0 }
 0x29a   :  { %v1907_v10 = vmax.f32 %v5422_v11, %v5424_v43  ;;  %v6186_v43 = vld [vmem:[#allocation25_spill] sm:$0xff] }
 0x29c   :  { %v5434_v37 = vpop.f32.mrb[24].mxu0 }
 0x29d   :  { %v5436_v18 = vpop.f32.mrb[25].mxu0 }
 0x29e   :  { %v1908_v41 = vmax.f32 %v5434_v37, %v5436_v18  ;;  %v6188_v18 = vld [vmem:[#allocation26_spill] sm:$0xff] }
 0x2a0   :  { %v5446_v42 = vpop.f32.mrb[26].mxu0 }
 0x2a1   :  { %v5448_v34 = vpop.f32.mrb[27].mxu0 }
 0x2a4   :  { %v5452_v39 = vpop.f32.mrb[28].mxu0 }
 0x2a5   :  { %v5454_v4 = vpop.f32.mrb[29].mxu0 }
 0x2a8   :  { %v5458_v17 = vpop.f32.mrb[30].mxu0 }
 0x2a9   :  { %v5460_v21 = vpop.f32.mrb[31].mxu0 }
 0x2ac   :  { %v1569_v51 = vpop.f32.mrb[48].mxu0 }
 0x2ad   :  { %v3621_v62 = vadd.f32 %v1569_v51, %v6175_v27  ;;  %v1571_v16 = vpop.f32.mrb[49].mxu0  ;;  %v6178_v27 = vld [vmem:[#allocation17_spill] sm:$0xff] }
 0x2ae   :  { %v3622_v60 = vadd.f32 %v1571_v16, %v6176_v63 }
 0x2b0   :  { %v1912_v58 = vmax.f32 %v3621_v62, %v3622_v60  ;;  %v1575_v57 = vpop.f32.mrb[50].mxu0 }
 0x2b1   :  { %v3623_v12 = vadd.f32 %v1575_v57, %v6177_v56  ;;  %v1577_v44 = vpop.f32.mrb[51].mxu0  ;;  %v3488_v57 = vld [vmem:[%s6072_s2 + $0x208] sm:$0xff] }
 0x2b2   :  { %v1960_v51 = vmax.f32 %v1904_v7, %v1912_v58  ;;  %v3624_v46 = vadd.f32 %v1577_v44, %v6178_v27  ;;  %v6181_v58 = vld [vmem:[#allocation20_spill] sm:$0xff]  ;;  %v6182_v7 = vld [vmem:[#allocation21_spill] sm:$0xff]  ;;  %v6184_v27 = vld [vmem:[#allocation23_spill] sm:$0xff] }
 0x2b4   :  { %v1913_v55 = vmax.f32 %v3623_v12, %v3624_v46  ;;  %v1581_v16 = vpop.f32.mrb[52].mxu0  ;;  %v1999_v63 = vadd.f32 %v5299_v23, %v1960_v51  ;;  %v6183_v12 = vld [vmem:[#allocation22_spill] sm:$0xff] }
 0x2b5   :  { %v3625_v53 = vadd.f32 %v1581_v16, %v6179_v54  ;;  %v1583_v50 = vpop.f32.mrb[53].mxu0  ;;  %v3490_v54 = vld [vmem:[%s6072_s2 + $0x218] sm:$0xff] }
 0x2b6   :  { %v1961_v25 = vmax.f32 %v1905_v48, %v1913_v55  ;;  %v3626_v19 = vadd.f32 %v1583_v50, %v6180_v36  ;;  %v5483_v22 = vmax.f32 %v1999_v63, 0.0  ;;  %v3587_v50 = vpack.c.bf16 %v3490_v54, %v3488_v57 }
 0x2b8   :  { %v1914_v62 = vmax.f32 %v3625_v53, %v3626_v19  ;;  %v1587_v60 = vpop.f32.mrb[54].mxu0  ;;  %2200 = vmatmul.mubr.f32.gmra.mrb[112].mxu1 %v5483_v22  ;;  %v2000_v56 = vadd.f32 %v5299_v23, %v1961_v25  ;;  %3588 = vmatprep.subr.bf16.mxu1 %v3587_v50 }
 0x2b9   :  { %v3627_v55 = vadd.f32 %v1587_v60, %v6181_v58  ;;  %v1589_v59 = vpop.f32.mrb[55].mxu0  ;;  %2205 = vmatprep.mubr.f32.mxu1 %v6149_v3 }
 0x2ba   :  { %v1962_v53 = vmax.f32 %v1906_v24, %v1914_v62  ;;  %v3628_v48 = vadd.f32 %v1589_v59, %v6182_v7  ;;  %v5496_v19 = vmax.f32 %v2000_v56, 0.0  ;;  %v6185_v56 = vld [vmem:[#allocation24_spill] sm:$0xff] }
 0x2bc   :  { %v1915_v36 = vmax.f32 %v3627_v55, %v3628_v48  ;;  %v1593_v25 = vpop.f32.mrb[56].mxu0  ;;  %2206 = vmatmul.mubr.f32.gmra.mrb[114].mxu1 %v5496_v19  ;;  %v2001_v6 = vadd.f32 %v5299_v23, %v1962_v53  ;;  %v6187_v48 = vmax.f32 %v5446_v42, %v5448_v34  ;;  %v6191_v34 = vld [vmem:[#allocation28_spill] sm:$0xff] }
 0x2bd   :  { %v3629_v44 = vadd.f32 %v1593_v25, %v6183_v12  ;;  %v1595_v51 = vpop.f32.mrb[57].mxu0  ;;  %2211 = vmatprep.mubr.f32.mxu1 %v6149_v3 }
 0x2be   :  { %v1963_v24 = vmax.f32 %v1907_v10, %v1915_v36  ;;  %v3630_v46 = vadd.f32 %v1595_v51, %v6184_v27  ;;  %v5506_v16 = vmax.f32 %v2001_v6, 0.0 }
 0x2c0   :  { %v1916_v63 = vmax.f32 %v3629_v44, %v3630_v46  ;;  %v1599_v62 = vpop.f32.mrb[58].mxu0  ;;  %2212 = vmatmul.mubr.f32.gmra.mrb[116].mxu1 %v5506_v16  ;;  %v2002_v60 = vadd.f32 %v5299_v23, %v1963_v24  ;;  %v6189_v44 = vld [vmem:[#allocation27_spill] sm:$0xff]  ;;  %v6190_v24 = vmax.f32 %v5452_v39, %v5454_v4  ;;  %v6195_v4 = vld [vmem:[#allocation30_spill] sm:$0xff] }
 0x2c1   :  { %v3631_v57 = vadd.f32 %v1599_v62, %v6185_v56  ;;  %v1601_v54 = vpop.f32.mrb[59].mxu0  ;;  %2217 = vmatprep.mubr.f32.mxu1 %v6149_v3  ;;  %v6193_v56 = vld [vmem:[#allocation29_spill] sm:$0xff] }
 0x2c2   :  { %v1964_v11 = vmax.f32 %v1908_v41, %v1916_v63  ;;  %v3632_v10 = vadd.f32 %v1601_v54, %v6186_v43  ;;  %v5516_v58 = vmax.f32 %v2002_v60, 0.0 }
 0x2c4   :  { %v1917_v55 = vmax.f32 %v3631_v57, %v3632_v10  ;;  %v1605_v59 = vpop.f32.mrb[60].mxu0  ;;  %2218 = vmatmul.mubr.f32.gmra.mrb[118].mxu1 %v5516_v58  ;;  %v2003_v50 = vadd.f32 %v5299_v23, %v1964_v11  ;;  %v6194_v11 = vmax.f32 %v5458_v17, %v5460_v21 }
 0x2c5   :  { %v3633_v53 = vadd.f32 %v1605_v59, %v4779_v5  ;;  %v1607_v7 = vpop.f32.mrb[61].mxu0  ;;  %2223 = vmatprep.mubr.f32.mxu1 %v6149_v3 }
 0x2c6   :  { %v1965_v37 = vmax.f32 %v6187_v48, %v1917_v55  ;;  %v3634_v41 = vadd.f32 %v1607_v7, %v6188_v18  ;;  %v5526_v36 = vmax.f32 %v2003_v50, 0.0 }
 0x2c8   :  { %v1918_v25 = vmax.f32 %v3633_v53, %v3634_v41  ;;  %v1611_v6 = vpop.f32.mrb[62].mxu0  ;;  %2224 = vmatmul.mubr.f32.gmra.mrb[120].mxu1 %v5526_v36  ;;  %v2004_v12 = vadd.f32 %v5299_v23, %v1965_v37  ;;  %v6197_v53 = vld [vmem:[#allocation31_spill] sm:$0xff]  ;;  %v6198_v37 = vld [vmem:[#allocation32_spill] sm:$0xff] }
 0x2c9   :  { %v3635_v51 = vadd.f32 %v1611_v6, %v6189_v44  ;;  %v1613_v5 = vpop.f32.mrb[63].mxu0  ;;  %2229 = vmatprep.mubr.f32.mxu1 %v6149_v3  ;;  %v6201_v44 = vld [vmem:[#allocation34_spill] sm:$0xff] }
 0x2ca   :  { %v1966_v42 = vmax.f32 %v6190_v24, %v1918_v25  ;;  %v3636_v27 = vadd.f32 %v1613_v5, %v6191_v34  ;;  %v5536_v46 = vmax.f32 %v2004_v12, 0.0  ;;  %v6200_v25 = vld [vmem:[#allocation33_spill] sm:$0xff] }
 0x2cc   :  { %6192 = vst [vmem:[#allocation6_spill] sm:$0xff] %v5536_v46  ;;  %v1919_v63 = vmax.f32 %v3635_v51, %v3636_v27  ;;  %v1617_v62 = vpop.f32.mrb[64].mxu0  ;;  %2230 = vmatmul.mubr.f32.gmra.mrb[122].mxu1 %v5536_v46  ;;  %v2005_v60 = vadd.f32 %v5299_v23, %v1966_v42  ;;  %v6202_v42 = vld [vmem:[#allocation35_spill] sm:$0xff] }
 0x2cd   :  { %v3637_v57 = vadd.f32 %v1617_v62, %v6193_v56  ;;  %v1619_v54 = vpop.f32.mrb[65].mxu0  ;;  %2235 = vmatprep.mubr.f32.mxu1 %v6149_v3 }
 0x2ce   :  { %v1967_v39 = vmax.f32 %v6194_v11, %v1919_v63  ;;  %v3638_v43 = vadd.f32 %v1619_v54, %v6195_v4  ;;  %v5546_v10 = vmax.f32 %v2005_v60, 0.0  ;;  %v6203_v63 = vld [vmem:[#allocation36_spill] sm:$0xff] }
 0x2d0   :  { %6196 = vst [vmem:[#allocation7_spill] sm:$0xff] %v5546_v10  ;;  %v1920_v55 = vmax.f32 %v3637_v57, %v3638_v43  ;;  %v1623_v59 = vpop.f32.mrb[66].mxu0  ;;  %2236 = vmatmul.mubr.f32.gmra.mrb[124].mxu1 %v5546_v10  ;;  %v2006_v50 = vadd.f32 %v5299_v23, %v1967_v39  ;;  %v6204_v57 = vld [vmem:[#allocation37_spill] sm:$0xff]  ;;  %v6205_v39 = vld [vmem:[#allocation38_spill] sm:$0xff] }
 0x2d1   :  { %v3639_v7 = vadd.f32 %v1623_v59, %v6197_v53  ;;  %v1625_v48 = vpop.f32.mrb[67].mxu0  ;;  %2241 = vmatprep.mubr.f32.mxu1 %v6149_v3 }
 0x2d2   :  { %v3640_v18 = vadd.f32 %v1625_v48, %v6198_v37  ;;  %v5553_v41 = vmax.f32 %v2006_v50, 0.0  ;;  %v6206_v50 = vld [vmem:[#allocation39_spill] sm:$0xff]  ;;  %v6207_v48 = vld [vmem:[#allocation40_spill] sm:$0xff] }
 0x2d4   :  { %6199 = vst [vmem:[#allocation8_spill] sm:$0xff] %v5553_v41  ;;  %v1921_v17 = vmax.f32 %v3639_v7, %v3640_v18  ;;  %v1629_v21 = vpop.f32.mrb[68].mxu0  ;;  %2242 = vmatmul.mubr.f32.gmra.mrb[126].mxu1 %v5553_v41  ;;  %v6216_v18 = vld [vmem:[#allocation49_spill] sm:$0xff] }
 0x2d5   :  { %v3641_v6 = vadd.f32 %v1629_v21, %v6200_v25  ;;  %v1631_v12 = vpop.f32.mrb[69].mxu0  ;;  %2247 = vmatprep.mubr.f32.mxu1 %v6149_v3  ;;  %v6208_v25 = vld [vmem:[#allocation41_spill] sm:$0xff] }
 0x2d6   :  { %v3642_v51 = vadd.f32 %v1631_v12, %v6201_v44  ;;  %v6209_v44 = vld [vmem:[#allocation42_spill] sm:$0xff] }
 0x2d8   :  { %v1922_v5 = vmax.f32 %v3641_v6, %v3642_v51  ;;  %v1635_v24 = vpop.f32.mrb[70].mxu0 }
 0x2d9   :  { %v3643_v34 = vadd.f32 %v1635_v24, %v6202_v42  ;;  %v1637_v27 = vpop.f32.mrb[71].mxu0 }
 0x2da   :  { %v3644_v62 = vadd.f32 %v1637_v27, %v6203_v63 }
 0x2dc   :  { %v1923_v60 = vmax.f32 %v3643_v34, %v3644_v62  ;;  %v1641_v56 = vpop.f32.mrb[72].mxu0  ;;  %v6210_v34 = vld [vmem:[#allocation43_spill] sm:$0xff]  ;;  %v6211_v62 = vld [vmem:[#allocation44_spill] sm:$0xff] }
 0x2dd   :  { %v5562_v54 = vadd.f32 %v1641_v56, %v6204_v57  ;;  %v1643_v11 = vpop.f32.mrb[73].mxu0 }
 0x2de   :  { %v5565_v4 = vadd.f32 %v1643_v11, %v6205_v39  ;;  %v6212_v11 = vld [vmem:[#allocation45_spill] sm:$0xff] }
 0x2e0   :  { %v1924_v43 = vmax.f32 %v5562_v54, %v5565_v4  ;;  %v1647_v59 = vpop.f32.mrb[74].mxu0 }
 0x2e1   :  { %v5570_v53 = vadd.f32 %v1647_v59, %v6206_v50  ;;  %v1649_v7 = vpop.f32.mrb[75].mxu0  ;;  %v6213_v59 = vld [vmem:[#allocation46_spill] sm:$0xff] }
 0x2e2   :  { %v5573_v37 = vadd.f32 %v1649_v7, %v6207_v48 }
 0x2e4   :  { %v1653_v21 = vpop.f32.mrb[76].mxu0 }
 0x2e5   :  { %v5578_v6 = vadd.f32 %v1653_v21, %v6208_v25  ;;  %v1655_v12 = vpop.f32.mrb[77].mxu0  ;;  %v6214_v21 = vld [vmem:[#allocation47_spill] sm:$0xff] }
 0x2e6   :  { %v5581_v51 = vadd.f32 %v1655_v12, %v6209_v44 }
 0x2e8   :  { %v1659_v42 = vpop.f32.mrb[78].mxu0 }
 0x2e9   :  { %v5586_v27 = vadd.f32 %v1659_v42, %v6210_v34  ;;  %v1661_v63 = vpop.f32.mrb[79].mxu0  ;;  %v6215_v42 = vld [vmem:[#allocation48_spill] sm:$0xff] }
 0x2ea   :  { %v5589_v56 = vadd.f32 %v1661_v63, %v6211_v62 }
 0x2ec   :  { %v1665_v54 = vpop.f32.mrb[80].mxu0 }
 0x2ed   :  { %v3653_v39 = vadd.f32 %v1665_v54, %v6212_v11  ;;  %v1667_v4 = vpop.f32.mrb[81].mxu0  ;;  %v6217_v54 = vld [vmem:[#allocation50_spill] sm:$0xff] }
 0x2ee   :  { %v3654_v50 = vadd.f32 %v1667_v4, %v6213_v59  ;;  %v6218_v59 = vld [vmem:[#allocation51_spill] sm:$0xff] }
 0x2f0   :  { %v1928_v7 = vmax.f32 %v3653_v39, %v3654_v50  ;;  %v1671_v48 = vpop.f32.mrb[82].mxu0 }
 0x2f1   :  { %v3655_v25 = vadd.f32 %v1671_v48, %v6214_v21  ;;  %v1673_v12 = vpop.f32.mrb[83].mxu0  ;;  %v6219_v21 = vld [vmem:[#allocation52_spill] sm:$0xff] }
 0x2f2   :  { %v1968_v44 = vmax.f32 %v1920_v55, %v1928_v7  ;;  %v3656_v34 = vadd.f32 %v1673_v12, %v6215_v42  ;;  %v6221_v42 = vld [vmem:[#allocation54_spill] sm:$0xff] }
 0x2f4   :  { %v1929_v24 = vmax.f32 %v3655_v25, %v3656_v34  ;;  %v1677_v63 = vpop.f32.mrb[84].mxu0  ;;  %v2007_v62 = vadd.f32 %v5299_v23, %v1968_v44 }
 0x2f5   :  { %v3657_v57 = vadd.f32 %v1677_v63, %v6216_v18  ;;  %v1679_v41 = vpop.f32.mrb[85].mxu0 }
 0x2f6   :  { %v1969_v10 = vmax.f32 %v1921_v17, %v1929_v24  ;;  %v3658_v11 = vadd.f32 %v1679_v41, %v6217_v54  ;;  %v5600_v46 = vmax.f32 %v2007_v62, 0.0 }
 0x2f8   :  { %v1930_v39 = vmax.f32 %v3657_v57, %v3658_v11  ;;  %v1683_v4 = vpop.f32.mrb[86].mxu0  ;;  %2248 = vmatmul.mubr.f32.gmra.mrb[128].mxu1 %v5600_v46  ;;  %v2008_v55 = vadd.f32 %v5299_v23, %v1969_v10  ;;  %v6220_v57 = vld [vmem:[#allocation53_spill] sm:$0xff]  ;;  %v6222_v11 = vld [vmem:[#allocation55_spill] sm:$0xff] }
 0x2f9   :  { %v3659_v50 = vadd.f32 %v1683_v4, %v6218_v59  ;;  %v1685_v7 = vpop.f32.mrb[87].mxu0  ;;  %2253 = vmatprep.mubr.f32.mxu1 %v6149_v3  ;;  %v6223_v59 = vld [vmem:[#allocation56_spill] sm:$0xff] }
 0x2fa   :  { %v1970_v48 = vmax.f32 %v1922_v5, %v1930_v39  ;;  %v3660_v18 = vadd.f32 %v1685_v7, %v6219_v21  ;;  %v5607_v25 = vmax.f32 %v2008_v55, 0.0 }
 0x2fc   :  { %v1931_v17 = vmax.f32 %v3659_v50, %v3660_v18  ;;  %v1689_v41 = vpop.f32.mrb[88].mxu0  ;;  %2254 = vmatmul.mubr.f32.gmra.mrb[130].mxu1 %v5607_v25  ;;  %v2009_v24 = vadd.f32 %v5299_v23, %v1970_v48  ;;  %v6224_v18 = vld [vmem:[#allocation57_spill] sm:$0xff] }
 0x2fd   :  { %v3661_v12 = vadd.f32 %v1689_v41, %v6220_v57  ;;  %v1691_v44 = vpop.f32.mrb[89].mxu0  ;;  %2259 = vmatprep.mubr.f32.mxu1 %v6149_v3 }
 0x2fe   :  { %v1971_v10 = vmax.f32 %v1923_v60, %v1931_v17  ;;  %v3662_v34 = vadd.f32 %v1691_v44, %v6221_v42  ;;  %v5614_v63 = vmax.f32 %v2009_v24, 0.0  ;;  %v6225_v24 = vmax.f32 %v5570_v53, %v5573_v37  ;;  %v6229_v37 = vld [vmem:[#allocation60_spill] sm:$0xff] }
 0x300   :  { %v1932_v5 = vmax.f32 %v3661_v12, %v3662_v34  ;;  %v1695_v62 = vpop.f32.mrb[90].mxu0  ;;  %2260 = vmatmul.mubr.f32.gmra.mrb[132].mxu1 %v5614_v63  ;;  %v2010_v54 = vadd.f32 %v5299_v23, %v1971_v10 }
 0x301   :  { %v3663_v39 = vadd.f32 %v1695_v62, %v6222_v11  ;;  %v1697_v4 = vpop.f32.mrb[91].mxu0  ;;  %2265 = vmatprep.mubr.f32.mxu1 %v6149_v3  ;;  %v6228_v11 = vmax.f32 %v5578_v6, %v5581_v51  ;;  %v6232_v51 = vld [vmem:[#allocation62_spill] sm:$0xff] }
 0x302   :  { %v1972_v55 = vmax.f32 %v1924_v43, %v1932_v5  ;;  %v3664_v50 = vadd.f32 %v1697_v4, %v6223_v59  ;;  %v5621_v7 = vmax.f32 %v2010_v54, 0.0  ;;  %v6226_v43 = vld [vmem:[#allocation58_spill] sm:$0xff]  ;;  %v6227_v5 = vld [vmem:[#allocation59_spill] sm:$0xff] }
 0x304   :  { %v1933_v60 = vmax.f32 %v3663_v39, %v3664_v50  ;;  %v1701_v48 = vpop.f32.mrb[92].mxu0  ;;  %2266 = vmatmul.mubr.f32.gmra.mrb[134].mxu1 %v5621_v7  ;;  %v2011_v21 = vadd.f32 %v5299_v23, %v1972_v55 }
 0x305   :  { %v3665_v17 = vadd.f32 %v1701_v48, %v6224_v18  ;;  %v1703_v41 = vpop.f32.mrb[93].mxu0  ;;  %2271 = vmatprep.mubr.f32.mxu1 %v6149_v3  ;;  %v6231_v18 = vmax.f32 %v5586_v27, %v5589_v56  ;;  %v6235_v56 = vld [vmem:[#allocation64_spill] sm:$0xff] }
 0x306   :  { %v1973_v57 = vmax.f32 %v6225_v24, %v1933_v60  ;;  %v3666_v12 = vadd.f32 %v1703_v41, %v6226_v43  ;;  %v5631_v44 = vmax.f32 %v2011_v21, 0.0  ;;  %v6230_v60 = vld [vmem:[#allocation61_spill] sm:$0xff] }
 0x308   :  { %v1934_v10 = vmax.f32 %v3665_v17, %v3666_v12  ;;  %v1707_v42 = vpop.f32.mrb[94].mxu0  ;;  %2272 = vmatmul.mubr.f32.gmra.mrb[136].mxu1 %v5631_v44  ;;  %v2012_v34 = vadd.f32 %v5299_v23, %v1973_v57  ;;  %v6233_v12 = vld [vmem:[#allocation63_spill] sm:$0xff] }
 0x309   :  { %v3667_v62 = vadd.f32 %v1707_v42, %v6227_v5  ;;  %v1709_v54 = vpop.f32.mrb[95].mxu0  ;;  %2277 = vmatprep.mubr.f32.mxu1 %v6149_v3 }
 0x30a   :  { %v1974_v53 = vmax.f32 %v6228_v11, %v1934_v10  ;;  %v3668_v39 = vadd.f32 %v1709_v54, %v6229_v37  ;;  %v5641_v4 = vmax.f32 %v2012_v34, 0.0  ;;  %v6234_v34 = vmax.f32 %v5147_v47, %v5152_v49  ;;  %v6236_v37 = vld [vmem:[#allocation65_spill] sm:$0xff]  ;;  %v6238_v49 = vld [vmem:[#allocation66_spill] sm:$0xff] }
 0x30c   :  { %v1935_v55 = vmax.f32 %v3667_v62, %v3668_v39  ;;  %v1713_v59 = vpop.f32.mrb[96].mxu0  ;;  %2278 = vmatmul.mubr.f32.gmra.mrb[138].mxu1 %v5641_v4  ;;  %v2013_v50 = vadd.f32 %v5299_v23, %v1974_v53 }
 0x30d   :  { %v3669_v48 = vadd.f32 %v1713_v59, %v6230_v60  ;;  %v1715_v21 = vpop.f32.mrb[97].mxu0  ;;  %2283 = vmatprep.mubr.f32.mxu1 %v6149_v3  ;;  %v6237_v59 = vmax.f32 %v5158_v52, %v5163_v28  ;;  %v6241_v28 = vld [vmem:[#allocation68_spill] sm:$0xff] }
 0x30e   :  { %v1975_v6 = vmax.f32 %v6231_v18, %v1935_v55  ;;  %v3670_v17 = vadd.f32 %v1715_v21, %v6232_v51  ;;  %v5651_v41 = vmax.f32 %v2013_v50, 0.0 }
 0x310   :  { %v1936_v24 = vmax.f32 %v3669_v48, %v3670_v17  ;;  %v1719_v57 = vpop.f32.mrb[98].mxu0  ;;  %2284 = vmatmul.mubr.f32.gmra.mrb[140].mxu1 %v5651_v41  ;;  %v2014_v43 = vadd.f32 %v5299_v23, %v1975_v6  ;;  %v6239_v6 = vld [vmem:[#allocation67_spill] sm:$0xff] }
 0x311   :  { %v3671_v10 = vadd.f32 %v1719_v57, %v6233_v12  ;;  %v1721_v42 = vpop.f32.mrb[99].mxu0  ;;  %2289 = vmatprep.mubr.f32.mxu1 %v6149_v3 }
 0x312   :  { %v1976_v27 = vmax.f32 %v1936_v24, %v6234_v34  ;;  %v3672_v5 = vadd.f32 %v1721_v42, %v6235_v56  ;;  %v5661_v62 = vmax.f32 %v2014_v43, 0.0  ;;  %v6240_v24 = vmax.f32 %v5169_v2, %v5174_v26  ;;  %v6242_v34 = vld [vmem:[#allocation69_spill] sm:$0xff]  ;;  %v6244_v26 = vld [vmem:[#allocation70_spill] sm:$0xff] }
 0x314   :  { %v1937_v54 = vmax.f32 %v3671_v10, %v3672_v5  ;;  %v1725_v11 = vpop.f32.mrb[100].mxu0  ;;  %2290 = vmatmul.mubr.f32.gmra.mrb[142].mxu1 %v5661_v62  ;;  %v2015_v53 = vadd.f32 %v5299_v23, %v1976_v27  ;;  %v6243_v5 = vmax.f32 %v5180_v31, %v5185_v14  ;;  %v6247_v14 = vld [vmem:[#allocation72_spill] sm:$0xff] }
 0x315   :  { %v3673_v39 = vadd.f32 %v1725_v11, %v6236_v37  ;;  %v1727_v55 = vpop.f32.mrb[101].mxu0  ;;  %2295 = vmatprep.mubr.f32.mxu1 %v6149_v3 }
 0x316   :  { %v1977_v47 = vmax.f32 %v1937_v54, %v6237_v59  ;;  %v3674_v50 = vadd.f32 %v1727_v55, %v6238_v49  ;;  %v5671_v60 = vmax.f32 %v2015_v53, 0.0  ;;  %v6245_v55 = vld [vmem:[#allocation71_spill] sm:$0xff]  ;;  %v6246_v49 = vmax.f32 %v5191_v35, %v5196_v20  ;;  %v6250_v20 = vld [vmem:[#allocation74_spill] sm:$0xff] }
 0x318   :  { %v1938_v48 = vmax.f32 %v3673_v39, %v3674_v50  ;;  %v1731_v21 = vpop.f32.mrb[102].mxu0  ;;  %2296 = vmatmul.mubr.f32.gmra.mrb[144].mxu1 %v5671_v60  ;;  %v2016_v18 = vadd.f32 %v5299_v23, %v1977_v47 }
 0x319   :  { %v3675_v51 = vadd.f32 %v1731_v21, %v6239_v6  ;;  %v1733_v17 = vpop.f32.mrb[103].mxu0  ;;  %2299 = vmatprep.mubr.f32.mxu1 %v6149_v3 }
 0x31a   :  { %v1978_v52 = vmax.f32 %v1938_v48, %v6240_v24  ;;  %v3676_v57 = vadd.f32 %v1733_v17, %v6241_v28  ;;  %v5681_v43 = vmax.f32 %v2016_v18, 0.0 }
 0x31c   :  { %v1939_v12 = vmax.f32 %v3675_v51, %v3676_v57  ;;  %v1737_v10 = vpop.f32.mrb[104].mxu0  ;;  %2300 = vmatmul.mubr.f32.gmra.mrb[146].mxu1 %v5681_v43  ;;  %v2017_v42 = vadd.f32 %v5299_v23, %v1978_v52  ;;  %v6248_v51 = vld [vmem:[#allocation73_spill] sm:$0xff]  ;;  %v6249_v52 = vmax.f32 %v5202_v0, %v5207_v32  ;;  %v6253_v32 = vld [vmem:[#allocation76_spill] sm:$0xff] }
 0x31d   :  { %v3677_v27 = vadd.f32 %v1737_v10, %v6242_v34  ;;  %v1739_v56 = vpop.f32.mrb[105].mxu0  ;;  %2303 = vmatprep.mubr.f32.mxu1 %v6149_v3  ;;  %v6251_v34 = vld [vmem:[#allocation75_spill] sm:$0xff] }
 0x31e   :  { %v1979_v2 = vmax.f32 %v1939_v12, %v6243_v5  ;;  %v3678_v54 = vadd.f32 %v1739_v56, %v6244_v26  ;;  %v5691_v11 = vmax.f32 %v2017_v42, 0.0  ;;  %v6252_v5 = vmax.f32 %v5213_v40, %v5218_v1 }
 0x320   :  { %v1940_v53 = vmax.f32 %v3677_v27, %v3678_v54  ;;  %v1743_v37 = vpop.f32.mrb[106].mxu0  ;;  %2304 = vmatmul.mubr.f32.gmra.mrb[148].mxu1 %v5691_v11  ;;  %v2018_v39 = vadd.f32 %v5299_v23, %v1979_v2 }
 0x321   :  { %v3679_v59 = vadd.f32 %v1743_v37, %v6245_v55  ;;  %v1745_v47 = vpop.f32.mrb[107].mxu0  ;;  %2307 = vmatprep.mubr.f32.mxu1 %v6149_v3  ;;  %v6254_v37 = vmax.f32 %v5224_v13, %v5229_v9  ;;  %v3492_v13 = vld [vmem:[%s6072_s2 + $0x228] sm:$0xff]  ;;  %v3494_v9 = vld [vmem:[%s6072_s2 + $0x238] sm:$0xff] }
 0x322   :  { %v1980_v31 = vmax.f32 %v1940_v53, %v6246_v49  ;;  %v3680_v50 = vadd.f32 %v1745_v47, %v6247_v14  ;;  %v5701_v48 = vmax.f32 %v2018_v39, 0.0  ;;  %v3489_v47 = vld [vmem:[%s6072_s2 + $0x210] sm:$0xff]  ;;  %v3591_v49 = vpack.c.bf16 %v3494_v9, %v3492_v13  ;;  %v3511_v13 = vld [vmem:[%s6072_s2 + $0x2c0] sm:$0xff] }
 0x323   :  { %v3493_v14 = vld [vmem:[%s6072_s2 + $0x230] sm:$0xff] }
 0x324   :  { %v1941_v21 = vmax.f32 %v3679_v59, %v3680_v50  ;;  %v1749_v18 = vpop.f32.mrb[108].mxu0  ;;  %2308 = vmatmul.mubr.f32.gmra.mrb[150].mxu1 %v5701_v48  ;;  %v2019_v6 = vadd.f32 %v5299_v23, %v1980_v31  ;;  %v3487_v59 = vld [vmem:[%s6072_s2 + $0x200] sm:$0xff]  ;;  %v3496_v50 = vld [vmem:[%s6072_s2 + $0x248] sm:$0xff]  ;;  %v3513_v9 = vld [vmem:[%s6072_s2 + $0x2d0] sm:$0xff] }
 0x325   :  { %v3681_v17 = vadd.f32 %v1749_v18, %v6248_v51  ;;  %v1751_v24 = vpop.f32.mrb[109].mxu0  ;;  %2311 = vmatprep.mubr.f32.mxu1 %v6149_v3  ;;  %v3491_v31 = vld [vmem:[%s6072_s2 + $0x220] sm:$0xff] }
 0x326   :  { %v1981_v35 = vmax.f32 %v1941_v21, %v6249_v52  ;;  %v3682_v28 = vadd.f32 %v1751_v24, %v6250_v20  ;;  %v5711_v57 = vmax.f32 %v2019_v6, 0.0  ;;  %v3498_v21 = vld [vmem:[%s6072_s2 + $0x258] sm:$0xff]  ;;  %v3593_v18 = vpack.c.bf16 %v3493_v14, %v3491_v31  ;;  %v3495_v51 = vld [vmem:[%s6072_s2 + $0x240] sm:$0xff]  ;;  %v3500_v24 = vld [vmem:[%s6072_s2 + $0x268] sm:$0xff] }
 0x327   :  { %v3595_v6 = vpack.c.bf16 %v3498_v21, %v3496_v50  ;;  %v3502_v52 = vld [vmem:[%s6072_s2 + $0x278] sm:$0xff]  ;;  %v3613_v31 = vpack.c.bf16 %v3513_v9, %v3511_v13  ;;  %v3515_v50 = vld [vmem:[%s6072_s2 + $0x2e0] sm:$0xff]  ;;  %v3517_v21 = vld [vmem:[%s6072_s2 + $0x2f0] sm:$0xff] }
 0x328   :  { %v1942_v12 = vmax.f32 %v3681_v17, %v3682_v28  ;;  %v1755_v10 = vpop.f32.mrb[110].mxu0  ;;  %2312 = vmatmul.mubr.f32.gmra.mrb[152].mxu1 %v5711_v57  ;;  %v2020_v42 = vadd.f32 %v5299_v23, %v1981_v35  ;;  %v3497_v17 = vld [vmem:[%s6072_s2 + $0x250] sm:$0xff]  ;;  %v3599_v20 = vpack.c.bf16 %v3502_v52, %v3500_v24  ;;  %v3499_v28 = vld [vmem:[%s6072_s2 + $0x260] sm:$0xff] }
 0x329   :  { %v3683_v27 = vadd.f32 %v1755_v10, %v6251_v34  ;;  %v1757_v56 = vpop.f32.mrb[111].mxu0  ;;  %2315 = vmatprep.mubr.f32.mxu1 %v6149_v3  ;;  %v3597_v35 = vpack.c.bf16 %v3497_v17, %v3495_v51  ;;  %v3504_v10 = vld [vmem:[%s6072_s2 + $0x288] sm:$0xff]  ;;  %v6256_v51 = vld [vmem:[#allocation7_spill] sm:$0xff] }
 0x32a   :  { %v1982_v0 = vmax.f32 %v1942_v12, %v6252_v5  ;;  %v3684_v2 = vadd.f32 %v1757_v56, %v6253_v32  ;;  %v5721_v26 = vmax.f32 %v2020_v42, 0.0  ;;  %v3501_v12 = vld [vmem:[%s6072_s2 + $0x270] sm:$0xff]  ;;  %v3506_v42 = vld [vmem:[%s6072_s2 + $0x298] sm:$0xff]  ;;  %v3503_v56 = vld [vmem:[%s6072_s2 + $0x280] sm:$0xff] }
 0x32b   :  { %v3601_v34 = vpack.c.bf16 %v3501_v12, %v3499_v28  ;;  %v3505_v5 = vld [vmem:[%s6072_s2 + $0x290] sm:$0xff]  ;;  %v3510_v32 = vld [vmem:[%s6072_s2 + $0x2b8] sm:$0xff]  ;;  %v6257_v17 = vld [vmem:[#allocation8_spill] sm:$0xff] }
 0x32c   :  { %v1943_v54 = vmax.f32 %v3683_v27, %v3684_v2  ;;  %2316 = vmatmul.mubr.f32.gmra.mrb[154].mxu1 %v5721_v26  ;;  %v2021_v53 = vadd.f32 %v5299_v23, %v1982_v0  ;;  %v3603_v27 = vpack.c.bf16 %v3506_v42, %v3504_v10  ;;  %v3508_v0 = vld [vmem:[%s6072_s2 + $0x2a8] sm:$0xff]  ;;  %v3605_v2 = vpack.c.bf16 %v3505_v5, %v3503_v56 }
 0x32d   :  { %2319 = vmatprep.mubr.f32.mxu1 %v6149_v3 }
 0x32e   :  { %v1983_v39 = vmax.f32 %v1943_v54, %v6254_v37  ;;  %v5729_v55 = vmax.f32 %v2021_v53, 0.0  ;;  %v3607_v54 = vpack.c.bf16 %v3510_v32, %v3508_v0  ;;  %v3507_v53 = vld [vmem:[%s6072_s2 + $0x2a0] sm:$0xff]  ;;  %v3509_v37 = vld [vmem:[%s6072_s2 + $0x2b0] sm:$0xff] }
 0x330   :  { %2320 = vmatmul.mubr.f32.gmra.mrb[156].mxu1 %v5729_v55  ;;  %v2022_v40 = vadd.f32 %v5299_v23, %v1983_v39  ;;  %v3589_v23 = vpack.c.bf16 %v3489_v47, %v3487_v59  ;;  %v3512_v39 = vld [vmem:[%s6072_s2 + $0x2c8] sm:$0xff]  ;;  %v3609_v59 = vpack.c.bf16 %v3509_v37, %v3507_v53 }
 0x331   :  { %2323 = vmatprep.mubr.f32.mxu1 %v6149_v3 }
 0x332   :  { %v5734_v1 = vmax.f32 %v2022_v40, 0.0  ;;  %v3514_v40 = vld [vmem:[%s6072_s2 + $0x2d8] sm:$0xff] }
 0x333   :  { %v3611_v47 = vpack.c.bf16 %v3514_v40, %v3512_v39 }
 0x334   :  { %2324 = vmatmul.mubr.f32.gmra.mrb[158].mxu1 %v5734_v1 }
 0x335   :  { %2425 = vmatprep.mubr.f32.mxu1 %v6149_v3 }
 0x338   :  { %2426 = vmatmul.mubr.f32.vlgmr.msra.gmra.mrb[160].mxu1 %v5314_v33 }
 0x339   :  { %3590 = vmatpush1.bf16.msra.mxu1 %v3589_v23  ;;  %2431 = vmatprep.mubr.f32.mxu1 %v6149_v3  ;;  %v3516_v23 = vld [vmem:[%s6072_s2 + $0x2e8] sm:$0xff] }
 0x33a   :  { %3592 = vmatprep.subr.bf16.mxu1 %v3591_v49  ;;  %v3518_v49 = vld [vmem:[%s6072_s2 + $0x2f8] sm:$0xff] }
 0x33b   :  { %v3615_v14 = vpack.c.bf16 %v3518_v49, %v3516_v23 }
 0x33c   :  { %2432 = vmatmul.mubr.f32.gmra.mrb[162].mxu1 %v5331_v45 }
 0x33d   :  { %2437 = vmatprep.mubr.f32.mxu1 %v6149_v3  ;;  %3594 = vmatpush1.bf16.msra.mxu1 %v3593_v18  ;;  %v3617_v18 = vpack.c.bf16 %v3517_v21, %v3515_v50 }
 0x33e   :  { %3596 = vmatprep.subr.bf16.mxu1 %v3595_v6  ;;  %v6255_v6 = vld [vmem:[#allocation6_spill] sm:$0xff] }
 0x340   :  { %2438 = vmatmul.mubr.f32.gmra.mrb[164].mxu1 %v5348_v30 }
 0x341   :  { %2443 = vmatprep.mubr.f32.mxu1 %v6149_v3  ;;  %3598 = vmatpush1.bf16.msra.mxu1 %v3597_v35 }
 0x342   :  { %3600 = vmatprep.subr.bf16.mxu1 %v3599_v20 }
 0x344   :  { %2444 = vmatmul.mubr.f32.gmra.mrb[166].mxu1 %v5368_v8 }
 0x345   :  { %2449 = vmatprep.mubr.f32.mxu1 %v6149_v3  ;;  %3602 = vmatpush1.bf16.msra.mxu1 %v3601_v34 }
 0x346   :  { %3604 = vmatprep.subr.bf16.mxu1 %v3603_v27 }
 0x348   :  { %2450 = vmatmul.mubr.f32.gmra.mrb[168].mxu1 %v5382_v29 }
 0x349   :  { %2455 = vmatprep.mubr.f32.mxu1 %v6149_v3  ;;  %3606 = vmatpush1.bf16.msra.mxu1 %v3605_v2 }
 0x34a   :  { %3608 = vmatprep.subr.bf16.mxu1 %v3607_v54 }
 0x34c   :  { %2456 = vmatmul.mubr.f32.gmra.mrb[170].mxu1 %v5390_v38 }
 0x34d   :  { %2461 = vmatprep.mubr.f32.mxu1 %v6149_v3  ;;  %3610 = vmatpush1.bf16.msra.mxu1 %v3609_v59 }
 0x34e   :  { %3612 = vmatprep.subr.bf16.mxu1 %v3611_v47 }
 0x350   :  { %2462 = vmatmul.mubr.f32.gmra.mrb[172].mxu1 %v5404_v15 }
 0x351   :  { %2467 = vmatprep.mubr.f32.mxu1 %v6149_v3  ;;  %3614 = vmatpush1.bf16.msra.mxu1 %v3613_v31 }
 0x352   :  { %3616 = vmatprep.subr.bf16.mxu1 %v3615_v14 }
 0x354   :  { %2468 = vmatmul.mubr.f32.gmra.mrb[174].mxu1 %v5415_v61 }
 0x355   :  { %2473 = vmatprep.mubr.f32.mxu1 %v6149_v3  ;;  %3618 = vmatpush1.bf16.msra.mxu1 %v3617_v18 }
 0x358   :  { %2474 = vmatmul.mubr.f32.gmra.mrb[96].mxu1 %v5483_v22 }
 0x359   :  { %2479 = vmatprep.mubr.f32.mxu1 %v6149_v3 }
 0x35c   :  { %2480 = vmatmul.mubr.f32.gmra.mrb[98].mxu1 %v5496_v19 }
 0x35d   :  { %2485 = vmatprep.mubr.f32.mxu1 %v6149_v3 }
 0x360   :  { %2486 = vmatmul.mubr.f32.gmra.mrb[100].mxu1 %v5506_v16 }
 0x361   :  { %2491 = vmatprep.mubr.f32.mxu1 %v6149_v3 }
 0x364   :  { %2492 = vmatmul.mubr.f32.gmra.mrb[102].mxu1 %v5516_v58 }
 0x365   :  { %2497 = vmatprep.mubr.f32.mxu1 %v6149_v3 }
 0x368   :  { %2498 = vmatmul.mubr.f32.gmra.mrb[104].mxu1 %v5526_v36 }
 0x369   :  { %2503 = vmatprep.mubr.f32.mxu1 %v6149_v3 }
 0x36c   :  { %2504 = vmatmul.mubr.f32.gmra.mrb[106].mxu1 %v6255_v6 }
 0x36d   :  { %2509 = vmatprep.mubr.f32.mxu1 %v6149_v3 }
 0x370   :  { %2510 = vmatmul.mubr.f32.gmra.mrb[108].mxu1 %v6256_v51 }
 0x371   :  { %2515 = vmatprep.mubr.f32.mxu1 %v6149_v3 }
 0x374   :  { %2516 = vmatmul.mubr.f32.gmra.mrb[110].mxu1 %v6257_v17 }
 0x375   :  { %2521 = vmatprep.mubr.f32.mxu1 %v6149_v3 }
 0x378   :  { %2522 = vmatmul.mubr.f32.gmra.mrb[112].mxu1 %v5600_v46 }
 0x379   :  { %2527 = vmatprep.mubr.f32.mxu1 %v6149_v3 }
 0x37c   :  { %2528 = vmatmul.mubr.f32.gmra.mrb[114].mxu1 %v5607_v25 }
 0x37d   :  { %2533 = vmatprep.mubr.f32.mxu1 %v6149_v3 }
 0x380   :  { %2534 = vmatmul.mubr.f32.gmra.mrb[116].mxu1 %v5614_v63 }
 0x381   :  { %2539 = vmatprep.mubr.f32.mxu1 %v6149_v3 }
 0x384   :  { %2540 = vmatmul.mubr.f32.gmra.mrb[118].mxu1 %v5621_v7 }
 0x385   :  { %2545 = vmatprep.mubr.f32.mxu1 %v6149_v3 }
 0x388   :  { %2546 = vmatmul.mubr.f32.gmra.mrb[120].mxu1 %v5631_v44 }
 0x389   :  { %2551 = vmatprep.mubr.f32.mxu1 %v6149_v3 }
 0x38c   :  { %2552 = vmatmul.mubr.f32.gmra.mrb[122].mxu1 %v5641_v4 }
 0x38d   :  { %2557 = vmatprep.mubr.f32.mxu1 %v6149_v3 }
 0x390   :  { %2558 = vmatmul.mubr.f32.gmra.mrb[124].mxu1 %v5651_v41 }
 0x391   :  { %2563 = vmatprep.mubr.f32.mxu1 %v6149_v3 }
 0x394   :  { %2564 = vmatmul.mubr.f32.gmra.mrb[126].mxu1 %v5661_v62 }
 0x395   :  { %2569 = vmatprep.mubr.f32.mxu1 %v6149_v3 }
 0x398   :  { %2570 = vmatmul.mubr.f32.gmra.mrb[128].mxu1 %v5671_v60 }
 0x399   :  { %2575 = vmatprep.mubr.f32.mxu1 %v6149_v3 }
 0x39c   :  { %2576 = vmatmul.mubr.f32.gmra.mrb[130].mxu1 %v5681_v43 }
 0x39d   :  { %2581 = vmatprep.mubr.f32.mxu1 %v6149_v3 }
 0x3a0   :  { %2582 = vmatmul.mubr.f32.gmra.mrb[132].mxu1 %v5691_v11 }
 0x3a1   :  { %2587 = vmatprep.mubr.f32.mxu1 %v6149_v3 }
 0x3a4   :  { %2588 = vmatmul.mubr.f32.gmra.mrb[134].mxu1 %v5701_v48 }
 0x3a5   :  { %2593 = vmatprep.mubr.f32.mxu1 %v6149_v3 }
 0x3a8   :  { %2594 = vmatmul.mubr.f32.gmra.mrb[136].mxu1 %v5711_v57 }
 0x3a9   :  { %2599 = vmatprep.mubr.f32.mxu1 %v6149_v3 }
 0x3ac   :  { %2600 = vmatmul.mubr.f32.gmra.mrb[138].mxu1 %v5721_v26 }
 0x3ad   :  { %2605 = vmatprep.mubr.f32.mxu1 %v6149_v3 }
 0x3b0   :  { %2606 = vmatmul.mubr.f32.gmra.mrb[140].mxu1 %v5729_v55 }
 0x3b1   :  { %2611 = vmatprep.mubr.f32.mxu1 %v6149_v3 }
 0x3b4   :  { %2612 = vmatmul.mubr.f32.gmra.mrb[142].mxu1 %v5734_v1 }
 0x3b5   :  { %2779 = vmatprep.mubr.f32.mxu1 %v6149_v3 }
 0x3b8   :  { %2780 = vmatmul.mubr.f32.vlgmr.msra.gmra.mrb[176].mxu1 %v5314_v33 }
 0x3b9   :  { %2783 = vmatprep.mubr.f32.mxu1 %v6149_v3 }
 0x3bc   :  { %2784 = vmatmul.mubr.f32.gmra.mrb[178].mxu1 %v5331_v45 }
 0x3bd   :  { %2787 = vmatprep.mubr.f32.mxu1 %v6149_v3 }
 0x3c0   :  { %2788 = vmatmul.mubr.f32.gmra.mrb[180].mxu1 %v5348_v30 }
 0x3c1   :  { %2791 = vmatprep.mubr.f32.mxu1 %v6149_v3 }
 0x3c4   :  { %2792 = vmatmul.mubr.f32.gmra.mrb[182].mxu1 %v5368_v8 }
 0x3c5   :  { %2795 = vmatprep.mubr.f32.mxu1 %v6149_v3 }
 0x3c8   :  { %2796 = vmatmul.mubr.f32.gmra.mrb[184].mxu1 %v5382_v29 }
 0x3c9   :  { %2799 = vmatprep.mubr.f32.mxu1 %v6149_v3 }
 0x3cc   :  { %2800 = vmatmul.mubr.f32.gmra.mrb[186].mxu1 %v5390_v38 }
 0x3cd   :  { %2803 = vmatprep.mubr.f32.mxu1 %v6149_v3 }
 0x3d0   :  { %2804 = vmatmul.mubr.f32.gmra.mrb[188].mxu1 %v5404_v15 }
 0x3d1   :  { %2807 = vmatprep.mubr.f32.mxu1 %v6149_v3 }
 0x3d4   :  { %2808 = vmatmul.mubr.f32.gmra.mrb[190].mxu1 %v5415_v61 }
 0x3d5   :  { %2811 = vmatprep.mubr.f32.mxu1 %v6149_v3 }
 0x3d8   :  { %2812 = vmatmul.mubr.f32.gmra.mrb[160].mxu1 %v5483_v22 }
 0x3d9   :  { %2817 = vmatprep.mubr.f32.mxu1 %v6149_v3 }
 0x3dc   :  { %2818 = vmatmul.mubr.f32.gmra.mrb[162].mxu1 %v5496_v19 }
 0x3dd   :  { %2823 = vmatprep.mubr.f32.mxu1 %v6149_v3 }
 0x3e0   :  { %2824 = vmatmul.mubr.f32.gmra.mrb[164].mxu1 %v5506_v16 }
 0x3e1   :  { %2829 = vmatprep.mubr.f32.mxu1 %v6149_v3 }
 0x3e4   :  { %2830 = vmatmul.mubr.f32.gmra.mrb[166].mxu1 %v5516_v58 }
 0x3e5   :  { %2835 = vmatprep.mubr.f32.mxu1 %v6149_v3 }
 0x3e8   :  { %2836 = vmatmul.mubr.f32.gmra.mrb[168].mxu1 %v5526_v36 }
 0x3e9   :  { %2841 = vmatprep.mubr.f32.mxu1 %v6149_v3 }
 0x3eb   :  { %v2297_v33 = vpop.f32.mrb[144].mxu1 }
 0x3ec   :  { %v2298_v45 = vpop.f32.mrb[145].mxu1  ;;  %2842 = vmatmul.mubr.f32.gmra.mrb[170].mxu1 %v6255_v6 }
 0x3ed   :  { %2847 = vmatprep.mubr.f32.mxu1 %v6149_v3 }
 0x3ef   :  { %v2301_v30 = vpop.f32.mrb[146].mxu1 }
 0x3f0   :  { %v2302_v8 = vpop.f32.mrb[147].mxu1  ;;  %2848 = vmatmul.mubr.f32.gmra.mrb[172].mxu1 %v6256_v51 }
 0x3f1   :  { %2853 = vmatprep.mubr.f32.mxu1 %v6149_v3 }
 0x3f3   :  { %v2305_v29 = vpop.f32.mrb[148].mxu1 }
 0x3f4   :  { %v2306_v38 = vpop.f32.mrb[149].mxu1  ;;  %2854 = vmatmul.mubr.f32.gmra.mrb[174].mxu1 %v6257_v17 }
 0x3f5   :  { %2859 = vmatprep.mubr.f32.mxu1 %v6149_v3 }
 0x3f7   :  { %v2309_v15 = vpop.f32.mrb[150].mxu1 }
 0x3f8   :  { %v2310_v61 = vpop.f32.mrb[151].mxu1  ;;  %2860 = vmatmul.mubr.f32.gmra.mrb[96].mxu1 %v5600_v46 }
 0x3f9   :  { %2865 = vmatprep.mubr.f32.mxu1 %v6149_v3 }
 0x3fb   :  { %v2313_v22 = vpop.f32.mrb[152].mxu1 }
 0x3fc   :  { %v2314_v19 = vpop.f32.mrb[153].mxu1  ;;  %2866 = vmatmul.mubr.f32.gmra.mrb[98].mxu1 %v5607_v25 }
 0x3fd   :  { %2871 = vmatprep.mubr.f32.mxu1 %v6149_v3 }
 0x3ff   :  { %v2317_v16 = vpop.f32.mrb[154].mxu1 }
 0x400   :  { %v2318_v58 = vpop.f32.mrb[155].mxu1  ;;  %2872 = vmatmul.mubr.f32.gmra.mrb[100].mxu1 %v5614_v63 }
 0x401   :  { %2877 = vmatprep.mubr.f32.mxu1 %v6149_v3 }
 0x403   :  { %v2321_v36 = vpop.f32.mrb[156].mxu1 }
 0x404   :  { %v2322_v24 = vpop.f32.mrb[157].mxu1  ;;  %2878 = vmatmul.mubr.f32.gmra.mrb[102].mxu1 %v5621_v7 }
 0x405   :  { %2883 = vmatprep.mubr.f32.mxu1 %v6149_v3 }
 0x407   :  { %v2325_v46 = vpop.f32.mrb[158].mxu1 }
 0x408   :  { %v2326_v52 = vpop.f32.mrb[159].mxu1  ;;  %2884 = vmatmul.mubr.f32.gmra.mrb[104].mxu1 %v5631_v44 }
 0x409   :  { %2889 = vmatprep.mubr.f32.mxu1 %v6149_v3 }
 0x40c   :  { %2890 = vmatmul.mubr.f32.gmra.mrb[106].mxu1 %v5641_v4 }
 0x40d   :  { %2895 = vmatprep.mubr.f32.mxu1 %v6149_v3 }
 0x410   :  { %2896 = vmatmul.mubr.f32.gmra.mrb[108].mxu1 %v5651_v41 }
 0x411   :  { %2901 = vmatprep.mubr.f32.mxu1 %v6149_v3 }
 0x414   :  { %2902 = vmatmul.mubr.f32.gmra.mrb[110].mxu1 %v5661_v62 }
 0x415   :  { %2907 = vmatprep.mubr.f32.mxu1 %v6149_v3 }
 0x418   :  { %2908 = vmatmul.mubr.f32.gmra.mrb[112].mxu1 %v5671_v60 }
 0x419   :  { %2913 = vmatprep.mubr.f32.mxu1 %v6149_v3 }
 0x41c   :  { %2914 = vmatmul.mubr.f32.gmra.mrb[114].mxu1 %v5681_v43 }
 0x41d   :  { %2919 = vmatprep.mubr.f32.mxu1 %v6149_v3 }
 0x420   :  { %2920 = vmatmul.mubr.f32.gmra.mrb[116].mxu1 %v5691_v11 }
 0x421   :  { %2925 = vmatprep.mubr.f32.mxu1 %v6149_v3 }
 0x424   :  { %2926 = vmatmul.mubr.f32.gmra.mrb[118].mxu1 %v5701_v48 }
 0x425   :  { %2931 = vmatprep.mubr.f32.mxu1 %v6149_v3 }
 0x428   :  { %2932 = vmatmul.mubr.f32.gmra.mrb[120].mxu1 %v5711_v57 }
 0x429   :  { %2937 = vmatprep.mubr.f32.mxu1 %v6149_v3 }
 0x42c   :  { %2938 = vmatmul.mubr.f32.gmra.mrb[122].mxu1 %v5721_v26 }
 0x42d   :  { %2943 = vmatprep.mubr.f32.mxu1 %v6149_v3 }
 0x430   :  { %2944 = vmatmul.mubr.f32.gmra.mrb[124].mxu1 %v5729_v55 }
 0x431   :  { %2949 = vmatprep.mubr.f32.mxu1 %v6149_v3 }
 0x434   :  { %2950 = vmatmul.mubr.f32.gmra.mrb[126].mxu1 %v5734_v1 }
 0x46b   :  { %v5955_v25 = vpop.f32.mrb[128].mxu1 }
 0x46c   :  { %v5957_v63 = vpop.f32.mrb[129].mxu1 }
 0x46d   :  { %v3044_v7 = vmax.f32 %v5955_v25, %v5957_v63 }
 0x46f   :  { %v5961_v44 = vpop.f32.mrb[130].mxu1 }
 0x470   :  { %v5963_v4 = vpop.f32.mrb[131].mxu1 }
 0x471   :  { %v3045_v41 = vmax.f32 %v5961_v44, %v5963_v4 }
 0x473   :  { %v5967_v62 = vpop.f32.mrb[132].mxu1 }
 0x474   :  { %v5969_v60 = vpop.f32.mrb[133].mxu1 }
 0x475   :  { %v3046_v3 = vmax.f32 %v5967_v62, %v5969_v60 }
 0x477   :  { %v5973_v43 = vpop.f32.mrb[134].mxu1 }
 0x478   :  { %v5975_v11 = vpop.f32.mrb[135].mxu1 }
 0x479   :  { %v3047_v48 = vmax.f32 %v5973_v43, %v5975_v11 }
 0x47b   :  { %v5979_v57 = vpop.f32.mrb[136].mxu1 }
 0x47c   :  { %v5981_v26 = vpop.f32.mrb[137].mxu1 }
 0x47d   :  { %v3048_v55 = vmax.f32 %v5979_v57, %v5981_v26  ;;  %v3521_v26 = vld [vmem:[%s6076_s6] ss:$0 sm:$0xff] }
 0x47f   :  { %v5985_v1 = vpop.f32.mrb[138].mxu1 }
 0x480   :  { %v5987_v35 = vpop.f32.mrb[139].mxu1 }
 0x481   :  { %v3049_v20 = vmax.f32 %v5985_v1, %v5987_v35 }
 0x483   :  { %v5991_v28 = vpop.f32.mrb[140].mxu1 }
 0x484   :  { %v5993_v12 = vpop.f32.mrb[141].mxu1 }
 0x485   :  { %v3050_v10 = vmax.f32 %v5991_v28, %v5993_v12 }
 0x487   :  { %v5997_v42 = vpop.f32.mrb[142].mxu1 }
 0x488   :  { %v5999_v34 = vpop.f32.mrb[143].mxu1 }
 0x489   :  { %v3051_v27 = vmax.f32 %v5997_v42, %v5999_v34  ;;  %v3522_v42 = vld [vmem:[#allocation2] ss:$0 sm:$0xff] }
 0x48b   :  { %v2781_v56 = vpop.f32.mrb[176].mxu1 }
 0x48c   :  { %v2782_v5 = vpop.f32.mrb[177].mxu1 }
 0x48f   :  { %v2785_v0 = vpop.f32.mrb[178].mxu1 }
 0x490   :  { %v2786_v32 = vpop.f32.mrb[179].mxu1 }
 0x493   :  { %v2789_v2 = vpop.f32.mrb[180].mxu1 }
 0x494   :  { %v2790_v54 = vpop.f32.mrb[181].mxu1 }
 0x497   :  { %v2793_v53 = vpop.f32.mrb[182].mxu1 }
 0x498   :  { %v2794_v37 = vpop.f32.mrb[183].mxu1 }
 0x49b   :  { %v2797_v39 = vpop.f32.mrb[184].mxu1 }
 0x49c   :  { %v2798_v40 = vpop.f32.mrb[185].mxu1 }
 0x49f   :  { %v2801_v59 = vpop.f32.mrb[186].mxu1 }
 0x4a0   :  { %v2802_v47 = vpop.f32.mrb[187].mxu1 }
 0x4a3   :  { %v2805_v13 = vpop.f32.mrb[188].mxu1 }
 0x4a4   :  { %v2806_v9 = vpop.f32.mrb[189].mxu1 }
 0x4a7   :  { %v2809_v23 = vpop.f32.mrb[190].mxu1 }
 0x4a8   :  { %v2810_v49 = vpop.f32.mrb[191].mxu1 }
 0x4ab   :  { %v2813_v31 = vpop.f32.mrb[160].mxu1 }
 0x4ac   :  { %v2815_v14 = vpop.f32.mrb[161].mxu1 }
 0x4ad   :  { %v3020_v50 = vmax.f32 %v2813_v31, %v2815_v14  ;;  %v6006_v14 = vld [vmem:[%s6074_s4] ss:$0 sm:$0xff] }
 0x4af   :  { %v2819_v21 = vpop.f32.mrb[162].mxu1 }
 0x4b0   :  { %v2821_v18 = vpop.f32.mrb[163].mxu1 }
 0x4b1   :  { %v3021_v6 = vmax.f32 %v2819_v21, %v2821_v18 }
 0x4b3   :  { %v2825_v51 = vpop.f32.mrb[164].mxu1 }
 0x4b4   :  { %v2827_v17 = vpop.f32.mrb[165].mxu1 }
 0x4b5   :  { %v3022_v33 = vmax.f32 %v2825_v51, %v2827_v17 }
 0x4b7   :  { %v2831_v45 = vpop.f32.mrb[166].mxu1 }
 0x4b8   :  { %v2833_v30 = vpop.f32.mrb[167].mxu1 }
 0x4b9   :  { %v3023_v8 = vmax.f32 %v2831_v45, %v2833_v30 }
 0x4bb   :  { %v2837_v29 = vpop.f32.mrb[168].mxu1 }
 0x4bc   :  { %v2839_v38 = vpop.f32.mrb[169].mxu1 }
 0x4bd   :  { %v3024_v15 = vmax.f32 %v2837_v29, %v2839_v38 }
 0x4bf   :  { %v2843_v61 = vpop.f32.mrb[170].mxu1 }
 0x4c0   :  { %v2845_v22 = vpop.f32.mrb[171].mxu1 }
 0x4c1   :  { %v3025_v19 = vmax.f32 %v2843_v61, %v2845_v22 }
 0x4c3   :  { %v2849_v16 = vpop.f32.mrb[172].mxu1 }
 0x4c4   :  { %v2851_v58 = vpop.f32.mrb[173].mxu1 }
 0x4c5   :  { %v3026_v36 = vmax.f32 %v2849_v16, %v2851_v58 }
 0x4c7   :  { %v2855_v24 = vpop.f32.mrb[174].mxu1 }
 0x4c8   :  { %v2857_v46 = vpop.f32.mrb[175].mxu1 }
 0x4c9   :  { %v3027_v52 = vmax.f32 %v2855_v24, %v2857_v46 }
 0x4cb   :  { %v2861_v56 = vpop.f32.mrb[96].mxu1 }
 0x4cc   :  { %v2863_v5 = vpop.f32.mrb[97].mxu1 }
 0x4cd   :  { %v3028_v0 = vmax.f32 %v2861_v56, %v2863_v5 }
 0x4cf   :  { %v3052_v32 = vmax.f32 %v3020_v50, %v3028_v0  ;;  %v2867_v2 = vpop.f32.mrb[98].mxu1 }
 0x4d0   :  { %v2869_v54 = vpop.f32.mrb[99].mxu1 }
 0x4d1   :  { %v3029_v53 = vmax.f32 %v2867_v2, %v2869_v54  ;;  %v3075_v18 = vadd.f32 %v6006_v14, %v3052_v32 }
 0x4d3   :  { %v3053_v37 = vmax.f32 %v3021_v6, %v3029_v53  ;;  %v2873_v39 = vpop.f32.mrb[100].mxu1  ;;  %v3091_v30 = vmax.f32 %v3075_v18, 0.0 }
 0x4d4   :  { %v2875_v40 = vpop.f32.mrb[101].mxu1 }
 0x4d5   :  { %v3030_v59 = vmax.f32 %v2873_v39, %v2875_v40  ;;  %v3076_v29 = vadd.f32 %v6006_v14, %v3053_v37 }
 0x4d7   :  { %v3054_v47 = vmax.f32 %v3022_v33, %v3030_v59  ;;  %v2879_v13 = vpop.f32.mrb[102].mxu1  ;;  %v3092_v46 = vmax.f32 %v3076_v29, 0.0 }
 0x4d8   :  { %v2881_v9 = vpop.f32.mrb[103].mxu1 }
 0x4d9   :  { %v3031_v23 = vmax.f32 %v2879_v13, %v2881_v9  ;;  %v3077_v56 = vadd.f32 %v6006_v14, %v3054_v47 }
 0x4db   :  { %v3055_v49 = vmax.f32 %v3023_v8, %v3031_v23  ;;  %v2885_v31 = vpop.f32.mrb[104].mxu1  ;;  %v3093_v37 = vmax.f32 %v3077_v56, 0.0 }
 0x4dc   :  { %v2887_v21 = vpop.f32.mrb[105].mxu1 }
 0x4dd   :  { %v3032_v50 = vmax.f32 %v2885_v31, %v2887_v21 }
 0x4df   :  { %v3056_v51 = vmax.f32 %v3024_v15, %v3032_v50  ;;  %v2891_v6 = vpop.f32.mrb[106].mxu1 }
 0x4e0   :  { %v2893_v17 = vpop.f32.mrb[107].mxu1 }
 0x4e1   :  { %v3079_v45 = vadd.f32 %v6006_v14, %v3056_v51  ;;  %v3033_v33 = vmax.f32 %v2891_v6, %v2893_v17 }
 0x4e3   :  { %v3095_v8 = vmax.f32 %v3079_v45, 0.0  ;;  %v3057_v38 = vmax.f32 %v3025_v19, %v3033_v33  ;;  %v2897_v61 = vpop.f32.mrb[108].mxu1  ;;  %v3078_v19 = vadd.f32 %v6006_v14, %v3055_v49 }
 0x4e4   :  { %v2899_v22 = vpop.f32.mrb[109].mxu1 }
 0x4e5   :  { %v3080_v16 = vadd.f32 %v6006_v14, %v3057_v38  ;;  %v3034_v58 = vmax.f32 %v2897_v61, %v2899_v22  ;;  %v3107_v24 = vmul.f32 %v3095_v8, %v3091_v30  ;;  %v3094_v47 = vmax.f32 %v3078_v19, 0.0 }
 0x4e7   :  { %v3096_v15 = vmax.f32 %v3080_v16, 0.0  ;;  %v3058_v5 = vmax.f32 %v3026_v36, %v3034_v58  ;;  %v2903_v0 = vpop.f32.mrb[110].mxu1 }
 0x4e8   :  { %v2905_v32 = vpop.f32.mrb[111].mxu1 }
 0x4e9   :  { %v3081_v2 = vadd.f32 %v6006_v14, %v3058_v5  ;;  %v3035_v54 = vmax.f32 %v2903_v0, %v2905_v32  ;;  %v3108_v53 = vmul.f32 %v3096_v15, %v3092_v46 }
 0x4eb   :  { %v3097_v39 = vmax.f32 %v3081_v2, 0.0  ;;  %v3059_v40 = vmax.f32 %v3027_v52, %v3035_v54  ;;  %v2909_v59 = vpop.f32.mrb[112].mxu1 }
 0x4ec   :  { %v2911_v13 = vpop.f32.mrb[113].mxu1 }
 0x4ed   :  { %v3082_v9 = vadd.f32 %v6006_v14, %v3059_v40  ;;  %v3036_v23 = vmax.f32 %v2909_v59, %v2911_v13  ;;  %v3109_v31 = vmul.f32 %v3097_v39, %v3093_v37 }
 0x4ef   :  { %v3098_v21 = vmax.f32 %v3082_v9, 0.0  ;;  %v3060_v36 = vmax.f32 %v3036_v23, %v3044_v7  ;;  %v2915_v50 = vpop.f32.mrb[114].mxu1 }
 0x4f0   :  { %v2917_v18 = vpop.f32.mrb[115].mxu1 }
 0x4f1   :  { %v3037_v51 = vmax.f32 %v2915_v50, %v2917_v18  ;;  %v3110_v6 = vmul.f32 %v3098_v21, %v3094_v47  ;;  %v3083_v44 = vadd.f32 %v6006_v14, %v3060_v36 }
 0x4f3   :  { %v3061_v52 = vmax.f32 %v3037_v51, %v3045_v41  ;;  %v2921_v49 = vpop.f32.mrb[116].mxu1 }
 0x4f4   :  { %v2923_v17 = vpop.f32.mrb[117].mxu1 }
 0x4f5   :  { %v3038_v45 = vmax.f32 %v2921_v49, %v2923_v17  ;;  %v3084_v22 = vadd.f32 %v6006_v14, %v3061_v52 }
 0x4f7   :  { %v3062_v33 = vmax.f32 %v3038_v45, %v3046_v3  ;;  %v2927_v30 = vpop.f32.mrb[118].mxu1  ;;  %v3099_v3 = vmax.f32 %v3083_v44, 0.0  ;;  %v3100_v5 = vmax.f32 %v3084_v22, 0.0 }
 0x4f8   :  { %v2929_v29 = vpop.f32.mrb[119].mxu1 }
 0x4f9   :  { %v3039_v8 = vmax.f32 %v2927_v30, %v2929_v29  ;;  %v3085_v56 = vadd.f32 %v6006_v14, %v3062_v33 }
 0x4fb   :  { %v3063_v25 = vmax.f32 %v3039_v8, %v3047_v48  ;;  %v2933_v63 = vpop.f32.mrb[120].mxu1  ;;  %v3520_v48 = vld [vmem:[%s6075_s5] ss:$0 sm:$0xff]  ;;  %v3101_v39 = vmax.f32 %v3085_v56, 0.0 }
 0x4fc   :  { %v2935_v7 = vpop.f32.mrb[121].mxu1  ;;  %v3122_v15 = vmul.f32 %v3520_v48, %v3107_v24  ;;  %v3123_v40 = vmul.f32 %v3520_v48, %v3108_v53  ;;  %v3124_v21 = vmul.f32 %v3520_v48, %v3109_v31  ;;  %v3125_v18 = vmul.f32 %v3520_v48, %v3110_v6 }
 0x4fd   :  { %v3040_v38 = vmax.f32 %v2933_v63, %v2935_v7  ;;  %v3086_v59 = vadd.f32 %v6006_v14, %v3063_v25 }
 0x4ff   :  { %v3064_v4 = vmax.f32 %v3040_v38, %v3048_v55  ;;  %v2939_v41 = vpop.f32.mrb[122].mxu1  ;;  %v3102_v23 = vmax.f32 %v3086_v59, 0.0 }
 0x500   :  { %v2941_v61 = vpop.f32.mrb[123].mxu1 }
 0x501   :  { %v3087_v62 = vadd.f32 %v6006_v14, %v3064_v4  ;;  %v3041_v60 = vmax.f32 %v2939_v41, %v2941_v61 }
 0x503   :  { %v3103_v16 = vmax.f32 %v3087_v62, 0.0  ;;  %v3065_v43 = vmax.f32 %v3041_v60, %v3049_v20  ;;  %v2945_v11 = vpop.f32.mrb[124].mxu1 }
 0x504   :  { %v2947_v57 = vpop.f32.mrb[125].mxu1 }
 0x505   :  { %v3088_v55 = vadd.f32 %v6006_v14, %v3065_v43  ;;  %v3042_v58 = vmax.f32 %v2945_v11, %v2947_v57  ;;  %v3111_v46 = vmul.f32 %v3103_v16, %v3099_v3 }
 0x507   :  { %v3104_v1 = vmax.f32 %v3088_v55, 0.0  ;;  %v3066_v35 = vmax.f32 %v3042_v58, %v3050_v10  ;;  %v2951_v20 = vpop.f32.mrb[126].mxu1  ;;  %v3133_v0 = vmul.f32 %v3521_v26, %v3111_v46 }
 0x508   :  { %v2953_v32 = vpop.f32.mrb[127].mxu1 }
 0x509   :  { %v3089_v2 = vadd.f32 %v6006_v14, %v3066_v35  ;;  %v3043_v54 = vmax.f32 %v2951_v20, %v2953_v32  ;;  %v3137_v37 = vadd.f32 %v3133_v0, %v3122_v15  ;;  %v3112_v19 = vmul.f32 %v3104_v1, %v3100_v5 }
 0x50b   :  { %v3105_v13 = vmax.f32 %v3089_v2, 0.0  ;;  %v3067_v24 = vmax.f32 %v3043_v54, %v3051_v27  ;;  %3141 = vadd.xlane.f32.xlu0 %v3137_v37  ;;  %v3134_v28 = vmul.f32 %v3521_v26, %v3112_v19 }
 0x50d   :  { %v3090_v12 = vadd.f32 %v6006_v14, %v3067_v24  ;;  %v3138_v10 = vadd.f32 %v3134_v28, %v3123_v40  ;;  %v3113_v9 = vmul.f32 %v3105_v13, %v3101_v39 }
 0x50f   :  { %v3106_v47 = vmax.f32 %v3090_v12, 0.0  ;;  %3143 = vadd.xlane.f32.xlu0 %v3138_v10  ;;  %v3135_v36 = vmul.f32 %v3521_v26, %v3113_v9 }
 0x511   :  { %v3139_v50 = vadd.f32 %v3135_v36, %v3124_v21  ;;  %v3114_v53 = vmul.f32 %v3106_v47, %v3102_v23 }
 0x513   :  { %3145 = vadd.xlane.f32.xlu1 %v3139_v50  ;;  %v3136_v51 = vmul.f32 %v3521_v26, %v3114_v53 }
 0x515   :  { %v3140_v52 = vadd.f32 %v3136_v51, %v3125_v18 }
 0x517   :  { %3147 = vadd.xlane.f32.xlu1 %v3140_v52 }
 0x598   :  { %v3142_v34 = vpop.xlane.xlu0 %3141 }
 0x599   :  { %v3156_v27 = vadd.f32 %v3522_v42, %v3142_v34 }
 0x59b   :  { %v3160_v49 = vand.u32 2147483647, %v3156_v27  ;;  %vm3176_vm1 = vcmp.ge.f32.partialorder %v3156_v27, 0.0 }
 0x59c   :  { %v3144_v17 = vpop.xlane.xlu0 %3143 }
 0x59d   :  { %v3164_v14 = vsub.f32 0.0, %v3160_v49  ;;  %v3157_v45 = vadd.f32 %v3522_v42, %v3144_v17 }
 0x59f   :  { %v3168_v33 = vmul.f32 1.442695, %v3164_v14  ;;  %v3161_v30 = vand.u32 2147483647, %v3157_v45  ;;  %vm3177_vm3 = vcmp.ge.f32.partialorder %v3157_v45, 0.0 }
 0x5a0   :  { %v3146_v29 = vpop.xlane.xlu1 %3145 }
 0x5a1   :  { %3945 = vpow2.f32 %v3168_v33  ;;  %v3165_v31 = vsub.f32 0.0, %v3161_v30  ;;  %v3158_v8 = vadd.f32 %v3522_v42, %v3146_v29 }
 0x5a3   :  { %v3170_v25 = vmul.f32 1.442695, %v3165_v31  ;;  %v3162_v63 = vand.u32 2147483647, %v3158_v8  ;;  %vm3178_vm4 = vcmp.ge.f32.partialorder %v3158_v8, 0.0 }
 0x5a4   :  { %v3148_v7 = vpop.xlane.xlu1 %3147 }
 0x5a5   :  { %3947 = vpow2.f32 %v3170_v25  ;;  %v3166_v6 = vsub.f32 0.0, %v3162_v63  ;;  %v3159_v38 = vadd.f32 %v3522_v42, %v3148_v7 }
 0x5a7   :  { %v3172_v44 = vmul.f32 1.442695, %v3166_v6  ;;  %v3163_v4 = vand.u32 2147483647, %v3159_v38  ;;  %vm3179_vm5 = vcmp.ge.f32.partialorder %v3159_v38, 0.0 }
 0x5a9   :  { %3949 = vpow2.f32 %v3172_v44  ;;  %v3167_v41 = vsub.f32 0.0, %v3163_v4 }
 0x5ab   :  { %v3946_v61 = vpop.eup %3945  ;;  %v3174_v62 = vmul.f32 1.442695, %v3167_v41 }
 0x5ac   :  { %v3184_v60 = vadd.f32 1.0, %v3946_v61  ;;  %v3180_v57 = vsel %vm3176_vm1, 1.0, %v3946_v61 }
 0x5ad   :  { %3951 = vpow2.f32 %v3174_v62 }
 0x5ae   :  { %3953 = vrcp.f32 %v3184_v60 }
 0x5af   :  { %v3948_v3 = vpop.eup %3947 }
 0x5b0   :  { %v3185_v22 = vadd.f32 1.0, %v3948_v3  ;;  %v3181_v46 = vsel %vm3177_vm3, 1.0, %v3948_v3 }
 0x5b2   :  { %3955 = vrcp.f32 %v3185_v22 }
 0x5b3   :  { %v3950_v16 = vpop.eup %3949 }
 0x5b4   :  { %v3186_v43 = vadd.f32 1.0, %v3950_v16  ;;  %v3182_v5 = vsel %vm3178_vm4, 1.0, %v3950_v16 }
 0x5b6   :  { %3957 = vrcp.f32 %v3186_v43 }
 0x5b7   :  { %v3952_v11 = vpop.eup %3951 }
 0x5b8   :  { %v3954_v48 = vpop.eup %3953  ;;  %v3187_v26 = vadd.f32 1.0, %v3952_v11  ;;  %v3183_v20 = vsel %vm3179_vm5, 1.0, %v3952_v11 }
 0x5b9   :  { %v3189_v55 = vmul.f32 %v3954_v48, %v3180_v57 }
 0x5ba   :  { %3959 = vrcp.f32 %v3187_v26 }
 0x5bb   :  { %3197 = vst.msk [vmem:[%s6078_s8] sm:$0xff] %vm3196_vm2, %v3189_v55 }
 0x5bc   :  { %v3956_v58 = vpop.eup %3955 }
 0x5bd   :  { %v3191_v56 = vmul.f32 %v3956_v58, %v3181_v46 }
 0x5bf   :  { %3198 = vst.msk [vmem:[%s6078_s8 + $0x8] sm:$0xff] %vm3196_vm2, %v3191_v56 }
 0x5c0   :  { %v3958_v15 = vpop.eup %3957 }
 0x5c1   :  { %v3193_v1 = vmul.f32 %v3958_v15, %v3182_v5 }
 0x5c3   :  { %3199 = vst.msk [vmem:[%s6078_s8 + $0x10] sm:$0xff] %vm3196_vm2, %v3193_v1 }
 0x5c4   :  { %v3960_v35 = vpop.eup %3959 }
 0x5c5   :  { %v3195_v0 = vmul.f32 %v3960_v35, %v3183_v20 }
 0x5c7   :  { %3200 = vst.msk [vmem:[%s6078_s8 + $0x18] sm:$0xff] %vm3196_vm2, %v3195_v0 }
 0x5c8   :  { %3205 = vsyncpa [#allocation4], 1 }

</bundles_post_ra>
